<compile_context>
chip_gen: v5e
topology: v5e:2x2
jax: 0.10.0
libtpu: 0.0.40
codegen_flags: <defaults>
</compile_context>

<pallas_src>
import functools

import numpy as np

import jax
import jax.numpy as jnp
from jax.experimental import pallas as pl
from jax.experimental.pallas import tpu as pltpu


_K = 4        # conv kernel size
_STRIDE = 2   # conv stride
_PAD = 1      # conv padding


# ----------------------------------------------------------------------------
# Parameter init (matches the PyTorch module's layer shapes)
# ----------------------------------------------------------------------------
def init_params(key, img_channels=1, hidden_channels=8, latent_dim=8):
    hc = hidden_channels
    latent_half = int(latent_dim / 2)
    unflatten_dim = (3, 7)
    fc_in = int(4 * hc * unflatten_dim[0] * unflatten_dim[1] * (3 / 7))  # == 36*hc
    ks = jax.random.split(key, 8)
    sc = 0.05
    return {
        "w1": sc * jax.random.normal(ks[0], (hc, img_channels, _K, _K), jnp.float32),
        "b1": sc * jax.random.normal(ks[1], (hc,), jnp.float32),
        "w2": sc * jax.random.normal(ks[2], (2 * hc, hc, _K, _K), jnp.float32),
        "b2": sc * jax.random.normal(ks[3], (2 * hc,), jnp.float32),
        "w3": sc * jax.random.normal(ks[4], (4 * hc, 2 * hc, _K, _K), jnp.float32),
        "b3": sc * jax.random.normal(ks[5], (4 * hc,), jnp.float32),
        "wl": sc * jax.random.normal(ks[6], (latent_half, fc_in), jnp.float32),
        "bl": sc * jax.random.normal(ks[7], (latent_half,), jnp.float32),
    }


# ----------------------------------------------------------------------------
# Init-time folding of conv weights + padding into matmul-ready matrices
# (block-diagonal over the two image halves, since backbone weights are shared)
# ----------------------------------------------------------------------------
def _conv_out_size(n):
    return (n + 2 * _PAD - _K) // _STRIDE + 1


def _build_conv_mats(w, b, h_in, w_in):
    """R_kh (row gather + row pad), block-diag M_kh (col gather + pad + weights), bias."""
    w = np.asarray(w)
    b = np.asarray(b)
    c_out, c_in = int(w.shape[0]), int(w.shape[1])
    h_out, w_out = _conv_out_size(h_in), _conv_out_size(w_in)

    R = np.zeros((_K, h_out, h_in), np.float32)
    M_half = np.zeros((_K, w_in * c_in, w_out * c_out), np.float32)
    for kh in range(_K):
        for ho in range(h_out):
            r = _STRIDE * ho + kh - _PAD
            if 0 <= r < h_in:
                R[kh, ho, r] = 1.0
        for wo in range(w_out):
            for kw in range(_K):
                wi = _STRIDE * wo + kw - _PAD
                if 0 <= wi < w_in:
                    # M_half[kh][wi*Cin + ci, wo*Cout + co] = w[co, ci, kh, kw]
                    M_half[kh,
                           wi * c_in:(wi + 1) * c_in,
                           wo * c_out:(wo + 1) * c_out] = w[:, :, kh, kw].T

    nin, nout = w_in * c_in, w_out * c_out
    M = np.zeros((_K, 2 * nin, 2 * nout), np.float32)   # block-diag over halves
    M[:, :nin, :nout] = M_half
    M[:, nin:, nout:] = M_half
    b_vec = np.tile(b, 2 * w_out).reshape(1, 2 * nout).astype(np.float32)
    return jnp.asarray(R), jnp.asarray(M), jnp.asarray(b_vec), h_out, w_out


def prepare_kernel_params(params, img_size=28):
    """Precompute every matrix the fused kernel needs (done once, not per forward)."""
    h = w = img_size
    r1, m1, b1, h, w = _build_conv_mats(params["w1"], params["b1"], h, w)
    r2, m2, b2, h, w = _build_conv_mats(params["w2"], params["b2"], h, w)
    r3, m3, b3, h, w = _build_conv_mats(params["w3"], params["b3"], h, w)

    # FC: PyTorch flattens NCHW -> feature index (c, h, w).  Our activation is
    # laid out [h, half*(W*C) + w*C + c], so permute the FC weight columns once
    # at init and make it block-diagonal over halves.
    c3 = int(params["w3"].shape[0])
    latent_half = int(params["wl"].shape[0])
    wl = np.asarray(params["wl"]).reshape(latent_half, c3, h, w)     # [o, c, h, w]
    wl = wl.transpose(2, 3, 1, 0).reshape(h, w * c3, latent_half)    # [h, w*C+c, o]
    n_feat = w * c3
    wl_full = np.zeros((h, 2 * n_feat, 2 * latent_half), np.float32)
    wl_full[:, :n_feat, :latent_half] = wl
    wl_full[:, n_feat:, latent_half:] = wl
    bl_full = np.tile(np.asarray(params["bl"]), 2).reshape(1, 2 * latent_half)

    return {
        "r1": r1, "m1": m1, "b1": b1,
        "r2": r2, "m2": m2, "b2": b2,
        "r3": r3, "m3": m3, "b3": b3,
        "wl": jnp.asarray(wl_full.astype(np.float32)),
        "bl": jnp.asarray(bl_full.astype(np.float32)),
    }


# ----------------------------------------------------------------------------
# Fused Pallas kernel: one grid step == nb batch items (both halves each)
# through the whole net.
# ----------------------------------------------------------------------------
def _fused_pair_backbone_kernel(x_ref, r1, m1, b1, r2, m2, b2, r3, m3, b3,
                                wl, bl, o_ref):
    nb = x_ref.shape[1]

    def conv_relu(a, r_ref, m_ref, b_ref):
        h_out = r_ref.shape[1]
        n_out = m_ref.shape[2]
        acc = jnp.zeros((h_out, n_out), jnp.float32)
        for kh in range(_K):  # static unroll over the 4 kernel rows
            g = jnp.dot(r_ref[kh], a, preferred_element_type=jnp.float32)
            acc = acc + jnp.dot(g, m_ref[kh], preferred_element_type=jnp.float32)
        return jnp.maximum(acc + b_ref[...], 0.0)

    rows = []
    for bi in range(nb):                            # static unroll over batch tile
        a = x_ref[0, bi].astype(jnp.float32)        # (H, 2*S*C), both halves on lanes
        a = conv_relu(a, r1, m1, b1)                # (14, 2*14*hc)   Dropout: identity
        a = conv_relu(a, r2, m2, b2)                # (7,  2*7*2hc)   Dropout: identity
        a = conv_relu(a, r3, m3, b3)                # (3,  2*3*4hc)

        # Flatten (h, w, c order) + Linear as 3 tiny matmuls (no in-kernel reshape).
        mu = bl[...]                                # (1, 2*latent_half)
        for h in range(a.shape[0]):
            mu = mu + jnp.dot(a[h:h + 1, :], wl[h],
                              preferred_element_type=jnp.float32)
        rows.append(mu)

    o_ref[0] = jnp.concatenate(rows, axis=0).astype(o_ref.dtype)


def _pick_batch_tile(n):
    for cand in (4, 2, 1):
        if n % cand == 0:
            return cand
    return 1


@functools.partial(jax.jit, static_argnums=(2,))
def pair_cnn_encoder(kparams, x, img_concept_size=28):
    n, c, hh, w2 = x.shape
    s = img_concept_size
    assert w2 == 2 * s

    nb = _pick_batch_tile(n)
    g = n // nb
    two_l = int(kparams["bl"].shape[-1])
    latent_half = two_l // 2

    # (N, C, H, 2S) -> (G, NB, H, 2S*C): lanes = (half, w, c).  This is the only
    # XLA layout op in the forward (a few-KiB transpose; a pure reshape for C=1).
    x_r = x.transpose(0, 2, 3, 1).reshape(g, nb, hh, 2 * s * c)

    consts = (kparams["r1"], kparams["m1"], kparams["b1"],
              kparams["r2"], kparams["m2"], kparams["b2"],
              kparams["r3"], kparams["m3"], kparams["b3"],
              kparams["wl"], kparams["bl"])

    flops = 2 * n * (
        _K * sum(r.shape[1] * r.shape[2] * m.shape[1]
                 + r.shape[1] * m.shape[1] * m.shape[2]
                 for r, m in ((kparams["r1"], kparams["m1"]),
                              (kparams["r2"], kparams["m2"]),
                              (kparams["r3"], kparams["m3"])))
        + kparams["wl"].shape[0] * kparams["wl"].shape[1] * two_l)
    bytes_accessed = (x_r.size + sum(int(a.size) for a in consts) + n * two_l) * 4

    out = pl.pallas_call(
        _fused_pair_backbone_kernel,
        out_shape=jax.ShapeDtypeStruct((g, nb, two_l), jnp.float32),
        grid_spec=pltpu.PrefetchScalarGridSpec(
            num_scalar_prefetch=0,
            grid=(g,),
            in_specs=[pl.BlockSpec((1, nb, hh, 2 * s * c), lambda i: (i, 0, 0, 0))]
                     + [pl.BlockSpec(a.shape, lambda i, _nd=a.ndim: (0,) * _nd)
                        for a in consts],
            out_specs=pl.BlockSpec((1, nb, two_l), lambda i: (i, 0, 0)),
        ),
        compiler_params=pltpu.CompilerParams(
            dimension_semantics=("parallel",)),
        cost_estimate=pl.CostEstimate(flops=int(flops), transcendentals=0,
                                      bytes_accessed=int(bytes_accessed)),
    )(x_r, *consts)

    mu = out.reshape(n, two_l)
    return mu[:, :latent_half], mu[:, latent_half:]


# ----------------------------------------------------------------------------
# Pure-JAX reference (for correctness check only)
# ----------------------------------------------------------------------------
def reference_forward(params, x, img_concept_size=28):
    def conv(h, w, b):
        y = jax.lax.conv_general_dilated(
            h, w, window_strides=(_STRIDE, _STRIDE),
            padding=((_PAD, _PAD), (_PAD, _PAD)),
            dimension_numbers=("NCHW", "OIHW", "NCHW"),
            precision=jax.lax.Precision.HIGHEST)
        return jax.nn.relu(y + b[None, :, None, None])

    def backbone(h):
        h = conv(h, params["w1"], params["b1"])
        h = conv(h, params["w2"], params["b2"])
        h = conv(h, params["w3"], params["b3"])
        flat = h.reshape(h.shape[0], -1)
        return flat @ params["wl"].T + params["bl"]

    s = img_concept_size
    return backbone(x[:, :, :, :s]), backbone(x[:, :, :, s:])


if __name__ == "__main__":
    key = jax.random.PRNGKey(0)
    k_param, k_data = jax.random.split(key)

    batch = 2
    img_channels = 1
    hidden_channels = 8     # small but structurally identical to the module
    latent_dim = 8          # -> latent_half = 4
    img_concept_size = 28   # Linear in_features is tied to 28x28 halves

    params = init_params(k_param, img_channels, hidden_channels, latent_dim)
    kparams = prepare_kernel_params(params, img_size=img_concept_size)

    x = jax.random.normal(
        k_data,
        (batch, img_channels, img_concept_size, 2 * img_concept_size),
        jnp.float32)

    mu1, mu2 = pair_cnn_encoder(kparams, x, img_concept_size)
    jax.block_until_ready((mu1, mu2))

    assert mu1.shape == (batch, latent_dim // 2)
    assert mu2.shape == (batch, latent_dim // 2)

    ref1, ref2 = reference_forward(params, x, img_concept_size)
    np.testing.assert_allclose(np.asarray(mu1), np.asarray(ref1), rtol=5e-2, atol=5e-3)
    np.testing.assert_allclose(np.asarray(mu2), np.asarray(ref2), rtol=5e-2, atol=5e-3)

    print("KERNEL_OK")
</pallas_src>

<mosaic_0001>
module attributes {stable_mosaic.version = 11 : i64} {
  func.func @_fused_pair_backbone_kernel(%arg0: i32, %arg1: memref<1x2x28x56xf32, #tpu.memory_space<vmem>>, %arg2: memref<4x14x28xf32, #tpu.memory_space<vmem>>, %arg3: memref<4x56x224xf32, #tpu.memory_space<vmem>>, %arg4: memref<1x224xf32, #tpu.memory_space<vmem>>, %arg5: memref<4x7x14xf32, #tpu.memory_space<vmem>>, %arg6: memref<4x224x224xf32, #tpu.memory_space<vmem>>, %arg7: memref<1x224xf32, #tpu.memory_space<vmem>>, %arg8: memref<4x3x7xf32, #tpu.memory_space<vmem>>, %arg9: memref<4x224x192xf32, #tpu.memory_space<vmem>>, %arg10: memref<1x192xf32, #tpu.memory_space<vmem>>, %arg11: memref<3x192x8xf32, #tpu.memory_space<vmem>>, %arg12: memref<1x8xf32, #tpu.memory_space<vmem>>, %arg13: memref<1x2x8xf32, #tpu.memory_space<vmem>>) attributes {dimension_semantics = [#tpu.dimension_semantics<parallel>], iteration_bounds = array<i64: 1>, scalar_prefetch = 0 : i64, scratch_operands = 0 : i64, tpu.core_type = #tpu.core_type<tc>, window_params = [{transform_indices = @transform_0, window_bounds = array<i64: 1, 2, 28, 56>}, {pipeline_mode = #tpu.pipeline_mode<synchronous>, transform_indices = @transform_1, window_bounds = array<i64: 4, 14, 28>}, {pipeline_mode = #tpu.pipeline_mode<synchronous>, transform_indices = @transform_2, window_bounds = array<i64: 4, 56, 224>}, {pipeline_mode = #tpu.pipeline_mode<synchronous>, transform_indices = @transform_3, window_bounds = array<i64: 1, 224>}, {pipeline_mode = #tpu.pipeline_mode<synchronous>, transform_indices = @transform_4, window_bounds = array<i64: 4, 7, 14>}, {pipeline_mode = #tpu.pipeline_mode<synchronous>, transform_indices = @transform_5, window_bounds = array<i64: 4, 224, 224>}, {pipeline_mode = #tpu.pipeline_mode<synchronous>, transform_indices = @transform_6, window_bounds = array<i64: 1, 224>}, {pipeline_mode = #tpu.pipeline_mode<synchronous>, transform_indices = @transform_7, window_bounds = array<i64: 4, 3, 7>}, {pipeline_mode = #tpu.pipeline_mode<synchronous>, transform_indices = @transform_8, window_bounds = array<i64: 4, 224, 192>}, {pipeline_mode = #tpu.pipeline_mode<synchronous>, transform_indices = @transform_9, window_bounds = array<i64: 1, 192>}, {pipeline_mode = #tpu.pipeline_mode<synchronous>, transform_indices = @transform_10, window_bounds = array<i64: 3, 192, 8>}, {pipeline_mode = #tpu.pipeline_mode<synchronous>, transform_indices = @transform_11, window_bounds = array<i64: 1, 8>}, {transform_indices = @transform_12, window_bounds = array<i64: 1, 2, 8>}]} {
    %c0 = arith.constant 0 : index
    %c0_0 = arith.constant 0 : index
    %c0_1 = arith.constant 0 : index
    %c0_2 = arith.constant 0 : index
    %0 = vector.load %arg1[%c0, %c0_0, %c0_1, %c0_2] : memref<1x2x28x56xf32, #tpu.memory_space<vmem>>, vector<1x1x28x56xf32>
    %1 = vector.shape_cast %0 : vector<1x1x28x56xf32> to vector<28x56xf32>
    %cst = arith.constant 0.000000e+00 : f32
    %2 = vector.broadcast %cst : f32 to vector<14x224xf32>
    %c0_3 = arith.constant 0 : index
    %c0_4 = arith.constant 0 : index
    %c0_5 = arith.constant 0 : index
    %3 = vector.load %arg2[%c0_3, %c0_4, %c0_5] : memref<4x14x28xf32, #tpu.memory_space<vmem>>, vector<1x14x28xf32>
    %4 = vector.shape_cast %3 : vector<1x14x28xf32> to vector<14x28xf32>
    %cst_6 = arith.constant dense<0.000000e+00> : vector<14x56xf32>
    %5 = tpu.matmul %4, %1, %cst_6 {dimension_numbers = #tpu.dot_dimension_numbers<[1], [0], [0], [1], [0, 0, 1, 1], [], []>} : vector<14x28xf32>, vector<28x56xf32>, vector<14x56xf32> -> vector<14x56xf32>
    %c0_7 = arith.constant 0 : index
    %c0_8 = arith.constant 0 : index
    %c0_9 = arith.constant 0 : index
    %6 = vector.load %arg3[%c0_7, %c0_8, %c0_9] : memref<4x56x224xf32, #tpu.memory_space<vmem>>, vector<1x56x224xf32>
    %7 = vector.shape_cast %6 : vector<1x56x224xf32> to vector<56x224xf32>
    %cst_10 = arith.constant dense<0.000000e+00> : vector<14x224xf32>
    %8 = tpu.matmul %5, %7, %cst_10 {dimension_numbers = #tpu.dot_dimension_numbers<[1], [0], [0], [1], [0, 0, 1, 1], [], []>} : vector<14x56xf32>, vector<56x224xf32>, vector<14x224xf32> -> vector<14x224xf32>
    %9 = arith.addf %2, %8 : vector<14x224xf32>
    %c1 = arith.constant 1 : index
    %c0_11 = arith.constant 0 : index
    %c0_12 = arith.constant 0 : index
    %10 = vector.load %arg2[%c1, %c0_11, %c0_12] : memref<4x14x28xf32, #tpu.memory_space<vmem>>, vector<1x14x28xf32>
    %11 = vector.shape_cast %10 : vector<1x14x28xf32> to vector<14x28xf32>
    %cst_13 = arith.constant dense<0.000000e+00> : vector<14x56xf32>
    %12 = tpu.matmul %11, %1, %cst_13 {dimension_numbers = #tpu.dot_dimension_numbers<[1], [0], [0], [1], [0, 0, 1, 1], [], []>} : vector<14x28xf32>, vector<28x56xf32>, vector<14x56xf32> -> vector<14x56xf32>
    %c1_14 = arith.constant 1 : index
    %c0_15 = arith.constant 0 : index
    %c0_16 = arith.constant 0 : index
    %13 = vector.load %arg3[%c1_14, %c0_15, %c0_16] : memref<4x56x224xf32, #tpu.memory_space<vmem>>, vector<1x56x224xf32>
    %14 = vector.shape_cast %13 : vector<1x56x224xf32> to vector<56x224xf32>
    %cst_17 = arith.constant dense<0.000000e+00> : vector<14x224xf32>
    %15 = tpu.matmul %12, %14, %cst_17 {dimension_numbers = #tpu.dot_dimension_numbers<[1], [0], [0], [1], [0, 0, 1, 1], [], []>} : vector<14x56xf32>, vector<56x224xf32>, vector<14x224xf32> -> vector<14x224xf32>
    %16 = arith.addf %9, %15 : vector<14x224xf32>
    %c2 = arith.constant 2 : index
    %c0_18 = arith.constant 0 : index
    %c0_19 = arith.constant 0 : index
    %17 = vector.load %arg2[%c2, %c0_18, %c0_19] : memref<4x14x28xf32, #tpu.memory_space<vmem>>, vector<1x14x28xf32>
    %18 = vector.shape_cast %17 : vector<1x14x28xf32> to vector<14x28xf32>
    %cst_20 = arith.constant dense<0.000000e+00> : vector<14x56xf32>
    %19 = tpu.matmul %18, %1, %cst_20 {dimension_numbers = #tpu.dot_dimension_numbers<[1], [0], [0], [1], [0, 0, 1, 1], [], []>} : vector<14x28xf32>, vector<28x56xf32>, vector<14x56xf32> -> vector<14x56xf32>
    %c2_21 = arith.constant 2 : index
    %c0_22 = arith.constant 0 : index
    %c0_23 = arith.constant 0 : index
    %20 = vector.load %arg3[%c2_21, %c0_22, %c0_23] : memref<4x56x224xf32, #tpu.memory_space<vmem>>, vector<1x56x224xf32>
    %21 = vector.shape_cast %20 : vector<1x56x224xf32> to vector<56x224xf32>
    %cst_24 = arith.constant dense<0.000000e+00> : vector<14x224xf32>
    %22 = tpu.matmul %19, %21, %cst_24 {dimension_numbers = #tpu.dot_dimension_numbers<[1], [0], [0], [1], [0, 0, 1, 1], [], []>} : vector<14x56xf32>, vector<56x224xf32>, vector<14x224xf32> -> vector<14x224xf32>
    %23 = arith.addf %16, %22 : vector<14x224xf32>
    %c3 = arith.constant 3 : index
    %c0_25 = arith.constant 0 : index
    %c0_26 = arith.constant 0 : index
    %24 = vector.load %arg2[%c3, %c0_25, %c0_26] : memref<4x14x28xf32, #tpu.memory_space<vmem>>, vector<1x14x28xf32>
    %25 = vector.shape_cast %24 : vector<1x14x28xf32> to vector<14x28xf32>
    %cst_27 = arith.constant dense<0.000000e+00> : vector<14x56xf32>
    %26 = tpu.matmul %25, %1, %cst_27 {dimension_numbers = #tpu.dot_dimension_numbers<[1], [0], [0], [1], [0, 0, 1, 1], [], []>} : vector<14x28xf32>, vector<28x56xf32>, vector<14x56xf32> -> vector<14x56xf32>
    %c3_28 = arith.constant 3 : index
    %c0_29 = arith.constant 0 : index
    %c0_30 = arith.constant 0 : index
    %27 = vector.load %arg3[%c3_28, %c0_29, %c0_30] : memref<4x56x224xf32, #tpu.memory_space<vmem>>, vector<1x56x224xf32>
    %28 = vector.shape_cast %27 : vector<1x56x224xf32> to vector<56x224xf32>
    %cst_31 = arith.constant dense<0.000000e+00> : vector<14x224xf32>
    %29 = tpu.matmul %26, %28, %cst_31 {dimension_numbers = #tpu.dot_dimension_numbers<[1], [0], [0], [1], [0, 0, 1, 1], [], []>} : vector<14x56xf32>, vector<56x224xf32>, vector<14x224xf32> -> vector<14x224xf32>
    %30 = arith.addf %23, %29 : vector<14x224xf32>
    %c0_32 = arith.constant 0 : index
    %c0_33 = arith.constant 0 : index
    %31 = vector.load %arg4[%c0_32, %c0_33] : memref<1x224xf32, #tpu.memory_space<vmem>>, vector<1x224xf32>
    %32 = vector.broadcast %31 : vector<1x224xf32> to vector<14x224xf32>
    %33 = arith.addf %30, %32 : vector<14x224xf32>
    %cst_34 = arith.constant 0.000000e+00 : f32
    %34 = vector.broadcast %cst_34 : f32 to vector<14x224xf32>
    %35 = arith.maximumf %33, %34 : vector<14x224xf32>
    %cst_35 = arith.constant 0.000000e+00 : f32
    %36 = vector.broadcast %cst_35 : f32 to vector<7x224xf32>
    %c0_36 = arith.constant 0 : index
    %c0_37 = arith.constant 0 : index
    %c0_38 = arith.constant 0 : index
    %37 = vector.load %arg5[%c0_36, %c0_37, %c0_38] : memref<4x7x14xf32, #tpu.memory_space<vmem>>, vector<1x7x14xf32>
    %38 = vector.shape_cast %37 : vector<1x7x14xf32> to vector<7x14xf32>
    %cst_39 = arith.constant dense<0.000000e+00> : vector<7x224xf32>
    %39 = tpu.matmul %38, %35, %cst_39 {dimension_numbers = #tpu.dot_dimension_numbers<[1], [0], [0], [1], [0, 0, 1, 1], [], []>} : vector<7x14xf32>, vector<14x224xf32>, vector<7x224xf32> -> vector<7x224xf32>
    %c0_40 = arith.constant 0 : index
    %c0_41 = arith.constant 0 : index
    %c0_42 = arith.constant 0 : index
    %40 = vector.load %arg6[%c0_40, %c0_41, %c0_42] : memref<4x224x224xf32, #tpu.memory_space<vmem>>, vector<1x224x224xf32>
    %41 = vector.shape_cast %40 : vector<1x224x224xf32> to vector<224x224xf32>
    %cst_43 = arith.constant dense<0.000000e+00> : vector<7x224xf32>
    %42 = tpu.matmul %39, %41, %cst_43 {dimension_numbers = #tpu.dot_dimension_numbers<[1], [0], [0], [1], [0, 0, 1, 1], [], []>} : vector<7x224xf32>, vector<224x224xf32>, vector<7x224xf32> -> vector<7x224xf32>
    %43 = arith.addf %36, %42 : vector<7x224xf32>
    %c1_44 = arith.constant 1 : index
    %c0_45 = arith.constant 0 : index
    %c0_46 = arith.constant 0 : index
    %44 = vector.load %arg5[%c1_44, %c0_45, %c0_46] : memref<4x7x14xf32, #tpu.memory_space<vmem>>, vector<1x7x14xf32>
    %45 = vector.shape_cast %44 : vector<1x7x14xf32> to vector<7x14xf32>
    %cst_47 = arith.constant dense<0.000000e+00> : vector<7x224xf32>
    %46 = tpu.matmul %45, %35, %cst_47 {dimension_numbers = #tpu.dot_dimension_numbers<[1], [0], [0], [1], [0, 0, 1, 1], [], []>} : vector<7x14xf32>, vector<14x224xf32>, vector<7x224xf32> -> vector<7x224xf32>
    %c1_48 = arith.constant 1 : index
    %c0_49 = arith.constant 0 : index
    %c0_50 = arith.constant 0 : index
    %47 = vector.load %arg6[%c1_48, %c0_49, %c0_50] : memref<4x224x224xf32, #tpu.memory_space<vmem>>, vector<1x224x224xf32>
    %48 = vector.shape_cast %47 : vector<1x224x224xf32> to vector<224x224xf32>
    %cst_51 = arith.constant dense<0.000000e+00> : vector<7x224xf32>
    %49 = tpu.matmul %46, %48, %cst_51 {dimension_numbers = #tpu.dot_dimension_numbers<[1], [0], [0], [1], [0, 0, 1, 1], [], []>} : vector<7x224xf32>, vector<224x224xf32>, vector<7x224xf32> -> vector<7x224xf32>
    %50 = arith.addf %43, %49 : vector<7x224xf32>
    %c2_52 = arith.constant 2 : index
    %c0_53 = arith.constant 0 : index
    %c0_54 = arith.constant 0 : index
    %51 = vector.load %arg5[%c2_52, %c0_53, %c0_54] : memref<4x7x14xf32, #tpu.memory_space<vmem>>, vector<1x7x14xf32>
    %52 = vector.shape_cast %51 : vector<1x7x14xf32> to vector<7x14xf32>
    %cst_55 = arith.constant dense<0.000000e+00> : vector<7x224xf32>
    %53 = tpu.matmul %52, %35, %cst_55 {dimension_numbers = #tpu.dot_dimension_numbers<[1], [0], [0], [1], [0, 0, 1, 1], [], []>} : vector<7x14xf32>, vector<14x224xf32>, vector<7x224xf32> -> vector<7x224xf32>
    %c2_56 = arith.constant 2 : index
    %c0_57 = arith.constant 0 : index
    %c0_58 = arith.constant 0 : index
    %54 = vector.load %arg6[%c2_56, %c0_57, %c0_58] : memref<4x224x224xf32, #tpu.memory_space<vmem>>, vector<1x224x224xf32>
    %55 = vector.shape_cast %54 : vector<1x224x224xf32> to vector<224x224xf32>
    %cst_59 = arith.constant dense<0.000000e+00> : vector<7x224xf32>
    %56 = tpu.matmul %53, %55, %cst_59 {dimension_numbers = #tpu.dot_dimension_numbers<[1], [0], [0], [1], [0, 0, 1, 1], [], []>} : vector<7x224xf32>, vector<224x224xf32>, vector<7x224xf32> -> vector<7x224xf32>
    %57 = arith.addf %50, %56 : vector<7x224xf32>
    %c3_60 = arith.constant 3 : index
    %c0_61 = arith.constant 0 : index
    %c0_62 = arith.constant 0 : index
    %58 = vector.load %arg5[%c3_60, %c0_61, %c0_62] : memref<4x7x14xf32, #tpu.memory_space<vmem>>, vector<1x7x14xf32>
    %59 = vector.shape_cast %58 : vector<1x7x14xf32> to vector<7x14xf32>
    %cst_63 = arith.constant dense<0.000000e+00> : vector<7x224xf32>
    %60 = tpu.matmul %59, %35, %cst_63 {dimension_numbers = #tpu.dot_dimension_numbers<[1], [0], [0], [1], [0, 0, 1, 1], [], []>} : vector<7x14xf32>, vector<14x224xf32>, vector<7x224xf32> -> vector<7x224xf32>
    %c3_64 = arith.constant 3 : index
    %c0_65 = arith.constant 0 : index
    %c0_66 = arith.constant 0 : index
    %61 = vector.load %arg6[%c3_64, %c0_65, %c0_66] : memref<4x224x224xf32, #tpu.memory_space<vmem>>, vector<1x224x224xf32>
    %62 = vector.shape_cast %61 : vector<1x224x224xf32> to vector<224x224xf32>
    %cst_67 = arith.constant dense<0.000000e+00> : vector<7x224xf32>
    %63 = tpu.matmul %60, %62, %cst_67 {dimension_numbers = #tpu.dot_dimension_numbers<[1], [0], [0], [1], [0, 0, 1, 1], [], []>} : vector<7x224xf32>, vector<224x224xf32>, vector<7x224xf32> -> vector<7x224xf32>
    %64 = arith.addf %57, %63 : vector<7x224xf32>
    %c0_68 = arith.constant 0 : index
    %c0_69 = arith.constant 0 : index
    %65 = vector.load %arg7[%c0_68, %c0_69] : memref<1x224xf32, #tpu.memory_space<vmem>>, vector<1x224xf32>
    %66 = vector.broadcast %65 : vector<1x224xf32> to vector<7x224xf32>
    %67 = arith.addf %64, %66 : vector<7x224xf32>
    %cst_70 = arith.constant 0.000000e+00 : f32
    %68 = vector.broadcast %cst_70 : f32 to vector<7x224xf32>
    %69 = arith.maximumf %67, %68 : vector<7x224xf32>
    %cst_71 = arith.constant 0.000000e+00 : f32
    %70 = vector.broadcast %cst_71 : f32 to vector<3x192xf32>
    %c0_72 = arith.constant 0 : index
    %c0_73 = arith.constant 0 : index
    %c0_74 = arith.constant 0 : index
    %71 = vector.load %arg8[%c0_72, %c0_73, %c0_74] : memref<4x3x7xf32, #tpu.memory_space<vmem>>, vector<1x3x7xf32>
    %72 = vector.shape_cast %71 : vector<1x3x7xf32> to vector<3x7xf32>
    %cst_75 = arith.constant dense<0.000000e+00> : vector<3x224xf32>
    %73 = tpu.matmul %72, %69, %cst_75 {dimension_numbers = #tpu.dot_dimension_numbers<[1], [0], [0], [1], [0, 0, 1, 1], [], []>} : vector<3x7xf32>, vector<7x224xf32>, vector<3x224xf32> -> vector<3x224xf32>
    %c0_76 = arith.constant 0 : index
    %c0_77 = arith.constant 0 : index
    %c0_78 = arith.constant 0 : index
    %74 = vector.load %arg9[%c0_76, %c0_77, %c0_78] : memref<4x224x192xf32, #tpu.memory_space<vmem>>, vector<1x224x192xf32>
    %75 = vector.shape_cast %74 : vector<1x224x192xf32> to vector<224x192xf32>
    %cst_79 = arith.constant dense<0.000000e+00> : vector<3x192xf32>
    %76 = tpu.matmul %73, %75, %cst_79 {dimension_numbers = #tpu.dot_dimension_numbers<[1], [0], [0], [1], [0, 0, 1, 1], [], []>} : vector<3x224xf32>, vector<224x192xf32>, vector<3x192xf32> -> vector<3x192xf32>
    %77 = arith.addf %70, %76 : vector<3x192xf32>
    %c1_80 = arith.constant 1 : index
    %c0_81 = arith.constant 0 : index
    %c0_82 = arith.constant 0 : index
    %78 = vector.load %arg8[%c1_80, %c0_81, %c0_82] : memref<4x3x7xf32, #tpu.memory_space<vmem>>, vector<1x3x7xf32>
    %79 = vector.shape_cast %78 : vector<1x3x7xf32> to vector<3x7xf32>
    %cst_83 = arith.constant dense<0.000000e+00> : vector<3x224xf32>
    %80 = tpu.matmul %79, %69, %cst_83 {dimension_numbers = #tpu.dot_dimension_numbers<[1], [0], [0], [1], [0, 0, 1, 1], [], []>} : vector<3x7xf32>, vector<7x224xf32>, vector<3x224xf32> -> vector<3x224xf32>
    %c1_84 = arith.constant 1 : index
    %c0_85 = arith.constant 0 : index
    %c0_86 = arith.constant 0 : index
    %81 = vector.load %arg9[%c1_84, %c0_85, %c0_86] : memref<4x224x192xf32, #tpu.memory_space<vmem>>, vector<1x224x192xf32>
    %82 = vector.shape_cast %81 : vector<1x224x192xf32> to vector<224x192xf32>
    %cst_87 = arith.constant dense<0.000000e+00> : vector<3x192xf32>
    %83 = tpu.matmul %80, %82, %cst_87 {dimension_numbers = #tpu.dot_dimension_numbers<[1], [0], [0], [1], [0, 0, 1, 1], [], []>} : vector<3x224xf32>, vector<224x192xf32>, vector<3x192xf32> -> vector<3x192xf32>
    %84 = arith.addf %77, %83 : vector<3x192xf32>
    %c2_88 = arith.constant 2 : index
    %c0_89 = arith.constant 0 : index
    %c0_90 = arith.constant 0 : index
    %85 = vector.load %arg8[%c2_88, %c0_89, %c0_90] : memref<4x3x7xf32, #tpu.memory_space<vmem>>, vector<1x3x7xf32>
    %86 = vector.shape_cast %85 : vector<1x3x7xf32> to vector<3x7xf32>
    %cst_91 = arith.constant dense<0.000000e+00> : vector<3x224xf32>
    %87 = tpu.matmul %86, %69, %cst_91 {dimension_numbers = #tpu.dot_dimension_numbers<[1], [0], [0], [1], [0, 0, 1, 1], [], []>} : vector<3x7xf32>, vector<7x224xf32>, vector<3x224xf32> -> vector<3x224xf32>
    %c2_92 = arith.constant 2 : index
    %c0_93 = arith.constant 0 : index
    %c0_94 = arith.constant 0 : index
    %88 = vector.load %arg9[%c2_92, %c0_93, %c0_94] : memref<4x224x192xf32, #tpu.memory_space<vmem>>, vector<1x224x192xf32>
    %89 = vector.shape_cast %88 : vector<1x224x192xf32> to vector<224x192xf32>
    %cst_95 = arith.constant dense<0.000000e+00> : vector<3x192xf32>
    %90 = tpu.matmul %87, %89, %cst_95 {dimension_numbers = #tpu.dot_dimension_numbers<[1], [0], [0], [1], [0, 0, 1, 1], [], []>} : vector<3x224xf32>, vector<224x192xf32>, vector<3x192xf32> -> vector<3x192xf32>
    %91 = arith.addf %84, %90 : vector<3x192xf32>
    %c3_96 = arith.constant 3 : index
    %c0_97 = arith.constant 0 : index
    %c0_98 = arith.constant 0 : index
    %92 = vector.load %arg8[%c3_96, %c0_97, %c0_98] : memref<4x3x7xf32, #tpu.memory_space<vmem>>, vector<1x3x7xf32>
    %93 = vector.shape_cast %92 : vector<1x3x7xf32> to vector<3x7xf32>
    %cst_99 = arith.constant dense<0.000000e+00> : vector<3x224xf32>
    %94 = tpu.matmul %93, %69, %cst_99 {dimension_numbers = #tpu.dot_dimension_numbers<[1], [0], [0], [1], [0, 0, 1, 1], [], []>} : vector<3x7xf32>, vector<7x224xf32>, vector<3x224xf32> -> vector<3x224xf32>
    %c3_100 = arith.constant 3 : index
    %c0_101 = arith.constant 0 : index
    %c0_102 = arith.constant 0 : index
    %95 = vector.load %arg9[%c3_100, %c0_101, %c0_102] : memref<4x224x192xf32, #tpu.memory_space<vmem>>, vector<1x224x192xf32>
    %96 = vector.shape_cast %95 : vector<1x224x192xf32> to vector<224x192xf32>
    %cst_103 = arith.constant dense<0.000000e+00> : vector<3x192xf32>
    %97 = tpu.matmul %94, %96, %cst_103 {dimension_numbers = #tpu.dot_dimension_numbers<[1], [0], [0], [1], [0, 0, 1, 1], [], []>} : vector<3x224xf32>, vector<224x192xf32>, vector<3x192xf32> -> vector<3x192xf32>
    %98 = arith.addf %91, %97 : vector<3x192xf32>
    %c0_104 = arith.constant 0 : index
    %c0_105 = arith.constant 0 : index
    %99 = vector.load %arg10[%c0_104, %c0_105] : memref<1x192xf32, #tpu.memory_space<vmem>>, vector<1x192xf32>
    %100 = vector.broadcast %99 : vector<1x192xf32> to vector<3x192xf32>
    %101 = arith.addf %98, %100 : vector<3x192xf32>
    %cst_106 = arith.constant 0.000000e+00 : f32
    %102 = vector.broadcast %cst_106 : f32 to vector<3x192xf32>
    %103 = arith.maximumf %101, %102 : vector<3x192xf32>
    %c0_107 = arith.constant 0 : index
    %c0_108 = arith.constant 0 : index
    %104 = vector.load %arg12[%c0_107, %c0_108] : memref<1x8xf32, #tpu.memory_space<vmem>>, vector<1x8xf32>
    %105 = vector.extract_strided_slice %103 {offsets = [0, 0], sizes = [1, 192], strides = [1, 1]} : vector<3x192xf32> to vector<1x192xf32>
    %c0_109 = arith.constant 0 : index
    %c0_110 = arith.constant 0 : index
    %c0_111 = arith.constant 0 : index
    %106 = vector.load %arg11[%c0_109, %c0_110, %c0_111] : memref<3x192x8xf32, #tpu.memory_space<vmem>>, vector<1x192x8xf32>
    %107 = vector.shape_cast %106 : vector<1x192x8xf32> to vector<192x8xf32>
    %cst_112 = arith.constant dense<0.000000e+00> : vector<1x8xf32>
    %108 = tpu.matmul %105, %107, %cst_112 {dimension_numbers = #tpu.dot_dimension_numbers<[1], [0], [0], [1], [0, 0, 1, 1], [], []>} : vector<1x192xf32>, vector<192x8xf32>, vector<1x8xf32> -> vector<1x8xf32>
    %109 = arith.addf %104, %108 : vector<1x8xf32>
    %110 = vector.extract_strided_slice %103 {offsets = [1, 0], sizes = [1, 192], strides = [1, 1]} : vector<3x192xf32> to vector<1x192xf32>
    %c1_113 = arith.constant 1 : index
    %c0_114 = arith.constant 0 : index
    %c0_115 = arith.constant 0 : index
    %111 = vector.load %arg11[%c1_113, %c0_114, %c0_115] : memref<3x192x8xf32, #tpu.memory_space<vmem>>, vector<1x192x8xf32>
    %112 = vector.shape_cast %111 : vector<1x192x8xf32> to vector<192x8xf32>
    %cst_116 = arith.constant dense<0.000000e+00> : vector<1x8xf32>
    %113 = tpu.matmul %110, %112, %cst_116 {dimension_numbers = #tpu.dot_dimension_numbers<[1], [0], [0], [1], [0, 0, 1, 1], [], []>} : vector<1x192xf32>, vector<192x8xf32>, vector<1x8xf32> -> vector<1x8xf32>
    %114 = arith.addf %109, %113 : vector<1x8xf32>
    %115 = vector.extract_strided_slice %103 {offsets = [2, 0], sizes = [1, 192], strides = [1, 1]} : vector<3x192xf32> to vector<1x192xf32>
    %c2_117 = arith.constant 2 : index
    %c0_118 = arith.constant 0 : index
    %c0_119 = arith.constant 0 : index
    %116 = vector.load %arg11[%c2_117, %c0_118, %c0_119] : memref<3x192x8xf32, #tpu.memory_space<vmem>>, vector<1x192x8xf32>
    %117 = vector.shape_cast %116 : vector<1x192x8xf32> to vector<192x8xf32>
    %cst_120 = arith.constant dense<0.000000e+00> : vector<1x8xf32>
    %118 = tpu.matmul %115, %117, %cst_120 {dimension_numbers = #tpu.dot_dimension_numbers<[1], [0], [0], [1], [0, 0, 1, 1], [], []>} : vector<1x192xf32>, vector<192x8xf32>, vector<1x8xf32> -> vector<1x8xf32>
    %119 = arith.addf %114, %118 : vector<1x8xf32>
    %c0_121 = arith.constant 0 : index
    %c1_122 = arith.constant 1 : index
    %c0_123 = arith.constant 0 : index
    %c0_124 = arith.constant 0 : index
    %120 = vector.load %arg1[%c0_121, %c1_122, %c0_123, %c0_124] : memref<1x2x28x56xf32, #tpu.memory_space<vmem>>, vector<1x1x28x56xf32>
    %121 = vector.shape_cast %120 : vector<1x1x28x56xf32> to vector<28x56xf32>
    %cst_125 = arith.constant 0.000000e+00 : f32
    %122 = vector.broadcast %cst_125 : f32 to vector<14x224xf32>
    %c0_126 = arith.constant 0 : index
    %c0_127 = arith.constant 0 : index
    %c0_128 = arith.constant 0 : index
    %123 = vector.load %arg2[%c0_126, %c0_127, %c0_128] : memref<4x14x28xf32, #tpu.memory_space<vmem>>, vector<1x14x28xf32>
    %124 = vector.shape_cast %123 : vector<1x14x28xf32> to vector<14x28xf32>
    %cst_129 = arith.constant dense<0.000000e+00> : vector<14x56xf32>
    %125 = tpu.matmul %124, %121, %cst_129 {dimension_numbers = #tpu.dot_dimension_numbers<[1], [0], [0], [1], [0, 0, 1, 1], [], []>} : vector<14x28xf32>, vector<28x56xf32>, vector<14x56xf32> -> vector<14x56xf32>
    %c0_130 = arith.constant 0 : index
    %c0_131 = arith.constant 0 : index
    %c0_132 = arith.constant 0 : index
    %126 = vector.load %arg3[%c0_130, %c0_131, %c0_132] : memref<4x56x224xf32, #tpu.memory_space<vmem>>, vector<1x56x224xf32>
    %127 = vector.shape_cast %126 : vector<1x56x224xf32> to vector<56x224xf32>
    %cst_133 = arith.constant dense<0.000000e+00> : vector<14x224xf32>
    %128 = tpu.matmul %125, %127, %cst_133 {dimension_numbers = #tpu.dot_dimension_numbers<[1], [0], [0], [1], [0, 0, 1, 1], [], []>} : vector<14x56xf32>, vector<56x224xf32>, vector<14x224xf32> -> vector<14x224xf32>
    %129 = arith.addf %122, %128 : vector<14x224xf32>
    %c1_134 = arith.constant 1 : index
    %c0_135 = arith.constant 0 : index
    %c0_136 = arith.constant 0 : index
    %130 = vector.load %arg2[%c1_134, %c0_135, %c0_136] : memref<4x14x28xf32, #tpu.memory_space<vmem>>, vector<1x14x28xf32>
    %131 = vector.shape_cast %130 : vector<1x14x28xf32> to vector<14x28xf32>
    %cst_137 = arith.constant dense<0.000000e+00> : vector<14x56xf32>
    %132 = tpu.matmul %131, %121, %cst_137 {dimension_numbers = #tpu.dot_dimension_numbers<[1], [0], [0], [1], [0, 0, 1, 1], [], []>} : vector<14x28xf32>, vector<28x56xf32>, vector<14x56xf32> -> vector<14x56xf32>
    %c1_138 = arith.constant 1 : index
    %c0_139 = arith.constant 0 : index
    %c0_140 = arith.constant 0 : index
    %133 = vector.load %arg3[%c1_138, %c0_139, %c0_140] : memref<4x56x224xf32, #tpu.memory_space<vmem>>, vector<1x56x224xf32>
    %134 = vector.shape_cast %133 : vector<1x56x224xf32> to vector<56x224xf32>
    %cst_141 = arith.constant dense<0.000000e+00> : vector<14x224xf32>
    %135 = tpu.matmul %132, %134, %cst_141 {dimension_numbers = #tpu.dot_dimension_numbers<[1], [0], [0], [1], [0, 0, 1, 1], [], []>} : vector<14x56xf32>, vector<56x224xf32>, vector<14x224xf32> -> vector<14x224xf32>
    %136 = arith.addf %129, %135 : vector<14x224xf32>
    %c2_142 = arith.constant 2 : index
    %c0_143 = arith.constant 0 : index
    %c0_144 = arith.constant 0 : index
    %137 = vector.load %arg2[%c2_142, %c0_143, %c0_144] : memref<4x14x28xf32, #tpu.memory_space<vmem>>, vector<1x14x28xf32>
    %138 = vector.shape_cast %137 : vector<1x14x28xf32> to vector<14x28xf32>
    %cst_145 = arith.constant dense<0.000000e+00> : vector<14x56xf32>
    %139 = tpu.matmul %138, %121, %cst_145 {dimension_numbers = #tpu.dot_dimension_numbers<[1], [0], [0], [1], [0, 0, 1, 1], [], []>} : vector<14x28xf32>, vector<28x56xf32>, vector<14x56xf32> -> vector<14x56xf32>
    %c2_146 = arith.constant 2 : index
    %c0_147 = arith.constant 0 : index
    %c0_148 = arith.constant 0 : index
    %140 = vector.load %arg3[%c2_146, %c0_147, %c0_148] : memref<4x56x224xf32, #tpu.memory_space<vmem>>, vector<1x56x224xf32>
    %141 = vector.shape_cast %140 : vector<1x56x224xf32> to vector<56x224xf32>
    %cst_149 = arith.constant dense<0.000000e+00> : vector<14x224xf32>
    %142 = tpu.matmul %139, %141, %cst_149 {dimension_numbers = #tpu.dot_dimension_numbers<[1], [0], [0], [1], [0, 0, 1, 1], [], []>} : vector<14x56xf32>, vector<56x224xf32>, vector<14x224xf32> -> vector<14x224xf32>
    %143 = arith.addf %136, %142 : vector<14x224xf32>
    %c3_150 = arith.constant 3 : index
    %c0_151 = arith.constant 0 : index
    %c0_152 = arith.constant 0 : index
    %144 = vector.load %arg2[%c3_150, %c0_151, %c0_152] : memref<4x14x28xf32, #tpu.memory_space<vmem>>, vector<1x14x28xf32>
    %145 = vector.shape_cast %144 : vector<1x14x28xf32> to vector<14x28xf32>
    %cst_153 = arith.constant dense<0.000000e+00> : vector<14x56xf32>
    %146 = tpu.matmul %145, %121, %cst_153 {dimension_numbers = #tpu.dot_dimension_numbers<[1], [0], [0], [1], [0, 0, 1, 1], [], []>} : vector<14x28xf32>, vector<28x56xf32>, vector<14x56xf32> -> vector<14x56xf32>
    %c3_154 = arith.constant 3 : index
    %c0_155 = arith.constant 0 : index
    %c0_156 = arith.constant 0 : index
    %147 = vector.load %arg3[%c3_154, %c0_155, %c0_156] : memref<4x56x224xf32, #tpu.memory_space<vmem>>, vector<1x56x224xf32>
    %148 = vector.shape_cast %147 : vector<1x56x224xf32> to vector<56x224xf32>
    %cst_157 = arith.constant dense<0.000000e+00> : vector<14x224xf32>
    %149 = tpu.matmul %146, %148, %cst_157 {dimension_numbers = #tpu.dot_dimension_numbers<[1], [0], [0], [1], [0, 0, 1, 1], [], []>} : vector<14x56xf32>, vector<56x224xf32>, vector<14x224xf32> -> vector<14x224xf32>
    %150 = arith.addf %143, %149 : vector<14x224xf32>
    %c0_158 = arith.constant 0 : index
    %c0_159 = arith.constant 0 : index
    %151 = vector.load %arg4[%c0_158, %c0_159] : memref<1x224xf32, #tpu.memory_space<vmem>>, vector<1x224xf32>
    %152 = vector.broadcast %151 : vector<1x224xf32> to vector<14x224xf32>
    %153 = arith.addf %150, %152 : vector<14x224xf32>
    %cst_160 = arith.constant 0.000000e+00 : f32
    %154 = vector.broadcast %cst_160 : f32 to vector<14x224xf32>
    %155 = arith.maximumf %153, %154 : vector<14x224xf32>
    %cst_161 = arith.constant 0.000000e+00 : f32
    %156 = vector.broadcast %cst_161 : f32 to vector<7x224xf32>
    %c0_162 = arith.constant 0 : index
    %c0_163 = arith.constant 0 : index
    %c0_164 = arith.constant 0 : index
    %157 = vector.load %arg5[%c0_162, %c0_163, %c0_164] : memref<4x7x14xf32, #tpu.memory_space<vmem>>, vector<1x7x14xf32>
    %158 = vector.shape_cast %157 : vector<1x7x14xf32> to vector<7x14xf32>
    %cst_165 = arith.constant dense<0.000000e+00> : vector<7x224xf32>
    %159 = tpu.matmul %158, %155, %cst_165 {dimension_numbers = #tpu.dot_dimension_numbers<[1], [0], [0], [1], [0, 0, 1, 1], [], []>} : vector<7x14xf32>, vector<14x224xf32>, vector<7x224xf32> -> vector<7x224xf32>
    %c0_166 = arith.constant 0 : index
    %c0_167 = arith.constant 0 : index
    %c0_168 = arith.constant 0 : index
    %160 = vector.load %arg6[%c0_166, %c0_167, %c0_168] : memref<4x224x224xf32, #tpu.memory_space<vmem>>, vector<1x224x224xf32>
    %161 = vector.shape_cast %160 : vector<1x224x224xf32> to vector<224x224xf32>
    %cst_169 = arith.constant dense<0.000000e+00> : vector<7x224xf32>
    %162 = tpu.matmul %159, %161, %cst_169 {dimension_numbers = #tpu.dot_dimension_numbers<[1], [0], [0], [1], [0, 0, 1, 1], [], []>} : vector<7x224xf32>, vector<224x224xf32>, vector<7x224xf32> -> vector<7x224xf32>
    %163 = arith.addf %156, %162 : vector<7x224xf32>
    %c1_170 = arith.constant 1 : index
    %c0_171 = arith.constant 0 : index
    %c0_172 = arith.constant 0 : index
    %164 = vector.load %arg5[%c1_170, %c0_171, %c0_172] : memref<4x7x14xf32, #tpu.memory_space<vmem>>, vector<1x7x14xf32>
    %165 = vector.shape_cast %164 : vector<1x7x14xf32> to vector<7x14xf32>
    %cst_173 = arith.constant dense<0.000000e+00> : vector<7x224xf32>
    %166 = tpu.matmul %165, %155, %cst_173 {dimension_numbers = #tpu.dot_dimension_numbers<[1], [0], [0], [1], [0, 0, 1, 1], [], []>} : vector<7x14xf32>, vector<14x224xf32>, vector<7x224xf32> -> vector<7x224xf32>
    %c1_174 = arith.constant 1 : index
    %c0_175 = arith.constant 0 : index
    %c0_176 = arith.constant 0 : index
    %167 = vector.load %arg6[%c1_174, %c0_175, %c0_176] : memref<4x224x224xf32, #tpu.memory_space<vmem>>, vector<1x224x224xf32>
    %168 = vector.shape_cast %167 : vector<1x224x224xf32> to vector<224x224xf32>
    %cst_177 = arith.constant dense<0.000000e+00> : vector<7x224xf32>
    %169 = tpu.matmul %166, %168, %cst_177 {dimension_numbers = #tpu.dot_dimension_numbers<[1], [0], [0], [1], [0, 0, 1, 1], [], []>} : vector<7x224xf32>, vector<224x224xf32>, vector<7x224xf32> -> vector<7x224xf32>
    %170 = arith.addf %163, %169 : vector<7x224xf32>
    %c2_178 = arith.constant 2 : index
    %c0_179 = arith.constant 0 : index
    %c0_180 = arith.constant 0 : index
    %171 = vector.load %arg5[%c2_178, %c0_179, %c0_180] : memref<4x7x14xf32, #tpu.memory_space<vmem>>, vector<1x7x14xf32>
    %172 = vector.shape_cast %171 : vector<1x7x14xf32> to vector<7x14xf32>
    %cst_181 = arith.constant dense<0.000000e+00> : vector<7x224xf32>
    %173 = tpu.matmul %172, %155, %cst_181 {dimension_numbers = #tpu.dot_dimension_numbers<[1], [0], [0], [1], [0, 0, 1, 1], [], []>} : vector<7x14xf32>, vector<14x224xf32>, vector<7x224xf32> -> vector<7x224xf32>
    %c2_182 = arith.constant 2 : index
    %c0_183 = arith.constant 0 : index
    %c0_184 = arith.constant 0 : index
    %174 = vector.load %arg6[%c2_182, %c0_183, %c0_184] : memref<4x224x224xf32, #tpu.memory_space<vmem>>, vector<1x224x224xf32>
    %175 = vector.shape_cast %174 : vector<1x224x224xf32> to vector<224x224xf32>
    %cst_185 = arith.constant dense<0.000000e+00> : vector<7x224xf32>
    %176 = tpu.matmul %173, %175, %cst_185 {dimension_numbers = #tpu.dot_dimension_numbers<[1], [0], [0], [1], [0, 0, 1, 1], [], []>} : vector<7x224xf32>, vector<224x224xf32>, vector<7x224xf32> -> vector<7x224xf32>
    %177 = arith.addf %170, %176 : vector<7x224xf32>
    %c3_186 = arith.constant 3 : index
    %c0_187 = arith.constant 0 : index
    %c0_188 = arith.constant 0 : index
    %178 = vector.load %arg5[%c3_186, %c0_187, %c0_188] : memref<4x7x14xf32, #tpu.memory_space<vmem>>, vector<1x7x14xf32>
    %179 = vector.shape_cast %178 : vector<1x7x14xf32> to vector<7x14xf32>
    %cst_189 = arith.constant dense<0.000000e+00> : vector<7x224xf32>
    %180 = tpu.matmul %179, %155, %cst_189 {dimension_numbers = #tpu.dot_dimension_numbers<[1], [0], [0], [1], [0, 0, 1, 1], [], []>} : vector<7x14xf32>, vector<14x224xf32>, vector<7x224xf32> -> vector<7x224xf32>
    %c3_190 = arith.constant 3 : index
    %c0_191 = arith.constant 0 : index
    %c0_192 = arith.constant 0 : index
    %181 = vector.load %arg6[%c3_190, %c0_191, %c0_192] : memref<4x224x224xf32, #tpu.memory_space<vmem>>, vector<1x224x224xf32>
    %182 = vector.shape_cast %181 : vector<1x224x224xf32> to vector<224x224xf32>
    %cst_193 = arith.constant dense<0.000000e+00> : vector<7x224xf32>
    %183 = tpu.matmul %180, %182, %cst_193 {dimension_numbers = #tpu.dot_dimension_numbers<[1], [0], [0], [1], [0, 0, 1, 1], [], []>} : vector<7x224xf32>, vector<224x224xf32>, vector<7x224xf32> -> vector<7x224xf32>
    %184 = arith.addf %177, %183 : vector<7x224xf32>
    %c0_194 = arith.constant 0 : index
    %c0_195 = arith.constant 0 : index
    %185 = vector.load %arg7[%c0_194, %c0_195] : memref<1x224xf32, #tpu.memory_space<vmem>>, vector<1x224xf32>
    %186 = vector.broadcast %185 : vector<1x224xf32> to vector<7x224xf32>
    %187 = arith.addf %184, %186 : vector<7x224xf32>
    %cst_196 = arith.constant 0.000000e+00 : f32
    %188 = vector.broadcast %cst_196 : f32 to vector<7x224xf32>
    %189 = arith.maximumf %187, %188 : vector<7x224xf32>
    %cst_197 = arith.constant 0.000000e+00 : f32
    %190 = vector.broadcast %cst_197 : f32 to vector<3x192xf32>
    %c0_198 = arith.constant 0 : index
    %c0_199 = arith.constant 0 : index
    %c0_200 = arith.constant 0 : index
    %191 = vector.load %arg8[%c0_198, %c0_199, %c0_200] : memref<4x3x7xf32, #tpu.memory_space<vmem>>, vector<1x3x7xf32>
    %192 = vector.shape_cast %191 : vector<1x3x7xf32> to vector<3x7xf32>
    %cst_201 = arith.constant dense<0.000000e+00> : vector<3x224xf32>
    %193 = tpu.matmul %192, %189, %cst_201 {dimension_numbers = #tpu.dot_dimension_numbers<[1], [0], [0], [1], [0, 0, 1, 1], [], []>} : vector<3x7xf32>, vector<7x224xf32>, vector<3x224xf32> -> vector<3x224xf32>
    %c0_202 = arith.constant 0 : index
    %c0_203 = arith.constant 0 : index
    %c0_204 = arith.constant 0 : index
    %194 = vector.load %arg9[%c0_202, %c0_203, %c0_204] : memref<4x224x192xf32, #tpu.memory_space<vmem>>, vector<1x224x192xf32>
    %195 = vector.shape_cast %194 : vector<1x224x192xf32> to vector<224x192xf32>
    %cst_205 = arith.constant dense<0.000000e+00> : vector<3x192xf32>
    %196 = tpu.matmul %193, %195, %cst_205 {dimension_numbers = #tpu.dot_dimension_numbers<[1], [0], [0], [1], [0, 0, 1, 1], [], []>} : vector<3x224xf32>, vector<224x192xf32>, vector<3x192xf32> -> vector<3x192xf32>
    %197 = arith.addf %190, %196 : vector<3x192xf32>
    %c1_206 = arith.constant 1 : index
    %c0_207 = arith.constant 0 : index
    %c0_208 = arith.constant 0 : index
    %198 = vector.load %arg8[%c1_206, %c0_207, %c0_208] : memref<4x3x7xf32, #tpu.memory_space<vmem>>, vector<1x3x7xf32>
    %199 = vector.shape_cast %198 : vector<1x3x7xf32> to vector<3x7xf32>
    %cst_209 = arith.constant dense<0.000000e+00> : vector<3x224xf32>
    %200 = tpu.matmul %199, %189, %cst_209 {dimension_numbers = #tpu.dot_dimension_numbers<[1], [0], [0], [1], [0, 0, 1, 1], [], []>} : vector<3x7xf32>, vector<7x224xf32>, vector<3x224xf32> -> vector<3x224xf32>
    %c1_210 = arith.constant 1 : index
    %c0_211 = arith.constant 0 : index
    %c0_212 = arith.constant 0 : index
    %201 = vector.load %arg9[%c1_210, %c0_211, %c0_212] : memref<4x224x192xf32, #tpu.memory_space<vmem>>, vector<1x224x192xf32>
    %202 = vector.shape_cast %201 : vector<1x224x192xf32> to vector<224x192xf32>
    %cst_213 = arith.constant dense<0.000000e+00> : vector<3x192xf32>
    %203 = tpu.matmul %200, %202, %cst_213 {dimension_numbers = #tpu.dot_dimension_numbers<[1], [0], [0], [1], [0, 0, 1, 1], [], []>} : vector<3x224xf32>, vector<224x192xf32>, vector<3x192xf32> -> vector<3x192xf32>
    %204 = arith.addf %197, %203 : vector<3x192xf32>
    %c2_214 = arith.constant 2 : index
    %c0_215 = arith.constant 0 : index
    %c0_216 = arith.constant 0 : index
    %205 = vector.load %arg8[%c2_214, %c0_215, %c0_216] : memref<4x3x7xf32, #tpu.memory_space<vmem>>, vector<1x3x7xf32>
    %206 = vector.shape_cast %205 : vector<1x3x7xf32> to vector<3x7xf32>
    %cst_217 = arith.constant dense<0.000000e+00> : vector<3x224xf32>
    %207 = tpu.matmul %206, %189, %cst_217 {dimension_numbers = #tpu.dot_dimension_numbers<[1], [0], [0], [1], [0, 0, 1, 1], [], []>} : vector<3x7xf32>, vector<7x224xf32>, vector<3x224xf32> -> vector<3x224xf32>
    %c2_218 = arith.constant 2 : index
    %c0_219 = arith.constant 0 : index
    %c0_220 = arith.constant 0 : index
    %208 = vector.load %arg9[%c2_218, %c0_219, %c0_220] : memref<4x224x192xf32, #tpu.memory_space<vmem>>, vector<1x224x192xf32>
    %209 = vector.shape_cast %208 : vector<1x224x192xf32> to vector<224x192xf32>
    %cst_221 = arith.constant dense<0.000000e+00> : vector<3x192xf32>
    %210 = tpu.matmul %207, %209, %cst_221 {dimension_numbers = #tpu.dot_dimension_numbers<[1], [0], [0], [1], [0, 0, 1, 1], [], []>} : vector<3x224xf32>, vector<224x192xf32>, vector<3x192xf32> -> vector<3x192xf32>
    %211 = arith.addf %204, %210 : vector<3x192xf32>
    %c3_222 = arith.constant 3 : index
    %c0_223 = arith.constant 0 : index
    %c0_224 = arith.constant 0 : index
    %212 = vector.load %arg8[%c3_222, %c0_223, %c0_224] : memref<4x3x7xf32, #tpu.memory_space<vmem>>, vector<1x3x7xf32>
    %213 = vector.shape_cast %212 : vector<1x3x7xf32> to vector<3x7xf32>
    %cst_225 = arith.constant dense<0.000000e+00> : vector<3x224xf32>
    %214 = tpu.matmul %213, %189, %cst_225 {dimension_numbers = #tpu.dot_dimension_numbers<[1], [0], [0], [1], [0, 0, 1, 1], [], []>} : vector<3x7xf32>, vector<7x224xf32>, vector<3x224xf32> -> vector<3x224xf32>
    %c3_226 = arith.constant 3 : index
    %c0_227 = arith.constant 0 : index
    %c0_228 = arith.constant 0 : index
    %215 = vector.load %arg9[%c3_226, %c0_227, %c0_228] : memref<4x224x192xf32, #tpu.memory_space<vmem>>, vector<1x224x192xf32>
    %216 = vector.shape_cast %215 : vector<1x224x192xf32> to vector<224x192xf32>
    %cst_229 = arith.constant dense<0.000000e+00> : vector<3x192xf32>
    %217 = tpu.matmul %214, %216, %cst_229 {dimension_numbers = #tpu.dot_dimension_numbers<[1], [0], [0], [1], [0, 0, 1, 1], [], []>} : vector<3x224xf32>, vector<224x192xf32>, vector<3x192xf32> -> vector<3x192xf32>
    %218 = arith.addf %211, %217 : vector<3x192xf32>
    %c0_230 = arith.constant 0 : index
    %c0_231 = arith.constant 0 : index
    %219 = vector.load %arg10[%c0_230, %c0_231] : memref<1x192xf32, #tpu.memory_space<vmem>>, vector<1x192xf32>
    %220 = vector.broadcast %219 : vector<1x192xf32> to vector<3x192xf32>
    %221 = arith.addf %218, %220 : vector<3x192xf32>
    %cst_232 = arith.constant 0.000000e+00 : f32
    %222 = vector.broadcast %cst_232 : f32 to vector<3x192xf32>
    %223 = arith.maximumf %221, %222 : vector<3x192xf32>
    %c0_233 = arith.constant 0 : index
    %c0_234 = arith.constant 0 : index
    %224 = vector.load %arg12[%c0_233, %c0_234] : memref<1x8xf32, #tpu.memory_space<vmem>>, vector<1x8xf32>
    %225 = vector.extract_strided_slice %223 {offsets = [0, 0], sizes = [1, 192], strides = [1, 1]} : vector<3x192xf32> to vector<1x192xf32>
    %c0_235 = arith.constant 0 : index
    %c0_236 = arith.constant 0 : index
    %c0_237 = arith.constant 0 : index
    %226 = vector.load %arg11[%c0_235, %c0_236, %c0_237] : memref<3x192x8xf32, #tpu.memory_space<vmem>>, vector<1x192x8xf32>
    %227 = vector.shape_cast %226 : vector<1x192x8xf32> to vector<192x8xf32>
    %cst_238 = arith.constant dense<0.000000e+00> : vector<1x8xf32>
    %228 = tpu.matmul %225, %227, %cst_238 {dimension_numbers = #tpu.dot_dimension_numbers<[1], [0], [0], [1], [0, 0, 1, 1], [], []>} : vector<1x192xf32>, vector<192x8xf32>, vector<1x8xf32> -> vector<1x8xf32>
    %229 = arith.addf %224, %228 : vector<1x8xf32>
    %230 = vector.extract_strided_slice %223 {offsets = [1, 0], sizes = [1, 192], strides = [1, 1]} : vector<3x192xf32> to vector<1x192xf32>
    %c1_239 = arith.constant 1 : index
    %c0_240 = arith.constant 0 : index
    %c0_241 = arith.constant 0 : index
    %231 = vector.load %arg11[%c1_239, %c0_240, %c0_241] : memref<3x192x8xf32, #tpu.memory_space<vmem>>, vector<1x192x8xf32>
    %232 = vector.shape_cast %231 : vector<1x192x8xf32> to vector<192x8xf32>
    %cst_242 = arith.constant dense<0.000000e+00> : vector<1x8xf32>
    %233 = tpu.matmul %230, %232, %cst_242 {dimension_numbers = #tpu.dot_dimension_numbers<[1], [0], [0], [1], [0, 0, 1, 1], [], []>} : vector<1x192xf32>, vector<192x8xf32>, vector<1x8xf32> -> vector<1x8xf32>
    %234 = arith.addf %229, %233 : vector<1x8xf32>
    %235 = vector.extract_strided_slice %223 {offsets = [2, 0], sizes = [1, 192], strides = [1, 1]} : vector<3x192xf32> to vector<1x192xf32>
    %c2_243 = arith.constant 2 : index
    %c0_244 = arith.constant 0 : index
    %c0_245 = arith.constant 0 : index
    %236 = vector.load %arg11[%c2_243, %c0_244, %c0_245] : memref<3x192x8xf32, #tpu.memory_space<vmem>>, vector<1x192x8xf32>
    %237 = vector.shape_cast %236 : vector<1x192x8xf32> to vector<192x8xf32>
    %cst_246 = arith.constant dense<0.000000e+00> : vector<1x8xf32>
    %238 = tpu.matmul %235, %237, %cst_246 {dimension_numbers = #tpu.dot_dimension_numbers<[1], [0], [0], [1], [0, 0, 1, 1], [], []>} : vector<1x192xf32>, vector<192x8xf32>, vector<1x8xf32> -> vector<1x8xf32>
    %239 = arith.addf %234, %238 : vector<1x8xf32>
    %240 = tpu.concatenate %119, %239 in 0 : vector<1x8xf32>, vector<1x8xf32> -> vector<2x8xf32>
    %c0_247 = arith.constant 0 : index
    %c0_248 = arith.constant 0 : index
    %c0_249 = arith.constant 0 : index
    %241 = vector.load %arg13[%c0_247, %c0_248, %c0_249] : memref<1x2x8xf32, #tpu.memory_space<vmem>>, vector<1x2x8xf32>
    %242 = vector.shape_cast %241 : vector<1x2x8xf32> to vector<2x8xf32>
    %243 = vector.shape_cast %240 : vector<2x8xf32> to vector<1x2x8xf32>
    tpu.vector_store %arg13[%c0_247, %c0_248, %c0_249], %243 {strides = array<i32>} : memref<1x2x8xf32, #tpu.memory_space<vmem>>, vector<1x2x8xf32>,
    return
  }
  func.func @transform_0(%arg0: i32) -> (i32, i32, i32, i32) {
    %c0_i32 = arith.constant 0 : i32
    %c0_i32_0 = arith.constant 0 : i32
    %c0_i32_1 = arith.constant 0 : i32
    %c0_i32_2 = arith.constant 0 : i32
    return %arg0, %c0_i32, %c0_i32_0, %c0_i32_1 : i32, i32, i32, i32
  }
  func.func @transform_1(%arg0: i32) -> (i32, i32, i32) {
    %c0_i32 = arith.constant 0 : i32
    %c0_i32_0 = arith.constant 0 : i32
    %c0_i32_1 = arith.constant 0 : i32
    %c0_i32_2 = arith.constant 0 : i32
    return %c0_i32, %c0_i32_0, %c0_i32_1 : i32, i32, i32
  }
  func.func @transform_2(%arg0: i32) -> (i32, i32, i32) {
    %c0_i32 = arith.constant 0 : i32
    %c0_i32_0 = arith.constant 0 : i32
    %c0_i32_1 = arith.constant 0 : i32
    %c0_i32_2 = arith.constant 0 : i32
    return %c0_i32, %c0_i32_0, %c0_i32_1 : i32, i32, i32
  }
  func.func @transform_3(%arg0: i32) -> (i32, i32) {
    %c0_i32 = arith.constant 0 : i32
    %c0_i32_0 = arith.constant 0 : i32
    %c0_i32_1 = arith.constant 0 : i32
    return %c0_i32, %c0_i32_0 : i32, i32
  }
  func.func @transform_4(%arg0: i32) -> (i32, i32, i32) {
    %c0_i32 = arith.constant 0 : i32
    %c0_i32_0 = arith.constant 0 : i32
    %c0_i32_1 = arith.constant 0 : i32
    %c0_i32_2 = arith.constant 0 : i32
    return %c0_i32, %c0_i32_0, %c0_i32_1 : i32, i32, i32
  }
  func.func @transform_5(%arg0: i32) -> (i32, i32, i32) {
    %c0_i32 = arith.constant 0 : i32
    %c0_i32_0 = arith.constant 0 : i32
    %c0_i32_1 = arith.constant 0 : i32
    %c0_i32_2 = arith.constant 0 : i32
    return %c0_i32, %c0_i32_0, %c0_i32_1 : i32, i32, i32
  }
  func.func @transform_6(%arg0: i32) -> (i32, i32) {
    %c0_i32 = arith.constant 0 : i32
    %c0_i32_0 = arith.constant 0 : i32
    %c0_i32_1 = arith.constant 0 : i32
    return %c0_i32, %c0_i32_0 : i32, i32
  }
  func.func @transform_7(%arg0: i32) -> (i32, i32, i32) {
    %c0_i32 = arith.constant 0 : i32
    %c0_i32_0 = arith.constant 0 : i32
    %c0_i32_1 = arith.constant 0 : i32
    %c0_i32_2 = arith.constant 0 : i32
    return %c0_i32, %c0_i32_0, %c0_i32_1 : i32, i32, i32
  }
  func.func @transform_8(%arg0: i32) -> (i32, i32, i32) {
    %c0_i32 = arith.constant 0 : i32
    %c0_i32_0 = arith.constant 0 : i32
    %c0_i32_1 = arith.constant 0 : i32
    %c0_i32_2 = arith.constant 0 : i32
    return %c0_i32, %c0_i32_0, %c0_i32_1 : i32, i32, i32
  }
  func.func @transform_9(%arg0: i32) -> (i32, i32) {
    %c0_i32 = arith.constant 0 : i32
    %c0_i32_0 = arith.constant 0 : i32
    %c0_i32_1 = arith.constant 0 : i32
    return %c0_i32, %c0_i32_0 : i32, i32
  }
  func.func @transform_10(%arg0: i32) -> (i32, i32, i32) {
    %c0_i32 = arith.constant 0 : i32
    %c0_i32_0 = arith.constant 0 : i32
    %c0_i32_1 = arith.constant 0 : i32
    %c0_i32_2 = arith.constant 0 : i32
    return %c0_i32, %c0_i32_0, %c0_i32_1 : i32, i32, i32
  }
  func.func @transform_11(%arg0: i32) -> (i32, i32) {
    %c0_i32 = arith.constant 0 : i32
    %c0_i32_0 = arith.constant 0 : i32
    %c0_i32_1 = arith.constant 0 : i32
    return %c0_i32, %c0_i32_0 : i32, i32
  }
  func.func @transform_12(%arg0: i32) -> (i32, i32, i32) {
    %c0_i32 = arith.constant 0 : i32
    %c0_i32_0 = arith.constant 0 : i32
    %c0_i32_1 = arith.constant 0 : i32
    return %arg0, %c0_i32, %c0_i32_0 : i32, i32, i32
  }
}

</mosaic_0001>

<bundles_post_ra>
// kernel: pair_cnn_encoder.1
= control target key start
LH: loop header
LB: loop body
LE: loop exit
PB: predicated region body
PF: predicated region fallthrough
CT: control target
= control target key end

     0   :  { %vm54_vm0 = vcmask 1043456   ;;  %vm47_vm1 = vcmask 228352   ;;  %vm142_vm2 = vcmask 457728   ;;  %vm472_vm3 = vcmask 1045504   ;;  %s8927_s0 = inlined_call_operand.vmem [shape: f32[1,2,28,56], index: 0, kind: input, shape index: {}]   ;;  %s8928_s2 = inlined_call_operand.vmem [shape: f32[4,56,224], index: 2, kind: input, shape index: {}]   ;;  %s8929_s1 = inlined_call_operand.vmem [shape: f32[4,14,28], index: 1, kind: input, shape index: {}]   ;;  %s8930_s3 = inlined_call_operand.vmem [shape: f32[1,224], index: 3, kind: input, shape index: {}]   ;;  %s8931_s4 = inlined_call_operand.vmem [shape: f32[4,7,14], index: 4, kind: input, shape index: {}]   ;;  %s8932_s5 = inlined_call_operand.vmem [shape: f32[4,224,224], index: 5, kind: input, shape index: {}]   ;;  %s8933_s8 = inlined_call_operand.vmem [shape: f32[4,224,192], index: 8, kind: input, shape index: {}]   ;;  %s8934_s6 = inlined_call_operand.vmem [shape: f32[1,224], index: 6, kind: input, shape index: {}]   ;;  %s8935_s7 = inlined_call_operand.vmem [shape: f32[4,3,7], index: 7, kind: input, shape index: {}]   ;;  %s8936_s10 = inlined_call_operand.vmem [shape: f32[3,192,8], index: 10, kind: input, shape index: {}]   ;;  %s8937_s9 = inlined_call_operand.vmem [shape: f32[1,192], index: 9, kind: input, shape index: {}]   ;;  %s8938_s11 = inlined_call_operand.vmem [shape: f32[1,8], index: 11, kind: input, shape index: {}]   ;;  %s8939_s12 = inlined_call_operand.vmem [shape: f32[1,2,8], index: 12, kind: output, shape index: {}]  }
   0x1   :  { %v4953_v0 = vld [vmem:[%s8927_s0 + $0x18] sm:$0xf]  ;;  %v4958_v1 = vld [vmem:[%s8927_s0 + $0x10] sm:$0xff]  ;;  %v4967_v2 = vld [vmem:[%s8927_s0 + $0x8] sm:$0xff]  ;;  %vm468_vm4 = vcmask 113664   ;;  %vm677_vm5 = vcmask 785408  }
   0x2   :  { %3690 = vmatpush.msk.msra.mxu1 %vm54_vm0, %v4953_v0  ;;  %3685 = vmatpush.msk.msra.mxu0 %vm54_vm0, %v4953_v0  ;;  %v3705_v3 = vld [vmem:[%s8928_s2 + $0xd0] sm:$0xff]  ;;  %v3706_v4 = vld [vmem:[%s8928_s2 + $0xd8] sm:$0xff]  ;;  %v3703_v5 = vld [vmem:[%s8928_s2 + $0xc0] sm:$0xff]  ;;  %vm1233_vm6 = vcmask 1046528   ;;  %vm1229_vm7 = vcmask 56320   ;;  %vm2013_vm8 = vcmask 523264  }
   0x3   :  { %v3704_v6 = vld [vmem:[%s8928_s2 + $0xc8] sm:$0xff]  ;;  %v4986_v7 = vld [vmem:[%s8927_s0] sm:$0xff]  ;;  %158 = vmatpush.msra.mxu2 %v3705_v3  ;;  %181 = vmatpush.msra.mxu3 %v3706_v4  ;;  %v3688_v8 = vld [vmem:[%s8929_s1 + $0x10] sm:$0xff]  ;;  %vm3677_vm9 = vcmask 1040384   ;;  %vm3679_vm10 = vcmask 58368  }
   0x4   :  { %117 = vmatpush.msra.mxu1 %v4958_v1  ;;  %71 = vmatpush.msra.mxu0 %v4958_v1  ;;  %v45_v9 = vld [vmem:[%s8929_s1] sm:$0xff]  ;;  %v3701_v10 = vld [vmem:[%s8928_s2 + $0xb0] sm:$0xff]  ;;  %v3702_v11 = vld [vmem:[%s8928_s2 + $0xb8] sm:$0xff] }
   0x5   :  { %159 = vmatpush.msra.mxu2 %v3703_v5  ;;  %182 = vmatpush.msra.mxu3 %v3704_v6  ;;  %v93_v12 = vld [vmem:[%s8928_s2 + $0x60] sm:$0xff]  ;;  %v94_v13 = vld [vmem:[%s8928_s2 + $0x68] sm:$0xff]  ;;  %v91_v16 = vld [vmem:[%s8928_s2 + $0x50] sm:$0xff] }
   0x6   :  { %118 = vmatpush.msra.mxu1 %v4967_v2  ;;  %72 = vmatpush.msra.mxu0 %v4967_v2  ;;  %v3699_v14 = vld [vmem:[%s8928_s2 + $0xa0] sm:$0xff]  ;;  %v3700_v15 = vld [vmem:[%s8928_s2 + $0xa8] sm:$0xff]  ;;  %v92_v17 = vld [vmem:[%s8928_s2 + $0x58] sm:$0xff] }
   0x7   :  { %160 = vmatpush.msra.mxu2 %v3701_v10  ;;  %183 = vmatpush.msra.mxu3 %v3702_v11  ;;  %v3697_v18 = vld [vmem:[%s8928_s2 + $0x90] sm:$0xff]  ;;  %v3698_v19 = vld [vmem:[%s8928_s2 + $0x98] sm:$0xff]  ;;  %v89_v20 = vld [vmem:[%s8928_s2 + $0x40] sm:$0xff] }
   0x8   :  { %119 = vmatpush.msra.mxu1 %v4986_v7  ;;  %73 = vmatpush.msra.mxu0 %v4986_v7  ;;  %v90_v21 = vld [vmem:[%s8928_s2 + $0x48] sm:$0xff]  ;;  %v3695_v22 = vld [vmem:[%s8928_s2 + $0x80] sm:$0xff]  ;;  %v3689_v24 = vld [vmem:[%s8929_s1 + $0x18] sm:$0x3f] }
   0x9   :  { %3691 = vmatmul.msk.f32.vlgmr.msra.gmra.mxu1 %vm47_vm1, %v3688_v8  ;;  %3686 = vmatmul.msk.f32.vlgmr.msra.gmra.mxu0 %vm47_vm1, %v45_v9  ;;  %v3696_v23 = vld [vmem:[%s8928_s2 + $0x88] sm:$0xff]  ;;  %v3693_v26 = vld [vmem:[%s8928_s2 + $0x70] sm:$0xff]  ;;  %v3694_v27 = vld [vmem:[%s8928_s2 + $0x78] sm:$0xff] }
   0xa   :  { %210 = vmatpush.msrb.mxu0 %v93_v12  ;;  %233 = vmatpush.msrb.mxu1 %v94_v13  ;;  %v46_v25 = vld [vmem:[%s8929_s1 + $0x8] sm:$0x3f]  ;;  %v87_v28 = vld [vmem:[%s8928_s2 + $0x30] sm:$0xff]  ;;  %v88_v29 = vld [vmem:[%s8928_s2 + $0x38] sm:$0xff] }
   0xb   :  { %161 = vmatpush.msra.mxu2 %v3699_v14  ;;  %184 = vmatpush.msra.mxu3 %v3700_v15  ;;  %v85_v30 = vld [vmem:[%s8928_s2 + $0x20] sm:$0xff]  ;;  %v86_v31 = vld [vmem:[%s8928_s2 + $0x28] sm:$0xff]  ;;  %v83_v32 = vld [vmem:[%s8928_s2 + $0x10] sm:$0xff] }
   0xc   :  { %211 = vmatpush.msrb.mxu0 %v91_v16  ;;  %234 = vmatpush.msrb.mxu1 %v92_v17  ;;  %v84_v33 = vld [vmem:[%s8928_s2 + $0x18] sm:$0xff]  ;;  %v81_v34 = vld [vmem:[%s8928_s2] sm:$0xff]  ;;  %v82_v35 = vld [vmem:[%s8928_s2 + $0x8] sm:$0xff] }
   0xd   :  { %162 = vmatpush.msra.mxu2 %v3697_v18  ;;  %185 = vmatpush.msra.mxu3 %v3698_v19  ;;  %v3715_v40 = vld [vmem:[%s8929_s1 + $0x20] sm:$0xff]  ;;  %v3738_v41 = vld [vmem:[%s8929_s1 + $0x30] sm:$0xff]  ;;  %v3716_v42 = vld [vmem:[%s8929_s1 + $0x28] sm:$0x3f] }
   0xe   :  { %212 = vmatpush.msrb.mxu0 %v89_v20  ;;  %235 = vmatpush.msrb.mxu1 %v90_v21  ;;  %v3739_v43 = vld [vmem:[%s8929_s1 + $0x38] sm:$0x3f]  ;;  %v3732_v44 = vld [vmem:[%s8928_s2 + $0x140] sm:$0xff]  ;;  %v3733_v45 = vld [vmem:[%s8928_s2 + $0x148] sm:$0xff] }
   0xf   :  { %163 = vmatpush.msra.mxu2 %v3695_v22  ;;  %186 = vmatpush.msra.mxu3 %v3696_v23  ;;  %v3730_v46 = vld [vmem:[%s8928_s2 + $0x130] sm:$0xff]  ;;  %v3731_v47 = vld [vmem:[%s8928_s2 + $0x138] sm:$0xff]  ;;  %v3728_v48 = vld [vmem:[%s8928_s2 + $0x120] sm:$0xff] }
  0x10   :  { %213 = vmatpush.msrb.mxu0 %v87_v28  ;;  %236 = vmatpush.msrb.mxu1 %v88_v29  ;;  %v3729_v49 = vld [vmem:[%s8928_s2 + $0x128] sm:$0xff]  ;;  %v3726_v50 = vld [vmem:[%s8928_s2 + $0x110] sm:$0xff]  ;;  %v3727_v51 = vld [vmem:[%s8928_s2 + $0x118] sm:$0xff] }
  0x11   :  { %3692 = vmatmul.msk.f32.gmra.mxu1 %vm47_vm1, %v3689_v24  ;;  %3687 = vmatmul.msk.f32.gmra.mxu0 %vm47_vm1, %v46_v25  ;;  %v3724_v52 = vld [vmem:[%s8928_s2 + $0x100] sm:$0xff]  ;;  %v3725_v53 = vld [vmem:[%s8928_s2 + $0x108] sm:$0xff]  ;;  %v3722_v54 = vld [vmem:[%s8928_s2 + $0xf0] sm:$0xff] }
  0x12   :  { %164 = vmatpush.msra.mxu2 %v3693_v26  ;;  %187 = vmatpush.msra.mxu3 %v3694_v27  ;;  %v3723_v55 = vld [vmem:[%s8928_s2 + $0xf8] sm:$0xff]  ;;  %v3755_v56 = vld [vmem:[%s8928_s2 + $0x1b0] sm:$0xff]  ;;  %v3720_v57 = vld [vmem:[%s8928_s2 + $0xe0] sm:$0xff] }
  0x13   :  { %214 = vmatpush.msrb.mxu0 %v85_v30  ;;  %237 = vmatpush.msrb.mxu1 %v86_v31  ;;  %v3721_v58 = vld [vmem:[%s8928_s2 + $0xe8] sm:$0xff]  ;;  %v3753_v59 = vld [vmem:[%s8928_s2 + $0x1a0] sm:$0xff]  ;;  %v3751_v60 = vld [vmem:[%s8928_s2 + $0x190] sm:$0xff] }
  0x14   :  { %3717 = vmatpush.msk.msrb.mxu2 %vm54_vm0, %v4953_v0  ;;  %309 = vmatpush.msrb.mxu3 %v3732_v44  ;;  %v3756_v61 = vld [vmem:[%s8928_s2 + $0x1b8] sm:$0xff]  ;;  %v3749_v62 = vld [vmem:[%s8928_s2 + $0x180] sm:$0xff]  ;;  %v3754_v63 = vld [vmem:[%s8928_s2 + $0x1a8] sm:$0xff] }
  0x15   :  { %215 = vmatpush.msrb.mxu0 %v83_v32  ;;  %238 = vmatpush.msrb.mxu1 %v84_v33  ;;  %v3743_v3 = vld [vmem:[%s8928_s2 + $0x150] sm:$0xff]  ;;  %v3750_v4 = vld [vmem:[%s8928_s2 + $0x188] sm:$0xff]  ;;  %v3748_v5 = vld [vmem:[%s8928_s2 + $0x178] sm:$0xff] }
  0x16   :  { %269 = vmatpush.msrb.mxu2 %v4958_v1  ;;  %310 = vmatpush.msrb.mxu3 %v3730_v46  ;;  %v3744_v8 = vld [vmem:[%s8928_s2 + $0x158] sm:$0xff]  ;;  %v453_v23 = vld [vmem:[%s8930_s3] sm:$0x3] }
  0x17   :  { %216 = vmatpush.msrb.mxu0 %v81_v34  ;;  %239 = vmatpush.msrb.mxu1 %v82_v35  ;;  %v5209_v30 = vperm.slane %v453_v23, 0  ;;  %v3798_v44 = vld [vmem:[%s8932_s5 + $0x2a0] sm:$0xff] }
  0x18   :  { %270 = vmatpush.msrb.mxu2 %v4967_v2  ;;  %311 = vmatpush.msrb.mxu3 %v3728_v48  ;;  %v3796_v48 = vld [vmem:[%s8932_s5 + $0x290] sm:$0xff] }
  0x19   :  { %3740 = vmatpush.msk.msra.mxu1 %vm54_vm0, %v4953_v0  ;;  %332 = vmatpush.msra.mxu0 %v3733_v45  ;;  %v3747_v0 = vld [vmem:[%s8928_s2 + $0x170] sm:$0xff]  ;;  %v3799_v45 = vld [vmem:[%s8932_s5 + $0x2a8] sm:$0xff] }
  0x1a   :  { %271 = vmatpush.msrb.mxu2 %v4986_v7  ;;  %312 = vmatpush.msrb.mxu3 %v3726_v50 }
  0x1b   :  { %372 = vmatpush.msra.mxu1 %v4958_v1  ;;  %333 = vmatpush.msra.mxu0 %v3731_v47  ;;  %v3745_v1 = vld [vmem:[%s8928_s2 + $0x160] sm:$0xff] }
  0x1c   :  { %313 = vmatpush.msrb.mxu3 %v3724_v52  ;;  %v5249_v52 = vperm.slane %v453_v23, 1  ;;  %v3778_v23 = vld [vmem:[%s8932_s5 + $0x200] sm:$0xff] }
  0x1d   :  { %373 = vmatpush.msra.mxu1 %v4967_v2  ;;  %334 = vmatpush.msra.mxu0 %v3729_v49  ;;  %v3752_v2 = vld [vmem:[%s8928_s2 + $0x198] sm:$0xff] }
  0x1e   :  { %314 = vmatpush.msrb.mxu3 %v3722_v54  ;;  %v3797_v49 = vld [vmem:[%s8932_s5 + $0x298] sm:$0xff]  ;;  %v3794_v54 = vld [vmem:[%s8932_s5 + $0x280] sm:$0xff] }
  0x1f   :  { %374 = vmatpush.msra.mxu1 %v4986_v7  ;;  %335 = vmatpush.msra.mxu0 %v3727_v51  ;;  %v3746_v7 = vld [vmem:[%s8928_s2 + $0x168] sm:$0xff] }
  0x20   :  { %315 = vmatpush.msrb.mxu3 %v3720_v57  ;;  %v3792_v57 = vld [vmem:[%s8932_s5 + $0x270] sm:$0xff] }
  0x21   :  { %336 = vmatpush.msra.mxu0 %v3725_v53 }
  0x23   :  { %337 = vmatpush.msra.mxu0 %v3723_v55  ;;  %v3795_v55 = vld [vmem:[%s8932_s5 + $0x288] sm:$0xff] }
  0x25   :  { %338 = vmatpush.msra.mxu0 %v3721_v58  ;;  %v3793_v58 = vld [vmem:[%s8932_s5 + $0x278] sm:$0xff] }
  0x86   :  { %v121_v36 = vpop.f32.mrf.mxu1  ;;  %v75_v37 = vpop.f32.mrf.mxu0 }
  0x87   :  { %3707 = vmatmul.msk.f32.vlgmr.msra.gmra.mxu2 %vm142_vm2, %v121_v36  ;;  %3709 = vmatmul.msk.f32.vlgmr.msra.gmra.mxu3 %vm142_vm2, %v121_v36 }
  0x88   :  { %3711 = vmatmul.msk.f32.vlgmr.msrb.gmra.mxu0 %vm142_vm2, %v75_v37  ;;  %3713 = vmatmul.msk.f32.vlgmr.msrb.gmra.mxu1 %vm142_vm2, %v75_v37 }
  0x89   :  { %4285 = vmatpush.msra.mxu2 %v3755_v56  ;;  %412 = vmatpush.msrb.mxu0 %v3755_v56 }
  0x8a   :  { %435 = vmatpush.msra.mxu3 %v3756_v61 }
  0x8b   :  { %4286 = vmatpush.msra.mxu2 %v3753_v59  ;;  %413 = vmatpush.msrb.mxu0 %v3753_v59 }
  0x8c   :  { %436 = vmatpush.msra.mxu3 %v3754_v63  ;;  %v3791_v63 = vld [vmem:[%s8932_s5 + $0x268] sm:$0xff] }
  0x8d   :  { %4287 = vmatpush.msra.mxu2 %v3751_v60  ;;  %414 = vmatpush.msrb.mxu0 %v3751_v60 }
  0x8e   :  { %v124_v38 = vpop.f32.mrf.mxu1  ;;  %v78_v39 = vpop.f32.mrf.mxu0  ;;  %437 = vmatpush.msra.mxu3 %v3752_v2  ;;  %v3825_v2 = vld [vmem:[%s8932_s5 + $0x378] sm:$0xff] }
  0x8f   :  { %3708 = vmatmul.msk.f32.gmra.mxu2 %vm142_vm2, %v124_v38  ;;  %3710 = vmatmul.msk.f32.gmra.mxu3 %vm142_vm2, %v124_v38 }
  0x90   :  { %3712 = vmatmul.msk.f32.gmra.mxu0 %vm142_vm2, %v78_v39  ;;  %3714 = vmatmul.msk.f32.gmra.mxu1 %vm142_vm2, %v78_v39  ;;  %v3765_v39 = vld [vmem:[%s8931_s4 + $0x8] sm:$0x7f] }
  0x91   :  { %4288 = vmatpush.msra.mxu2 %v3749_v62  ;;  %415 = vmatpush.msrb.mxu0 %v3749_v62  ;;  %v3790_v62 = vld [vmem:[%s8932_s5 + $0x260] sm:$0xff] }
  0x92   :  { %438 = vmatpush.msra.mxu3 %v3750_v4  ;;  %v3789_v4 = vld [vmem:[%s8932_s5 + $0x258] sm:$0xff] }
  0x93   :  { %4289 = vmatpush.msra.mxu2 %v3747_v0  ;;  %416 = vmatpush.msrb.mxu0 %v3747_v0 }
  0x94   :  { %439 = vmatpush.msra.mxu3 %v3748_v5  ;;  %v3822_v5 = vld [vmem:[%s8932_s5 + $0x360] sm:$0xff] }
  0x95   :  { %4290 = vmatpush.msra.mxu2 %v3745_v1  ;;  %417 = vmatpush.msrb.mxu0 %v3745_v1  ;;  %v3824_v1 = vld [vmem:[%s8932_s5 + $0x370] sm:$0xff] }
  0x96   :  { %440 = vmatpush.msra.mxu3 %v3746_v7  ;;  %v3786_v7 = vld [vmem:[%s8932_s5 + $0x240] sm:$0xff] }
  0x97   :  { %3718 = vmatmul.msk.f32.vlgmr.msrb.gmra.mxu2 %vm47_vm1, %v3715_v40  ;;  %418 = vmatpush.msrb.mxu0 %v3743_v3  ;;  %v3800_v40 = vld [vmem:[%s8932_s5 + $0x2b0] sm:$0xff] }
  0x98   :  { %3741 = vmatmul.msk.f32.vlgmr.msra.gmra.mxu1 %vm47_vm1, %v3738_v41  ;;  %4291 = vmatpush.msra.mxu2 %v3743_v3  ;;  %v3801_v41 = vld [vmem:[%s8932_s5 + $0x2b8] sm:$0xff]  ;;  %v3788_v3 = vld [vmem:[%s8932_s5 + $0x250] sm:$0xff] }
  0x99   :  { %441 = vmatpush.msra.mxu3 %v3744_v8  ;;  %v3787_v8 = vld [vmem:[%s8932_s5 + $0x248] sm:$0xff] }
  0x9f   :  { %3719 = vmatmul.msk.f32.gmra.mxu2 %vm47_vm1, %v3716_v42 }
  0xa0   :  { %3742 = vmatmul.msk.f32.gmra.mxu1 %vm47_vm1, %v3739_v43  ;;  %v467_v43 = vld [vmem:[%s8931_s4] sm:$0x7f] }
 0x105   :  { %v241_v6 = vpop.f32.mrf.mxu1  ;;  %v218_v16 = vpop.f32.mrf.mxu0 }
 0x10a   :  { %v166_v9 = vpop.f32.mrf.mxu2  ;;  %v189_v17 = vpop.f32.mrf.mxu3 }
 0x10b   :  { %v219_v24 = vadd.f32 %v218_v16, %v166_v9  ;;  %v242_v42 = vadd.f32 %v241_v6, %v189_v17  ;;  %v3823_v6 = vld [vmem:[%s8932_s5 + $0x368] sm:$0xff]  ;;  %v3820_v9 = vld [vmem:[%s8932_s5 + $0x350] sm:$0xff] }
 0x10c   :  { %v3783_v16 = vld [vmem:[%s8932_s5 + $0x228] sm:$0xff]  ;;  %v3816_v17 = vld [vmem:[%s8932_s5 + $0x330] sm:$0xff] }
 0x10d   :  { %v244_v10 = vpop.f32.mrf.mxu1  ;;  %v221_v18 = vpop.f32.mrf.mxu0 }
 0x112   :  { %v169_v11 = vpop.f32.mrf.mxu2  ;;  %v192_v19 = vpop.f32.mrf.mxu3 }
 0x113   :  { %v222_v25 = vadd.f32 %v221_v18, %v169_v11  ;;  %v245_v46 = vadd.f32 %v244_v10, %v192_v19  ;;  %v3821_v10 = vld [vmem:[%s8932_s5 + $0x358] sm:$0xff]  ;;  %v3784_v11 = vld [vmem:[%s8932_s5 + $0x230] sm:$0xff] }
 0x114   :  { %v3817_v18 = vld [vmem:[%s8932_s5 + $0x338] sm:$0xff]  ;;  %v3780_v19 = vld [vmem:[%s8932_s5 + $0x210] sm:$0xff] }
 0x115   :  { %v376_v12 = vpop.f32.mrf.mxu1 }
 0x11a   :  { %v273_v13 = vpop.f32.mrf.mxu2 }
 0x11b   :  { %3734 = vmatmul.msk.f32.vlgmr.msrb.gmra.mxu3 %vm142_vm2, %v273_v13  ;;  %3736 = vmatmul.msk.f32.vlgmr.msra.gmra.mxu0 %vm142_vm2, %v273_v13  ;;  %v3818_v13 = vld [vmem:[%s8932_s5 + $0x340] sm:$0xff] }
 0x11d   :  { %v379_v14 = vpop.f32.mrf.mxu1 }
 0x11e   :  { %3758 = vmatmul.msk.f32.vlgmr.msra.gmra.mxu2 %vm142_vm2, %v379_v14 }
 0x122   :  { %v276_v15 = vpop.f32.mrf.mxu2 }
 0x123   :  { %3735 = vmatmul.msk.f32.gmra.mxu3 %vm142_vm2, %v276_v15  ;;  %3737 = vmatmul.msk.f32.gmra.mxu0 %vm142_vm2, %v276_v15  ;;  %v3782_v15 = vld [vmem:[%s8932_s5 + $0x220] sm:$0xff] }
 0x12b   :  { %3757 = vmatmul.msk.f32.vlgmr.msrb.gmra.mxu0 %vm142_vm2, %v376_v12  ;;  %3759 = vmatmul.msk.f32.vlgmr.msra.gmra.mxu3 %vm142_vm2, %v376_v12  ;;  %v3785_v12 = vld [vmem:[%s8932_s5 + $0x238] sm:$0xff] }
 0x133   :  { %3760 = vmatmul.msk.f32.gmra.mxu3 %vm142_vm2, %v379_v14  ;;  %v3819_v14 = vld [vmem:[%s8932_s5 + $0x348] sm:$0xff] }
 0x198   :  { %v340_v20 = vpop.f32.mrf.mxu0 }
 0x199   :  { %v347_v47 = vadd.f32 %v340_v20, %v242_v42  ;;  %v3781_v20 = vld [vmem:[%s8932_s5 + $0x218] sm:$0xff]  ;;  %v3770_v42 = vld [vmem:[%s8932_s5 + $0x1c0] sm:$0xff] }
 0x19e   :  { %v317_v21 = vpop.f32.mrf.mxu3 }
 0x19f   :  { %v346_v28 = vadd.f32 %v317_v21, %v219_v24  ;;  %v3814_v21 = vld [vmem:[%s8932_s5 + $0x320] sm:$0xff]  ;;  %v3779_v24 = vld [vmem:[%s8932_s5 + $0x208] sm:$0xff] }
 0x1a0   :  { %v343_v22 = vpop.f32.mrf.mxu0 }
 0x1a1   :  { %v423_v27 = vpop.f32.mrf.mxu2  ;;  %v349_v50 = vadd.f32 %v343_v22, %v245_v46  ;;  %v3815_v22 = vld [vmem:[%s8932_s5 + $0x328] sm:$0xff]  ;;  %v550_v46 = vld [vmem:[%s8932_s5 + $0xf8] sm:$0xff] }
 0x1a6   :  { %v320_v26 = vpop.f32.mrf.mxu3 }
 0x1a7   :  { %v348_v29 = vadd.f32 %v320_v26, %v222_v25  ;;  %v3812_v25 = vld [vmem:[%s8932_s5 + $0x310] sm:$0xff]  ;;  %v3813_v26 = vld [vmem:[%s8932_s5 + $0x318] sm:$0xff] }
 0x1a8   :  { %v420_v31 = vpop.f32.mrf.mxu0 }
 0x1a9   :  { %v449_v32 = vadd.f32 %v420_v31, %v346_v28  ;;  %v451_v33 = vadd.f32 %v423_v27, %v348_v29  ;;  %v3776_v27 = vld [vmem:[%s8932_s5 + $0x1f0] sm:$0xff]  ;;  %v3777_v28 = vld [vmem:[%s8932_s5 + $0x1f8] sm:$0xff]  ;;  %v3810_v29 = vld [vmem:[%s8932_s5 + $0x300] sm:$0xff] }
 0x1aa   :  { %v3811_v31 = vld [vmem:[%s8932_s5 + $0x308] sm:$0xff] }
 0x1ab   :  { %v459_v34 = vadd.f32 %v5209_v30, %v449_v32  ;;  %v461_v35 = vadd.f32 %v5209_v30, %v451_v33  ;;  %v3774_v32 = vld [vmem:[%s8932_s5 + $0x1e0] sm:$0xff]  ;;  %v3775_v33 = vld [vmem:[%s8932_s5 + $0x1e8] sm:$0xff] }
 0x1ad   :  { %v5213_v36 = vmax.f32 %v461_v35, 0.0  ;;  %v5215_v38 = vmax.f32 %v459_v34, 0.0  ;;  %v3808_v34 = vld [vmem:[%s8932_s5 + $0x2f0] sm:$0xff]  ;;  %v3809_v35 = vld [vmem:[%s8932_s5 + $0x2f8] sm:$0xff] }
 0x1ae   :  { %v443_v37 = vpop.f32.mrf.mxu3 }
 0x1af   :  { %3761 = vmatpush.msk.msra.mxu0 %vm472_vm3, %v5213_v36  ;;  %3766 = vmatpush.msk.msrb.mxu2 %vm472_vm3, %v5213_v36  ;;  %v450_v51 = vadd.f32 %v443_v37, %v347_v47  ;;  %v3772_v37 = vld [vmem:[%s8932_s5 + $0x1d0] sm:$0xff]  ;;  %v574_v47 = vld [vmem:[%s8932_s5 + $0x1b8] sm:$0xff] }
 0x1b1   :  { %494 = vmatpush.msra.mxu0 %v5215_v38  ;;  %595 = vmatpush.msrb.mxu2 %v5215_v38  ;;  %v460_v59 = vadd.f32 %v5249_v52, %v450_v51  ;;  %v573_v51 = vld [vmem:[%s8932_s5 + $0x1b0] sm:$0xff] }
 0x1b2   :  { %3767 = vmatmul.msk.f32.vlgmr.msrb.gmra.mxu2 %vm468_vm4, %v3765_v39  ;;  %3762 = vmatmul.msk.f32.vlgmr.msra.gmra.mxu0 %vm468_vm4, %v467_v43 }
 0x1b3   :  { %681 = vmatpush.msrb.mxu0 %v3800_v40  ;;  %721 = vmatpush.msra.mxu2 %v3801_v41  ;;  %v5273_v0 = vmax.f32 %v460_v59, 0.0  ;;  %v3806_v40 = vld [vmem:[%s8932_s5 + $0x2e0] sm:$0xff]  ;;  %v3807_v41 = vld [vmem:[%s8932_s5 + $0x2e8] sm:$0xff]  ;;  %v545_v59 = vld [vmem:[%s8932_s5 + $0xd0] sm:$0xff] }
 0x1b5   :  { %682 = vmatpush.msrb.mxu0 %v3798_v44  ;;  %722 = vmatpush.msra.mxu2 %v3799_v45  ;;  %v3804_v44 = vld [vmem:[%s8932_s5 + $0x2d0] sm:$0xff]  ;;  %v3805_v45 = vld [vmem:[%s8932_s5 + $0x2d8] sm:$0xff] }
 0x1b6   :  { %v446_v53 = vpop.f32.mrf.mxu3 }
 0x1b7   :  { %v452_v56 = vadd.f32 %v446_v53, %v349_v50  ;;  %683 = vmatpush.msrb.mxu0 %v3796_v48  ;;  %723 = vmatpush.msra.mxu2 %v3797_v49  ;;  %v3802_v48 = vld [vmem:[%s8932_s5 + $0x2c0] sm:$0xff]  ;;  %v3803_v49 = vld [vmem:[%s8932_s5 + $0x2c8] sm:$0xff]  ;;  %v549_v50 = vld [vmem:[%s8932_s5 + $0xf0] sm:$0xff] }
 0x1b8   :  { %v548_v53 = vld [vmem:[%s8932_s5 + $0xe8] sm:$0xff] }
 0x1b9   :  { %v462_v60 = vadd.f32 %v5249_v52, %v452_v56  ;;  %684 = vmatpush.msrb.mxu0 %v3794_v54  ;;  %724 = vmatpush.msra.mxu2 %v3795_v55  ;;  %v572_v54 = vld [vmem:[%s8932_s5 + $0x1a8] sm:$0xff]  ;;  %v547_v55 = vld [vmem:[%s8932_s5 + $0xe0] sm:$0xff] }
 0x1ba   :  { %v571_v56 = vld [vmem:[%s8932_s5 + $0x1a0] sm:$0xff] }
 0x1bb   :  { %v5265_v61 = vmax.f32 %v462_v60, 0.0  ;;  %685 = vmatpush.msrb.mxu0 %v3792_v57  ;;  %725 = vmatpush.msra.mxu2 %v3793_v58  ;;  %v546_v57 = vld [vmem:[%s8932_s5 + $0xd8] sm:$0xff]  ;;  %v569_v60 = vld [vmem:[%s8932_s5 + $0x190] sm:$0xff] }
 0x1bc   :  { %v570_v58 = vld [vmem:[%s8932_s5 + $0x198] sm:$0xff] }
 0x1bd   :  { %3763 = vmatpush.msk.msrb.mxu1 %vm472_vm3, %v5265_v61  ;;  %3768 = vmatpush.msk.msrb.mxu3 %vm472_vm3, %v5265_v61 }
 0x1be   :  { %686 = vmatpush.msrb.mxu0 %v3790_v62  ;;  %726 = vmatpush.msra.mxu2 %v3791_v63  ;;  %v544_v62 = vld [vmem:[%s8932_s5 + $0xc8] sm:$0xff] }
 0x1bf   :  { %514 = vmatpush.msrb.mxu1 %v5273_v0  ;;  %615 = vmatpush.msrb.mxu3 %v5273_v0  ;;  %v568_v63 = vld [vmem:[%s8932_s5 + $0x188] sm:$0xff] }
 0x1c0   :  { %3769 = vmatmul.msk.f32.vlgmr.msrb.gmra.mxu3 %vm468_vm4, %v3765_v39  ;;  %3764 = vmatmul.msk.f32.vlgmr.msrb.gmra.mxu1 %vm468_vm4, %v467_v43  ;;  %v3773_v39 = vld [vmem:[%s8932_s5 + $0x1d8] sm:$0xff]  ;;  %v3771_v43 = vld [vmem:[%s8932_s5 + $0x1c8] sm:$0xff] }
 0x1c1   :  { %705 = vmatpush.msra.mxu1 %v3824_v1  ;;  %745 = vmatpush.msra.mxu3 %v3825_v2  ;;  %v543_v1 = vld [vmem:[%s8932_s5 + $0xc0] sm:$0xff] }
 0x1c2   :  { %687 = vmatpush.msrb.mxu0 %v3788_v3  ;;  %727 = vmatpush.msra.mxu2 %v3789_v4  ;;  %v567_v2 = vld [vmem:[%s8932_s5 + $0x180] sm:$0xff]  ;;  %v542_v3 = vld [vmem:[%s8932_s5 + $0xb8] sm:$0xff] }
 0x1c3   :  { %706 = vmatpush.msra.mxu1 %v3822_v5  ;;  %746 = vmatpush.msra.mxu3 %v3823_v6  ;;  %v566_v4 = vld [vmem:[%s8932_s5 + $0x178] sm:$0xff]  ;;  %v541_v5 = vld [vmem:[%s8932_s5 + $0xb0] sm:$0xff] }
 0x1c4   :  { %688 = vmatpush.msrb.mxu0 %v3786_v7  ;;  %728 = vmatpush.msra.mxu2 %v3787_v8  ;;  %v565_v6 = vld [vmem:[%s8932_s5 + $0x170] sm:$0xff]  ;;  %v540_v7 = vld [vmem:[%s8932_s5 + $0xa8] sm:$0xff] }
 0x1c5   :  { %707 = vmatpush.msra.mxu1 %v3820_v9  ;;  %747 = vmatpush.msra.mxu3 %v3821_v10  ;;  %v564_v8 = vld [vmem:[%s8932_s5 + $0x168] sm:$0xff]  ;;  %v539_v9 = vld [vmem:[%s8932_s5 + $0xa0] sm:$0xff] }
 0x1c6   :  { %689 = vmatpush.msrb.mxu0 %v3784_v11  ;;  %729 = vmatpush.msra.mxu2 %v3785_v12  ;;  %v563_v10 = vld [vmem:[%s8932_s5 + $0x160] sm:$0xff]  ;;  %v538_v11 = vld [vmem:[%s8932_s5 + $0x98] sm:$0xff]  ;;  %v537_v12 = vld [vmem:[%s8932_s5 + $0x90] sm:$0xff] }
 0x1c7   :  { %708 = vmatpush.msra.mxu1 %v3818_v13  ;;  %748 = vmatpush.msra.mxu3 %v3819_v14  ;;  %v561_v13 = vld [vmem:[%s8932_s5 + $0x150] sm:$0xff]  ;;  %v536_v14 = vld [vmem:[%s8932_s5 + $0x88] sm:$0xff] }
 0x1c8   :  { %690 = vmatpush.msrb.mxu0 %v3782_v15  ;;  %730 = vmatpush.msra.mxu2 %v3783_v16  ;;  %v535_v15 = vld [vmem:[%s8932_s5 + $0x80] sm:$0xff] }
 0x1c9   :  { %709 = vmatpush.msra.mxu1 %v3816_v17  ;;  %749 = vmatpush.msra.mxu3 %v3817_v18  ;;  %v559_v16 = vld [vmem:[%s8932_s5 + $0x140] sm:$0xff]  ;;  %v533_v17 = vld [vmem:[%s8932_s5 + $0x70] sm:$0xff] }
 0x1ca   :  { %691 = vmatpush.msrb.mxu0 %v3780_v19  ;;  %731 = vmatpush.msra.mxu2 %v3781_v20  ;;  %v557_v18 = vld [vmem:[%s8932_s5 + $0x130] sm:$0xff]  ;;  %v531_v19 = vld [vmem:[%s8932_s5 + $0x60] sm:$0xff] }
 0x1cb   :  { %710 = vmatpush.msra.mxu1 %v3814_v21  ;;  %750 = vmatpush.msra.mxu3 %v3815_v22  ;;  %v555_v20 = vld [vmem:[%s8932_s5 + $0x120] sm:$0xff]  ;;  %v529_v21 = vld [vmem:[%s8932_s5 + $0x50] sm:$0xff] }
 0x1cc   :  { %692 = vmatpush.msrb.mxu0 %v3778_v23  ;;  %732 = vmatpush.msra.mxu2 %v3779_v24  ;;  %v553_v22 = vld [vmem:[%s8932_s5 + $0x110] sm:$0xff]  ;;  %v527_v23 = vld [vmem:[%s8932_s5 + $0x40] sm:$0xff] }
 0x1cd   :  { %711 = vmatpush.msra.mxu1 %v3812_v25  ;;  %751 = vmatpush.msra.mxu3 %v3813_v26  ;;  %v525_v24 = vld [vmem:[%s8932_s5 + $0x30] sm:$0xff]  ;;  %v523_v25 = vld [vmem:[%s8932_s5 + $0x20] sm:$0xff] }
 0x1ce   :  { %693 = vmatpush.msrb.mxu0 %v3776_v27  ;;  %733 = vmatpush.msra.mxu2 %v3777_v28  ;;  %v521_v26 = vld [vmem:[%s8932_s5 + $0x10] sm:$0xff]  ;;  %v534_v27 = vld [vmem:[%s8932_s5 + $0x78] sm:$0xff] }
 0x1cf   :  { %712 = vmatpush.msra.mxu1 %v3810_v29  ;;  %752 = vmatpush.msra.mxu3 %v3811_v31  ;;  %v562_v28 = vld [vmem:[%s8932_s5 + $0x158] sm:$0xff]  ;;  %v532_v29 = vld [vmem:[%s8932_s5 + $0x68] sm:$0xff] }
 0x1d0   :  { %694 = vmatpush.msrb.mxu0 %v3774_v32  ;;  %734 = vmatpush.msra.mxu2 %v3775_v33  ;;  %v560_v31 = vld [vmem:[%s8932_s5 + $0x148] sm:$0xff]  ;;  %v530_v32 = vld [vmem:[%s8932_s5 + $0x58] sm:$0xff] }
 0x1d1   :  { %713 = vmatpush.msra.mxu1 %v3808_v34  ;;  %753 = vmatpush.msra.mxu3 %v3809_v35  ;;  %v558_v33 = vld [vmem:[%s8932_s5 + $0x138] sm:$0xff]  ;;  %v519_v34 = vld [vmem:[%s8932_s5] sm:$0xff] }
 0x1d2   :  { %695 = vmatpush.msrb.mxu0 %v3772_v37  ;;  %735 = vmatpush.msra.mxu2 %v3773_v39  ;;  %v551_v35 = vld [vmem:[%s8932_s5 + $0x100] sm:$0xff]  ;;  %v528_v37 = vld [vmem:[%s8932_s5 + $0x48] sm:$0xff] }
 0x1d3   :  { %714 = vmatpush.msra.mxu1 %v3806_v40  ;;  %754 = vmatpush.msra.mxu3 %v3807_v41  ;;  %v556_v39 = vld [vmem:[%s8932_s5 + $0x128] sm:$0xff]  ;;  %v526_v40 = vld [vmem:[%s8932_s5 + $0x38] sm:$0xff] }
 0x1d4   :  { %696 = vmatpush.msrb.mxu0 %v3770_v42  ;;  %736 = vmatpush.msra.mxu2 %v3771_v43  ;;  %v554_v41 = vld [vmem:[%s8932_s5 + $0x118] sm:$0xff]  ;;  %v524_v42 = vld [vmem:[%s8932_s5 + $0x28] sm:$0xff] }
 0x1d5   :  { %715 = vmatpush.msra.mxu1 %v3804_v44  ;;  %755 = vmatpush.msra.mxu3 %v3805_v45  ;;  %v552_v43 = vld [vmem:[%s8932_s5 + $0x108] sm:$0xff]  ;;  %v522_v44 = vld [vmem:[%s8932_s5 + $0x18] sm:$0xff] }
 0x1d6   :  { %804 = vmatpush.msra.mxu0 %v550_v46  ;;  %828 = vmatpush.msrb.mxu2 %v574_v47  ;;  %v520_v45 = vld [vmem:[%s8932_s5 + $0x8] sm:$0xff] }
 0x1d7   :  { %716 = vmatpush.msra.mxu1 %v3802_v48  ;;  %756 = vmatpush.msra.mxu3 %v3803_v49 }
 0x1d8   :  { %805 = vmatpush.msra.mxu0 %v548_v53  ;;  %829 = vmatpush.msrb.mxu2 %v572_v54  ;;  %v3863_v53 = vld [vmem:[%s8932_s5 + $0x460] sm:$0xff]  ;;  %v3864_v54 = vld [vmem:[%s8932_s5 + $0x468] sm:$0xff] }
 0x1d9   :  { %764 = vmatpush.msrb.mxu1 %v549_v50  ;;  %788 = vmatpush.msrb.mxu3 %v573_v51  ;;  %v3865_v50 = vld [vmem:[%s8932_s5 + $0x470] sm:$0xff]  ;;  %v3866_v51 = vld [vmem:[%s8932_s5 + $0x478] sm:$0xff] }
 0x1da   :  { %806 = vmatpush.msra.mxu0 %v546_v57  ;;  %830 = vmatpush.msrb.mxu2 %v570_v58  ;;  %v3861_v57 = vld [vmem:[%s8932_s5 + $0x450] sm:$0xff]  ;;  %v3862_v58 = vld [vmem:[%s8932_s5 + $0x458] sm:$0xff] }
 0x1db   :  { %765 = vmatpush.msrb.mxu1 %v547_v55  ;;  %789 = vmatpush.msrb.mxu3 %v571_v56  ;;  %v3889_v55 = vld [vmem:[%s8932_s5 + $0x530] sm:$0xff]  ;;  %v3890_v56 = vld [vmem:[%s8932_s5 + $0x538] sm:$0xff] }
 0x1dc   :  { %807 = vmatpush.msra.mxu0 %v544_v62  ;;  %831 = vmatpush.msrb.mxu2 %v568_v63  ;;  %v3859_v62 = vld [vmem:[%s8932_s5 + $0x440] sm:$0xff]  ;;  %v3860_v63 = vld [vmem:[%s8932_s5 + $0x448] sm:$0xff] }
 0x1dd   :  { %766 = vmatpush.msrb.mxu1 %v545_v59  ;;  %790 = vmatpush.msrb.mxu3 %v569_v60  ;;  %v3887_v59 = vld [vmem:[%s8932_s5 + $0x520] sm:$0xff]  ;;  %v3888_v60 = vld [vmem:[%s8932_s5 + $0x528] sm:$0xff] }
 0x1de   :  { %808 = vmatpush.msra.mxu0 %v542_v3  ;;  %832 = vmatpush.msrb.mxu2 %v566_v4  ;;  %v3883_v3 = vld [vmem:[%s8932_s5 + $0x500] sm:$0xff]  ;;  %v3884_v4 = vld [vmem:[%s8932_s5 + $0x508] sm:$0xff] }
 0x1df   :  { %767 = vmatpush.msrb.mxu1 %v543_v1  ;;  %791 = vmatpush.msrb.mxu3 %v567_v2  ;;  %v3885_v1 = vld [vmem:[%s8932_s5 + $0x510] sm:$0xff]  ;;  %v3886_v2 = vld [vmem:[%s8932_s5 + $0x518] sm:$0xff] }
 0x1e0   :  { %809 = vmatpush.msra.mxu0 %v540_v7  ;;  %833 = vmatpush.msrb.mxu2 %v564_v8  ;;  %v3882_v7 = vld [vmem:[%s8932_s5 + $0x4f8] sm:$0xff]  ;;  %v3879_v8 = vld [vmem:[%s8932_s5 + $0x4e0] sm:$0xff] }
 0x1e1   :  { %768 = vmatpush.msrb.mxu1 %v541_v5  ;;  %792 = vmatpush.msrb.mxu3 %v565_v6  ;;  %v3830_v5 = vld [vmem:[%s8931_s4 + $0x10] sm:$0x7f] }
 0x1e2   :  { %810 = vmatpush.msra.mxu0 %v538_v11  ;;  %834 = vmatpush.msrb.mxu2 %v562_v28  ;;  %v3881_v6 = vld [vmem:[%s8932_s5 + $0x4f0] sm:$0xff]  ;;  %v3878_v11 = vld [vmem:[%s8932_s5 + $0x4d8] sm:$0xff]  ;;  %v3847_v28 = vld [vmem:[%s8932_s5 + $0x3e0] sm:$0xff] }
 0x1e3   :  { %769 = vmatpush.msrb.mxu1 %v539_v9  ;;  %793 = vmatpush.msrb.mxu3 %v563_v10  ;;  %v3880_v9 = vld [vmem:[%s8932_s5 + $0x4e8] sm:$0xff]  ;;  %v3877_v10 = vld [vmem:[%s8932_s5 + $0x4d0] sm:$0xff] }
 0x1e4   :  { %811 = vmatpush.msra.mxu0 %v536_v14  ;;  %835 = vmatpush.msrb.mxu2 %v560_v31  ;;  %v3873_v14 = vld [vmem:[%s8932_s5 + $0x4b0] sm:$0xff] }
 0x1e5   :  { %770 = vmatpush.msrb.mxu1 %v537_v12  ;;  %794 = vmatpush.msrb.mxu3 %v561_v13  ;;  %v3875_v12 = vld [vmem:[%s8932_s5 + $0x4c0] sm:$0xff]  ;;  %v3876_v13 = vld [vmem:[%s8932_s5 + $0x4c8] sm:$0xff]  ;;  %v3845_v31 = vld [vmem:[%s8932_s5 + $0x3d0] sm:$0xff] }
 0x1e6   :  { %812 = vmatpush.msra.mxu0 %v534_v27  ;;  %836 = vmatpush.msrb.mxu2 %v558_v33  ;;  %v3850_v27 = vld [vmem:[%s8932_s5 + $0x3f8] sm:$0xff]  ;;  %v3843_v33 = vld [vmem:[%s8932_s5 + $0x3c0] sm:$0xff] }
 0x1e7   :  { %771 = vmatpush.msrb.mxu1 %v535_v15  ;;  %795 = vmatpush.msrb.mxu3 %v559_v16  ;;  %v3874_v15 = vld [vmem:[%s8932_s5 + $0x4b8] sm:$0xff]  ;;  %v3871_v16 = vld [vmem:[%s8932_s5 + $0x4a0] sm:$0xff] }
 0x1e8   :  { %813 = vmatpush.msra.mxu0 %v532_v29  ;;  %837 = vmatpush.msrb.mxu2 %v556_v39  ;;  %v3848_v29 = vld [vmem:[%s8932_s5 + $0x3e8] sm:$0xff]  ;;  %v3839_v39 = vld [vmem:[%s8932_s5 + $0x3a0] sm:$0xff] }
 0x1e9   :  { %772 = vmatpush.msrb.mxu1 %v533_v17  ;;  %796 = vmatpush.msrb.mxu3 %v557_v18  ;;  %v3872_v17 = vld [vmem:[%s8932_s5 + $0x4a8] sm:$0xff]  ;;  %v3869_v18 = vld [vmem:[%s8932_s5 + $0x490] sm:$0xff] }
 0x1ea   :  { %814 = vmatpush.msra.mxu0 %v530_v32  ;;  %838 = vmatpush.msrb.mxu2 %v554_v41  ;;  %v3846_v32 = vld [vmem:[%s8932_s5 + $0x3d8] sm:$0xff]  ;;  %v3837_v41 = vld [vmem:[%s8932_s5 + $0x390] sm:$0xff] }
 0x1eb   :  { %773 = vmatpush.msrb.mxu1 %v531_v19  ;;  %797 = vmatpush.msrb.mxu3 %v555_v20  ;;  %v3870_v19 = vld [vmem:[%s8932_s5 + $0x498] sm:$0xff]  ;;  %v3867_v20 = vld [vmem:[%s8932_s5 + $0x480] sm:$0xff] }
 0x1ec   :  { %815 = vmatpush.msra.mxu0 %v528_v37  ;;  %839 = vmatpush.msrb.mxu2 %v552_v43  ;;  %v3842_v37 = vld [vmem:[%s8932_s5 + $0x3b8] sm:$0xff]  ;;  %v3835_v43 = vld [vmem:[%s8932_s5 + $0x380] sm:$0xff] }
 0x1ed   :  { %774 = vmatpush.msrb.mxu1 %v529_v21  ;;  %798 = vmatpush.msrb.mxu3 %v553_v22  ;;  %v3868_v21 = vld [vmem:[%s8932_s5 + $0x488] sm:$0xff]  ;;  %v3857_v22 = vld [vmem:[%s8932_s5 + $0x430] sm:$0xff] }
 0x1ee   :  { %816 = vmatpush.msra.mxu0 %v526_v40  ;;  %v3840_v40 = vld [vmem:[%s8932_s5 + $0x3a8] sm:$0xff] }
 0x1ef   :  { %775 = vmatpush.msrb.mxu1 %v527_v23  ;;  %799 = vmatpush.msrb.mxu3 %v551_v35  ;;  %v3858_v23 = vld [vmem:[%s8932_s5 + $0x438] sm:$0xff]  ;;  %v3841_v35 = vld [vmem:[%s8932_s5 + $0x3b0] sm:$0xff] }
 0x1f0   :  { %817 = vmatpush.msra.mxu0 %v524_v42  ;;  %v3838_v42 = vld [vmem:[%s8932_s5 + $0x398] sm:$0xff] }
 0x1f1   :  { %776 = vmatpush.msrb.mxu1 %v525_v24  ;;  %v3855_v24 = vld [vmem:[%s8932_s5 + $0x420] sm:$0xff] }
 0x1f2   :  { %818 = vmatpush.msra.mxu0 %v522_v44  ;;  %v3836_v44 = vld [vmem:[%s8932_s5 + $0x388] sm:$0xff] }
 0x1f3   :  { %777 = vmatpush.msrb.mxu1 %v523_v25  ;;  %v3852_v25 = vld [vmem:[%s8932_s5 + $0x408] sm:$0xff] }
 0x1f4   :  { %819 = vmatpush.msra.mxu0 %v520_v45  ;;  %v3928_v45 = vld [vmem:[%s8932_s5 + $0x630] sm:$0xff] }
 0x1f5   :  { %778 = vmatpush.msrb.mxu1 %v521_v26  ;;  %v3849_v26 = vld [vmem:[%s8932_s5 + $0x3f0] sm:$0xff] }
 0x1f7   :  { %779 = vmatpush.msrb.mxu1 %v519_v34  ;;  %v3844_v34 = vld [vmem:[%s8932_s5 + $0x3c8] sm:$0xff] }
 0x22f   :  { %v496_v47 = vpop.f32.mrf.mxu0 }
 0x235   :  { %v597_v46 = vpop.f32.mrf.mxu2 }
 0x236   :  { %737 = vmatmul.f32.vlgmr.msra.gmra.mxu2 %v597_v46  ;;  %697 = vmatmul.f32.vlgmr.msrb.gmra.mxu0 %v597_v46  ;;  %v3929_v46 = vld [vmem:[%s8932_s5 + $0x638] sm:$0xff] }
 0x237   :  { %949 = vmatpush.msra.mxu2 %v3865_v50  ;;  %989 = vmatpush.msrb.mxu0 %v3866_v51  ;;  %v3925_v50 = vld [vmem:[%s8932_s5 + $0x618] sm:$0xff]  ;;  %v3922_v51 = vld [vmem:[%s8932_s5 + $0x600] sm:$0xff] }
 0x239   :  { %950 = vmatpush.msra.mxu2 %v3863_v53  ;;  %990 = vmatpush.msrb.mxu0 %v3864_v54  ;;  %v3923_v53 = vld [vmem:[%s8932_s5 + $0x608] sm:$0xff]  ;;  %v3920_v54 = vld [vmem:[%s8932_s5 + $0x5f0] sm:$0xff] }
 0x23b   :  { %951 = vmatpush.msra.mxu2 %v3861_v57  ;;  %991 = vmatpush.msrb.mxu0 %v3862_v58  ;;  %v3918_v57 = vld [vmem:[%s8932_s5 + $0x5e0] sm:$0xff]  ;;  %v3919_v58 = vld [vmem:[%s8932_s5 + $0x5e8] sm:$0xff] }
 0x23d   :  { %v516_v48 = vpop.f32.mrf.mxu1  ;;  %952 = vmatpush.msra.mxu2 %v3859_v62  ;;  %992 = vmatpush.msrb.mxu0 %v3860_v63  ;;  %v3914_v62 = vld [vmem:[%s8932_s5 + $0x5c0] sm:$0xff]  ;;  %v3915_v63 = vld [vmem:[%s8932_s5 + $0x5c8] sm:$0xff] }
 0x23e   :  { %3829 = vmatmul.msk.f32.vlgmr.msrb.gmra.mxu2 %vm677_vm5, %v516_v48  ;;  %820 = vmatmul.f32.vlgmr.msra.gmra.mxu0 %v496_v47 }
 0x23f   :  { %953 = vmatpush.msra.mxu2 %v3857_v22  ;;  %993 = vmatpush.msrb.mxu0 %v3858_v23  ;;  %v3945_v22 = vld [vmem:[%s8932_s5 + $0x6b8] sm:$0xff]  ;;  %v3942_v23 = vld [vmem:[%s8932_s5 + $0x6a0] sm:$0xff] }
 0x241   :  { %954 = vmatpush.msra.mxu2 %v3855_v24  ;;  %v3943_v24 = vld [vmem:[%s8932_s5 + $0x6a8] sm:$0xff] }
 0x243   :  { %v617_v49 = vpop.f32.mrf.mxu3 }
 0x244   :  { %3826 = vmatmul.msk.f32.vlgmr.msra.gmra.mxu1 %vm677_vm5, %v617_v49  ;;  %3827 = vmatmul.msk.f32.vlgmr.msra.gmra.mxu3 %vm677_vm5, %v617_v49  ;;  %v3924_v49 = vld [vmem:[%s8932_s5 + $0x610] sm:$0xff] }
 0x245   :  { %3831 = vmatpush.msk.msra.mxu3 %vm472_vm3, %v5213_v36  ;;  %3833 = vmatpush.msk.msra.mxu1 %vm472_vm3, %v5265_v61 }
 0x247   :  { %864 = vmatpush.msra.mxu3 %v5215_v38  ;;  %884 = vmatpush.msra.mxu1 %v5273_v0 }
 0x24c   :  { %780 = vmatmul.f32.vlgmr.msrb.gmra.mxu1 %v496_v47  ;;  %3828 = vmatmul.msk.f32.vlgmr.msrb.gmra.mxu3 %vm677_vm5, %v516_v48  ;;  %v3926_v47 = vld [vmem:[%s8932_s5 + $0x620] sm:$0xff]  ;;  %v3927_v48 = vld [vmem:[%s8932_s5 + $0x628] sm:$0xff] }
 0x24d   :  { %973 = vmatpush.msrb.mxu3 %v3889_v55  ;;  %1013 = vmatpush.msrb.mxu1 %v3890_v56  ;;  %v3921_v55 = vld [vmem:[%s8932_s5 + $0x5f8] sm:$0xff] }
 0x24f   :  { %974 = vmatpush.msrb.mxu3 %v3887_v59  ;;  %1014 = vmatpush.msrb.mxu1 %v3888_v60  ;;  %v3916_v59 = vld [vmem:[%s8932_s5 + $0x5d0] sm:$0xff]  ;;  %v3917_v60 = vld [vmem:[%s8932_s5 + $0x5d8] sm:$0xff] }
 0x251   :  { %975 = vmatpush.msrb.mxu3 %v3885_v1  ;;  %1015 = vmatpush.msrb.mxu1 %v3886_v2  ;;  %v3912_v2 = vld [vmem:[%s8932_s5 + $0x5b0] sm:$0xff] }
 0x253   :  { %976 = vmatpush.msrb.mxu3 %v3883_v3  ;;  %1016 = vmatpush.msrb.mxu1 %v3884_v4  ;;  %v3913_v3 = vld [vmem:[%s8932_s5 + $0x5b8] sm:$0xff] }
 0x254   :  { %3832 = vmatmul.msk.f32.vlgmr.msra.gmra.mxu3 %vm468_vm4, %v3830_v5  ;;  %3834 = vmatmul.msk.f32.vlgmr.msra.gmra.mxu1 %vm468_vm4, %v3830_v5  ;;  %v3910_v5 = vld [vmem:[%s8932_s5 + $0x5a0] sm:$0xff] }
 0x255   :  { %977 = vmatpush.msrb.mxu3 %v3881_v6  ;;  %1017 = vmatpush.msrb.mxu1 %v3882_v7  ;;  %v3911_v6 = vld [vmem:[%s8932_s5 + $0x5a8] sm:$0xff]  ;;  %v3908_v7 = vld [vmem:[%s8932_s5 + $0x590] sm:$0xff] }
 0x257   :  { %978 = vmatpush.msrb.mxu3 %v3879_v8  ;;  %1018 = vmatpush.msrb.mxu1 %v3880_v9  ;;  %v3909_v8 = vld [vmem:[%s8932_s5 + $0x598] sm:$0xff] }
 0x259   :  { %979 = vmatpush.msrb.mxu3 %v3877_v10  ;;  %1019 = vmatpush.msrb.mxu1 %v3878_v11  ;;  %v3952_v10 = vld [vmem:[%s8932_s5 + $0x6f0] sm:$0xff]  ;;  %v3953_v11 = vld [vmem:[%s8932_s5 + $0x6f8] sm:$0xff] }
 0x25b   :  { %980 = vmatpush.msrb.mxu3 %v3875_v12  ;;  %1020 = vmatpush.msrb.mxu1 %v3876_v13  ;;  %v3950_v13 = vld [vmem:[%s8932_s5 + $0x6e0] sm:$0xff] }
 0x25d   :  { %981 = vmatpush.msrb.mxu3 %v3873_v14  ;;  %1021 = vmatpush.msrb.mxu1 %v3874_v15  ;;  %v3951_v14 = vld [vmem:[%s8932_s5 + $0x6e8] sm:$0xff]  ;;  %v3948_v15 = vld [vmem:[%s8932_s5 + $0x6d0] sm:$0xff] }
 0x25f   :  { %982 = vmatpush.msrb.mxu3 %v3871_v16  ;;  %1022 = vmatpush.msrb.mxu1 %v3872_v17  ;;  %v3949_v16 = vld [vmem:[%s8932_s5 + $0x6d8] sm:$0xff]  ;;  %v3946_v17 = vld [vmem:[%s8932_s5 + $0x6c0] sm:$0xff] }
 0x261   :  { %983 = vmatpush.msrb.mxu3 %v3869_v18  ;;  %1023 = vmatpush.msrb.mxu1 %v3870_v19  ;;  %v3947_v18 = vld [vmem:[%s8932_s5 + $0x6c8] sm:$0xff] }
 0x263   :  { %984 = vmatpush.msrb.mxu3 %v3867_v20  ;;  %1024 = vmatpush.msrb.mxu1 %v3868_v21  ;;  %v3893_v20 = vld [vmem:[%s8931_s4 + $0x18] sm:$0x7f]  ;;  %v3944_v21 = vld [vmem:[%s8932_s5 + $0x6b0] sm:$0xff] }
 0x265   :  { %3894 = vmatpush.msk.msra.mxu3 %vm472_vm3, %v5213_v36  ;;  %3896 = vmatpush.msk.msra.mxu1 %vm472_vm3, %v5265_v61  ;;  %v3856_v36 = vld [vmem:[%s8932_s5 + $0x428] sm:$0xff]  ;;  %v3854_v61 = vld [vmem:[%s8932_s5 + $0x418] sm:$0xff] }
 0x266   :  { %994 = vmatpush.msrb.mxu0 %v3856_v36  ;;  %v3940_v36 = vld [vmem:[%s8932_s5 + $0x690] sm:$0xff] }
 0x267   :  { %1051 = vmatpush.msra.mxu3 %v5215_v38  ;;  %1071 = vmatpush.msra.mxu1 %v5273_v0  ;;  %v3853_v38 = vld [vmem:[%s8932_s5 + $0x410] sm:$0xff]  ;;  %v3851_v0 = vld [vmem:[%s8932_s5 + $0x400] sm:$0xff] }
 0x268   :  { %955 = vmatpush.msra.mxu2 %v3853_v38  ;;  %995 = vmatpush.msrb.mxu0 %v3854_v61  ;;  %v3941_v38 = vld [vmem:[%s8932_s5 + $0x698] sm:$0xff]  ;;  %v3906_v61 = vld [vmem:[%s8932_s5 + $0x580] sm:$0xff] }
 0x26a   :  { %956 = vmatpush.msra.mxu2 %v3851_v0  ;;  %996 = vmatpush.msrb.mxu0 %v3852_v25  ;;  %v3938_v0 = vld [vmem:[%s8932_s5 + $0x680] sm:$0xff]  ;;  %v3907_v25 = vld [vmem:[%s8932_s5 + $0x588] sm:$0xff] }
 0x26c   :  { %957 = vmatpush.msra.mxu2 %v3849_v26  ;;  %997 = vmatpush.msrb.mxu0 %v3850_v27  ;;  %v3939_v26 = vld [vmem:[%s8932_s5 + $0x688] sm:$0xff]  ;;  %v3904_v27 = vld [vmem:[%s8932_s5 + $0x570] sm:$0xff] }
 0x26e   :  { %958 = vmatpush.msra.mxu2 %v3847_v28  ;;  %998 = vmatpush.msrb.mxu0 %v3848_v29  ;;  %v3936_v28 = vld [vmem:[%s8932_s5 + $0x670] sm:$0xff]  ;;  %v3905_v29 = vld [vmem:[%s8932_s5 + $0x578] sm:$0xff] }
 0x270   :  { %959 = vmatpush.msra.mxu2 %v3845_v31  ;;  %999 = vmatpush.msrb.mxu0 %v3846_v32  ;;  %v3937_v31 = vld [vmem:[%s8932_s5 + $0x678] sm:$0xff]  ;;  %v3902_v32 = vld [vmem:[%s8932_s5 + $0x560] sm:$0xff] }
 0x272   :  { %960 = vmatpush.msra.mxu2 %v3843_v33  ;;  %1000 = vmatpush.msrb.mxu0 %v3844_v34  ;;  %v3934_v33 = vld [vmem:[%s8932_s5 + $0x660] sm:$0xff]  ;;  %v3903_v34 = vld [vmem:[%s8932_s5 + $0x568] sm:$0xff] }
 0x274   :  { %961 = vmatpush.msra.mxu2 %v3841_v35  ;;  %1001 = vmatpush.msrb.mxu0 %v3842_v37  ;;  %v3935_v35 = vld [vmem:[%s8932_s5 + $0x668] sm:$0xff]  ;;  %v3900_v37 = vld [vmem:[%s8932_s5 + $0x550] sm:$0xff] }
 0x276   :  { %962 = vmatpush.msra.mxu2 %v3839_v39  ;;  %1002 = vmatpush.msrb.mxu0 %v3840_v40  ;;  %v3932_v39 = vld [vmem:[%s8932_s5 + $0x650] sm:$0xff]  ;;  %v3901_v40 = vld [vmem:[%s8932_s5 + $0x558] sm:$0xff] }
 0x278   :  { %963 = vmatpush.msra.mxu2 %v3837_v41  ;;  %1003 = vmatpush.msrb.mxu0 %v3838_v42  ;;  %v3933_v41 = vld [vmem:[%s8932_s5 + $0x658] sm:$0xff]  ;;  %v3898_v42 = vld [vmem:[%s8932_s5 + $0x540] sm:$0xff] }
 0x27a   :  { %964 = vmatpush.msra.mxu2 %v3835_v43  ;;  %1004 = vmatpush.msrb.mxu0 %v3836_v44  ;;  %v3930_v43 = vld [vmem:[%s8932_s5 + $0x640] sm:$0xff]  ;;  %v3899_v44 = vld [vmem:[%s8932_s5 + $0x548] sm:$0xff] }
 0x27c   :  { %1136 = vmatpush.msrb.mxu2 %v3928_v45  ;;  %1176 = vmatpush.msra.mxu0 %v3929_v46  ;;  %v3931_v45 = vld [vmem:[%s8932_s5 + $0x648] sm:$0xff] }
 0x27e   :  { %1137 = vmatpush.msrb.mxu2 %v3926_v47  ;;  %1177 = vmatpush.msra.mxu0 %v3927_v48 }
 0x280   :  { %1138 = vmatpush.msrb.mxu2 %v3924_v49  ;;  %1178 = vmatpush.msra.mxu0 %v3925_v50 }
 0x282   :  { %1139 = vmatpush.msrb.mxu2 %v3922_v51  ;;  %1179 = vmatpush.msra.mxu0 %v3923_v53 }
 0x284   :  { %1140 = vmatpush.msrb.mxu2 %v3920_v54  ;;  %1180 = vmatpush.msra.mxu0 %v3921_v55 }
 0x286   :  { %1141 = vmatpush.msrb.mxu2 %v3918_v57  ;;  %1181 = vmatpush.msra.mxu0 %v3919_v58  ;;  %v3995_v58 = vld [vmem:[%s8933_s8 + $0x2b0] sm:$0xff] }
 0x288   :  { %1142 = vmatpush.msrb.mxu2 %v3916_v59  ;;  %1182 = vmatpush.msra.mxu0 %v3917_v60  ;;  %v3993_v59 = vld [vmem:[%s8933_s8 + $0x2a0] sm:$0xff]  ;;  %v3991_v60 = vld [vmem:[%s8933_s8 + $0x290] sm:$0xff] }
 0x28a   :  { %1143 = vmatpush.msrb.mxu2 %v3914_v62  ;;  %1183 = vmatpush.msra.mxu0 %v3915_v63  ;;  %v3989_v63 = vld [vmem:[%s8933_s8 + $0x280] sm:$0xff] }
 0x28c   :  { %1144 = vmatpush.msrb.mxu2 %v3912_v2  ;;  %1184 = vmatpush.msra.mxu0 %v3913_v3 }
 0x28e   :  { %1145 = vmatpush.msrb.mxu2 %v3910_v5  ;;  %1185 = vmatpush.msra.mxu0 %v3911_v6  ;;  %v5973_v5 = vld [vmem:[%s8934_s6] sm:$0x3]  ;;  %v3987_v6 = vld [vmem:[%s8933_s8 + $0x270] sm:$0xff] }
 0x290   :  { %1146 = vmatpush.msrb.mxu2 %v3908_v7  ;;  %1186 = vmatpush.msra.mxu0 %v3909_v8 }
 0x292   :  { %1147 = vmatpush.msrb.mxu2 %v3906_v61  ;;  %1187 = vmatpush.msra.mxu0 %v3907_v25  ;;  %v3977_v61 = vld [vmem:[%s8933_s8 + $0x220] sm:$0xff] }
 0x293   :  { %v1228_v25 = vld [vmem:[%s8935_s7] sm:$0x7] }
 0x294   :  { %1148 = vmatpush.msrb.mxu2 %v3904_v27  ;;  %1188 = vmatpush.msra.mxu0 %v3905_v29  ;;  %v3975_v27 = vld [vmem:[%s8933_s8 + $0x210] sm:$0xff] }
 0x296   :  { %1149 = vmatpush.msrb.mxu2 %v3902_v32  ;;  %1189 = vmatpush.msra.mxu0 %v3903_v34  ;;  %v4015_v32 = vld [vmem:[%s8933_s8 + $0x350] sm:$0xff]  ;;  %v4020_v34 = vld [vmem:[%s8933_s8 + $0x378] sm:$0xff] }
 0x298   :  { %1150 = vmatpush.msrb.mxu2 %v3900_v37  ;;  %1190 = vmatpush.msra.mxu0 %v3901_v40  ;;  %v3973_v37 = vld [vmem:[%s8933_s8 + $0x200] sm:$0xff]  ;;  %v4018_v40 = vld [vmem:[%s8933_s8 + $0x368] sm:$0xff] }
 0x29a   :  { %1151 = vmatpush.msrb.mxu2 %v3898_v42  ;;  %1191 = vmatpush.msra.mxu0 %v3899_v44  ;;  %v3971_v42 = vld [vmem:[%s8933_s8 + $0x1f0] sm:$0xff]  ;;  %v4016_v44 = vld [vmem:[%s8933_s8 + $0x358] sm:$0xff] }
 0x2b3   :  { %v698_v50 = vpop.f32.mrf.mxu0 }
 0x2b9   :  { %v738_v51 = vpop.f32.mrf.mxu2 }
 0x2bb   :  { %v821_v53 = vpop.f32.mrf.mxu0 }
 0x2c1   :  { %v5802_v56 = vpop.f32.mrf.mxu1  ;;  %v841_v54 = vpop.f32.mrf.mxu2 }
 0x2c7   :  { %v5822_v1 = vpop.f32.mrf.mxu3 }
 0x2c8   :  { %v759_v55 = vadd.f32 %v5822_v1, %v738_v51  ;;  %v3967_v51 = vld [vmem:[%s8933_s8 + $0x1d0] sm:$0xff] }
 0x2c9   :  { %v5830_v4 = vpop.f32.mrf.mxu1 }
 0x2ca   :  { %v822_v62 = vadd.f32 %v821_v53, %v759_v55  ;;  %v4005_v53 = vld [vmem:[%s8933_s8 + $0x300] sm:$0xff]  ;;  %v3986_v55 = vld [vmem:[%s8933_s8 + $0x268] sm:$0xff] }
 0x2cc   :  { %v842_v7 = vadd.f32 %v841_v54, %v822_v62  ;;  %v4012_v54 = vld [vmem:[%s8933_s8 + $0x338] sm:$0xff] }
 0x2cd   :  { %v1311_v62 = vld [vmem:[%s8933_s8 + $0xf8] sm:$0xff] }
 0x2cf   :  { %v5844_v9 = vpop.f32.mrf.mxu3 }
 0x2d1   :  { %v886_v12 = vpop.f32.mrf.mxu1 }
 0x2d2   :  { %3891 = vmatmul.msk.f32.vlgmr.msrb.gmra.mxu3 %vm677_vm5, %v886_v12  ;;  %3892 = vmatmul.msk.f32.vlgmr.msrb.gmra.mxu1 %vm677_vm5, %v886_v12 }
 0x2d3   :  { %1160 = vmatpush.msrb.mxu3 %v3952_v10  ;;  %1200 = vmatpush.msrb.mxu1 %v3953_v11  ;;  %v3985_v10 = vld [vmem:[%s8933_s8 + $0x260] sm:$0xff]  ;;  %v719_v11 = vadd.f32 %v5802_v56, %v698_v50  ;;  %v3988_v50 = vld [vmem:[%s8933_s8 + $0x278] sm:$0xff] }
 0x2d5   :  { %1161 = vmatpush.msrb.mxu3 %v3950_v13  ;;  %1201 = vmatpush.msrb.mxu1 %v3951_v14  ;;  %v1221_v14 = vperm.slane %v5973_v5, 1 }
 0x2d7   :  { %v866_v19 = vpop.f32.mrf.mxu3  ;;  %1162 = vmatpush.msrb.mxu3 %v3948_v15  ;;  %1202 = vmatpush.msrb.mxu1 %v3949_v16  ;;  %v3983_v15 = vld [vmem:[%s8933_s8 + $0x250] sm:$0xff]  ;;  %v782_v16 = vadd.f32 %v5830_v4, %v719_v11  ;;  %v3997_v11 = vld [vmem:[%s8933_s8 + $0x2c0] sm:$0xff] }
 0x2d8   :  { %965 = vmatmul.f32.vlgmr.msra.gmra.mxu2 %v866_v19  ;;  %1005 = vmatmul.f32.vlgmr.msrb.gmra.mxu0 %v866_v19  ;;  %v3979_v4 = vld [vmem:[%s8933_s8 + $0x230] sm:$0xff] }
 0x2d9   :  { %1163 = vmatpush.msrb.mxu3 %v3946_v17  ;;  %1203 = vmatpush.msrb.mxu1 %v3947_v18  ;;  %v802_v56 = vadd.f32 %v5844_v9, %v782_v16  ;;  %v4019_v9 = vld [vmem:[%s8933_s8 + $0x370] sm:$0xff]  ;;  %v4002_v16 = vld [vmem:[%s8933_s8 + $0x2e8] sm:$0xff] }
 0x2da   :  { %3895 = vmatmul.msk.f32.vlgmr.msra.gmra.mxu3 %vm468_vm4, %v3893_v20  ;;  %3897 = vmatmul.msk.f32.vlgmr.msra.gmra.mxu1 %vm468_vm4, %v3893_v20  ;;  %v3981_v20 = vld [vmem:[%s8933_s8 + $0x240] sm:$0xff] }
 0x2db   :  { %1164 = vmatpush.msrb.mxu3 %v3944_v21  ;;  %1204 = vmatpush.msrb.mxu1 %v3945_v22 }
 0x2dc   :  { %1441 = vmatpush.msrb.mxu0 %v3995_v58  ;;  %v4003_v58 = vld [vmem:[%s8933_s8 + $0x2f0] sm:$0xff] }
 0x2dd   :  { %1165 = vmatpush.msrb.mxu3 %v3942_v23  ;;  %1205 = vmatpush.msrb.mxu1 %v3943_v24 }
 0x2de   :  { %1442 = vmatpush.msrb.mxu0 %v3993_v59  ;;  %v4010_v59 = vld [vmem:[%s8933_s8 + $0x328] sm:$0xff] }
 0x2df   :  { %1166 = vmatpush.msrb.mxu3 %v3940_v36  ;;  %1206 = vmatpush.msrb.mxu1 %v3941_v38  ;;  %v1220_v38 = vperm.slane %v5973_v5, 0  ;;  %v4620_v5 = vld [vmem:[%s8933_s8 + $0x378] sm:$0xff] }
 0x2e0   :  { %1443 = vmatpush.msrb.mxu0 %v3991_v60  ;;  %v3984_v60 = vld [vmem:[%s8933_s8 + $0x258] sm:$0xff] }
 0x2e1   :  { %1167 = vmatpush.msrb.mxu3 %v3938_v0  ;;  %1207 = vmatpush.msrb.mxu1 %v3939_v26  ;;  %v4017_v26 = vld [vmem:[%s8933_s8 + $0x360] sm:$0xff] }
 0x2e2   :  { %1444 = vmatpush.msrb.mxu0 %v3989_v63  ;;  %v4001_v63 = vld [vmem:[%s8933_s8 + $0x2e0] sm:$0xff] }
 0x2e3   :  { %1168 = vmatpush.msrb.mxu3 %v3936_v28  ;;  %1208 = vmatpush.msrb.mxu1 %v3937_v31  ;;  %v3960_v31 = vld [vmem:[%s8935_s7 + $0x4] sm:$0x7] }
 0x2e4   :  { %1445 = vmatpush.msrb.mxu0 %v3987_v6  ;;  %v3999_v6 = vld [vmem:[%s8933_s8 + $0x2d0] sm:$0xff] }
 0x2e5   :  { %1169 = vmatpush.msrb.mxu3 %v3934_v33  ;;  %1209 = vmatpush.msrb.mxu1 %v3935_v35  ;;  %v3996_v33 = vld [vmem:[%s8933_s8 + $0x2b8] sm:$0xff]  ;;  %v4013_v35 = vld [vmem:[%s8933_s8 + $0x340] sm:$0xff] }
 0x2e6   :  { %1446 = vmatpush.msrb.mxu0 %v3985_v10  ;;  %v1307_v10 = vld [vmem:[%s8933_s8 + $0xd8] sm:$0xff] }
 0x2e7   :  { %1170 = vmatpush.msrb.mxu3 %v3932_v39  ;;  %1210 = vmatpush.msrb.mxu1 %v3933_v41  ;;  %v3994_v39 = vld [vmem:[%s8933_s8 + $0x2a8] sm:$0xff]  ;;  %v4011_v41 = vld [vmem:[%s8933_s8 + $0x330] sm:$0xff] }
 0x2e8   :  { %1447 = vmatpush.msrb.mxu0 %v3983_v15  ;;  %v1310_v15 = vld [vmem:[%s8933_s8 + $0xf0] sm:$0xff] }
 0x2e9   :  { %1171 = vmatpush.msrb.mxu3 %v3930_v43  ;;  %1211 = vmatpush.msrb.mxu1 %v3931_v45  ;;  %v3992_v43 = vld [vmem:[%s8933_s8 + $0x298] sm:$0xff]  ;;  %v4009_v45 = vld [vmem:[%s8933_s8 + $0x320] sm:$0xff] }
 0x2ea   :  { %1448 = vmatpush.msrb.mxu0 %v3981_v20  ;;  %v4000_v20 = vld [vmem:[%s8933_s8 + $0x2d8] sm:$0xff] }
 0x2ec   :  { %1449 = vmatpush.msrb.mxu0 %v3979_v4  ;;  %v3998_v4 = vld [vmem:[%s8933_s8 + $0x2c8] sm:$0xff] }
 0x2ee   :  { %1450 = vmatpush.msrb.mxu0 %v3977_v61  ;;  %v1334_v61 = vld [vmem:[%s8933_s8 + $0x1b0] sm:$0xff] }
 0x2f0   :  { %1451 = vmatpush.msrb.mxu0 %v3975_v27  ;;  %v1332_v27 = vld [vmem:[%s8933_s8 + $0x1a0] sm:$0xff] }
 0x2f2   :  { %1452 = vmatpush.msrb.mxu0 %v3973_v37  ;;  %v1298_v37 = vld [vmem:[%s8933_s8 + $0x90] sm:$0xff] }
 0x2f4   :  { %1453 = vmatpush.msrb.mxu0 %v3971_v42  ;;  %v1293_v42 = vld [vmem:[%s8933_s8 + $0x68] sm:$0xff] }
 0x34f   :  { %v1026_v46 = vpop.f32.mrf.mxu1 }
 0x355   :  { %v986_v47 = vpop.f32.mrf.mxu3  ;;  %v1006_v57 = vpop.f32.mrf.mxu0 }
 0x356   :  { %v1027_v1 = vadd.f32 %v1026_v46, %v1006_v57  ;;  %v3969_v46 = vld [vmem:[%s8933_s8 + $0x1e0] sm:$0xff] }
 0x357   :  { %v1073_v48 = vpop.f32.mrf.mxu1  ;;  %1454 = vmatpush.msrb.mxu0 %v3969_v46  ;;  %v3965_v57 = vld [vmem:[%s8933_s8 + $0x1c0] sm:$0xff]  ;;  %v1291_v46 = vld [vmem:[%s8933_s8 + $0x58] sm:$0xff] }
 0x358   :  { %3954 = vmatmul.msk.f32.vlgmr.msrb.gmra.mxu3 %vm677_vm5, %v1073_v48  ;;  %3955 = vmatmul.msk.f32.vlgmr.msrb.gmra.mxu1 %vm677_vm5, %v1073_v48  ;;  %v1030_v12 = vadd.f32 %v1027_v1, %v842_v7  ;;  %v4007_v48 = vld [vmem:[%s8933_s8 + $0x310] sm:$0xff]  ;;  %v4008_v1 = vld [vmem:[%s8933_s8 + $0x318] sm:$0xff]  ;;  %v4006_v7 = vld [vmem:[%s8933_s8 + $0x308] sm:$0xff] }
 0x359   :  { %1455 = vmatpush.msrb.mxu0 %v3967_v51  ;;  %v1322_v51 = vld [vmem:[%s8933_s8 + $0x150] sm:$0xff] }
 0x35b   :  { %v966_v2 = vpop.f32.mrf.mxu2  ;;  %1456 = vmatpush.msrb.mxu0 %v3965_v57  ;;  %v1320_v57 = vld [vmem:[%s8933_s8 + $0x140] sm:$0xff] }
 0x35c   :  { %v987_v17 = vadd.f32 %v986_v47, %v966_v2  ;;  %v3990_v47 = vld [vmem:[%s8933_s8 + $0x288] sm:$0xff] }
 0x35d   :  { %v1053_v49 = vpop.f32.mrf.mxu3  ;;  %v3982_v2 = vld [vmem:[%s8933_s8 + $0x248] sm:$0xff] }
 0x35e   :  { %1152 = vmatmul.f32.vlgmr.msrb.gmra.mxu2 %v1053_v49  ;;  %1192 = vmatmul.f32.vlgmr.msra.gmra.mxu0 %v1053_v49  ;;  %v1029_v23 = vadd.f32 %v987_v17, %v802_v56  ;;  %v4014_v49 = vld [vmem:[%s8933_s8 + $0x348] sm:$0xff]  ;;  %v1303_v56 = vld [vmem:[%s8933_s8 + $0xb8] sm:$0xff] }
 0x35f   :  { %1564 = vmatpush.msra.mxu0 %v1311_v62  ;;  %v1305_v17 = vld [vmem:[%s8933_s8 + $0xc8] sm:$0xff]  ;;  %v1318_v62 = vld [vmem:[%s8933_s8 + $0x130] sm:$0xff] }
 0x3d5   :  { %v1213_v3 = vpop.f32.mrf.mxu1 }
 0x3db   :  { %v1193_v8 = vpop.f32.mrf.mxu0  ;;  %v1173_v19 = vpop.f32.mrf.mxu3 }
 0x3dc   :  { %v1214_v13 = vadd.f32 %v1213_v3, %v1193_v8  ;;  %v1309_v3 = vld [vmem:[%s8933_s8 + $0xe8] sm:$0xff]  ;;  %v3980_v8 = vld [vmem:[%s8933_s8 + $0x238] sm:$0xff] }
 0x3dd   :  { %1565 = vmatpush.msra.mxu0 %v1309_v3  ;;  %v1316_v3 = vld [vmem:[%s8933_s8 + $0x120] sm:$0xff] }
 0x3de   :  { %v1217_v18 = vadd.f32 %v1214_v13, %v1030_v12  ;;  %v4004_v12 = vld [vmem:[%s8933_s8 + $0x2f8] sm:$0xff]  ;;  %v3978_v13 = vld [vmem:[%s8933_s8 + $0x228] sm:$0xff] }
 0x3df   :  { %1566 = vmatpush.msra.mxu0 %v1307_v10  ;;  %v1314_v10 = vld [vmem:[%s8933_s8 + $0x110] sm:$0xff] }
 0x3e0   :  { %v1225_v21 = vadd.f32 %v1221_v14, %v1217_v18  ;;  %v3976_v18 = vld [vmem:[%s8933_s8 + $0x218] sm:$0xff] }
 0x3e1   :  { %v1153_v22 = vpop.f32.mrf.mxu2  ;;  %1567 = vmatpush.msra.mxu0 %v1305_v17  ;;  %v1317_v17 = vld [vmem:[%s8933_s8 + $0x128] sm:$0xff] }
 0x3e2   :  { %v5996_v24 = vmax.f32 %v1225_v21, 0.0  ;;  %v1174_v36 = vadd.f32 %v1173_v19, %v1153_v22  ;;  %v1308_v19 = vld [vmem:[%s8933_s8 + $0xe0] sm:$0xff]  ;;  %v3974_v21 = vld [vmem:[%s8933_s8 + $0x208] sm:$0xff]  ;;  %v1306_v22 = vld [vmem:[%s8933_s8 + $0xd0] sm:$0xff] }
 0x3e3   :  { %1568 = vmatpush.msra.mxu0 %v1303_v56 }
 0x3e4   :  { %v1216_v0 = vadd.f32 %v1174_v36, %v1029_v23  ;;  %3958 = vmatpush.msk.msra.mxu1 %vm1233_vm6, %v5996_v24  ;;  %v1301_v23 = vld [vmem:[%s8933_s8 + $0xa8] sm:$0xff]  ;;  %v3972_v36 = vld [vmem:[%s8933_s8 + $0x1f8] sm:$0xff] }
 0x3e5   :  { %3959 = vmatmul.msk.f32.vlgmr.msra.gmra.mxu1 %vm1229_vm7, %v1228_v25  ;;  %1569 = vmatpush.msra.mxu0 %v1301_v23  ;;  %v4085_v23 = vld [vmem:[%s8933_s8 + $0x538] sm:$0xff] }
 0x3e6   :  { %v1224_v28 = vadd.f32 %v1220_v38, %v1216_v0  ;;  %1465 = vmatpush.msrb.mxu1 %v4019_v9  ;;  %v1304_v9 = vld [vmem:[%s8933_s8 + $0xc0] sm:$0xff]  ;;  %v1299_v0 = vld [vmem:[%s8933_s8 + $0x98] sm:$0xff] }
 0x3e7   :  { %1570 = vmatpush.msra.mxu0 %v1299_v0  ;;  %v4081_v0 = vld [vmem:[%s8933_s8 + $0x518] sm:$0xff] }
 0x3e8   :  { %v6019_v29 = vmax.f32 %v1224_v28, 0.0  ;;  %1466 = vmatpush.msrb.mxu1 %v4017_v26  ;;  %v1302_v26 = vld [vmem:[%s8933_s8 + $0xb0] sm:$0xff]  ;;  %v1297_v28 = vld [vmem:[%s8933_s8 + $0x88] sm:$0xff] }
 0x3e9   :  { %1571 = vmatpush.msra.mxu0 %v1297_v28  ;;  %v4076_v28 = vld [vmem:[%s8933_s8 + $0x4f0] sm:$0xff] }
 0x3ea   :  { %3956 = vmatpush.msk.msra.mxu3 %vm1233_vm6, %v6019_v29  ;;  %3961 = vmatpush.msk.msra.mxu2 %vm1233_vm6, %v6019_v29 }
 0x3eb   :  { %3957 = vmatmul.msk.f32.vlgmr.msra.gmra.mxu3 %vm1229_vm7, %v1228_v25  ;;  %3962 = vmatmul.msk.f32.vlgmr.msra.gmra.mxu2 %vm1229_vm7, %v3960_v31  ;;  %v3970_v25 = vld [vmem:[%s8933_s8 + $0x1e8] sm:$0xff] }
 0x3ec   :  { %3963 = vmatpush.msk.msrb.mxu3 %vm1233_vm6, %v5996_v24  ;;  %1467 = vmatpush.msrb.mxu1 %v4015_v32  ;;  %v1300_v32 = vld [vmem:[%s8933_s8 + $0xa0] sm:$0xff] }
 0x3ed   :  { %1481 = vmatpush.msrb.mxu2 %v3996_v33  ;;  %v1330_v33 = vld [vmem:[%s8933_s8 + $0x190] sm:$0xff] }
 0x3ee   :  { %1505 = vmatpush.msra.mxu3 %v4020_v34  ;;  %1468 = vmatpush.msrb.mxu1 %v4013_v35  ;;  %v1295_v34 = vld [vmem:[%s8933_s8 + $0x78] sm:$0xff]  ;;  %v3966_v35 = vld [vmem:[%s8933_s8 + $0x1c8] sm:$0xff] }
 0x3ef   :  { %1482 = vmatpush.msrb.mxu2 %v3994_v39  ;;  %v1335_v39 = vld [vmem:[%s8933_s8 + $0x1b8] sm:$0xff]  ;;  %1572 = vmatpush.msra.mxu0 %v1295_v34  ;;  %v4072_v34 = vld [vmem:[%s8933_s8 + $0x4d0] sm:$0xff] }
 0x3f0   :  { %1506 = vmatpush.msra.mxu3 %v4018_v40  ;;  %1469 = vmatpush.msrb.mxu1 %v4011_v41  ;;  %v1328_v40 = vld [vmem:[%s8933_s8 + $0x180] sm:$0xff] }
 0x3f1   :  { %1483 = vmatpush.msrb.mxu2 %v3992_v43  ;;  %v1296_v41 = vld [vmem:[%s8933_s8 + $0x80] sm:$0xff]  ;;  %v1333_v43 = vld [vmem:[%s8933_s8 + $0x1a8] sm:$0xff]  ;;  %1573 = vmatpush.msra.mxu0 %v1293_v42 }
 0x3f2   :  { %1507 = vmatpush.msra.mxu3 %v4016_v44  ;;  %1470 = vmatpush.msrb.mxu1 %v4009_v45  ;;  %v1326_v44 = vld [vmem:[%s8933_s8 + $0x170] sm:$0xff]  ;;  %v4066_v42 = vld [vmem:[%s8933_s8 + $0x4a0] sm:$0xff] }
 0x3f3   :  { %3964 = vmatmul.msk.f32.vlgmr.msrb.gmra.mxu3 %vm1229_vm7, %v3960_v31  ;;  %1484 = vmatpush.msrb.mxu2 %v3990_v47  ;;  %v3968_v31 = vld [vmem:[%s8933_s8 + $0x1d8] sm:$0xff]  ;;  %v1294_v45 = vld [vmem:[%s8933_s8 + $0x70] sm:$0xff] }
 0x3f4   :  { %1471 = vmatpush.msrb.mxu1 %v4007_v48  ;;  %1508 = vmatpush.msra.mxu3 %v4014_v49  ;;  %v1331_v47 = vld [vmem:[%s8933_s8 + $0x198] sm:$0xff]  ;;  %v1324_v48 = vld [vmem:[%s8933_s8 + $0x160] sm:$0xff] }
 0x3f5   :  { %1485 = vmatpush.msrb.mxu2 %v3988_v50  ;;  %v1292_v49 = vld [vmem:[%s8933_s8 + $0x60] sm:$0xff]  ;;  %v1329_v50 = vld [vmem:[%s8933_s8 + $0x188] sm:$0xff]  ;;  %1574 = vmatpush.msra.mxu0 %v1291_v46 }
 0x3f6   :  { %1472 = vmatpush.msrb.mxu1 %v4005_v53  ;;  %1509 = vmatpush.msra.mxu3 %v4012_v54  ;;  %v1290_v53 = vld [vmem:[%s8933_s8 + $0x50] sm:$0xff]  ;;  %v1327_v54 = vld [vmem:[%s8933_s8 + $0x178] sm:$0xff]  ;;  %v4062_v46 = vld [vmem:[%s8933_s8 + $0x480] sm:$0xff] }
 0x3f7   :  { %1486 = vmatpush.msrb.mxu2 %v3986_v55  ;;  %v1288_v55 = vld [vmem:[%s8933_s8 + $0x40] sm:$0xff] }
 0x3f8   :  { %1473 = vmatpush.msrb.mxu1 %v4003_v58  ;;  %1510 = vmatpush.msra.mxu3 %v4010_v59  ;;  %v1289_v58 = vld [vmem:[%s8933_s8 + $0x48] sm:$0xff] }
 0x3f9   :  { %1487 = vmatpush.msrb.mxu2 %v3984_v60  ;;  %v1325_v59 = vld [vmem:[%s8933_s8 + $0x168] sm:$0xff]  ;;  %v1286_v60 = vld [vmem:[%s8933_s8 + $0x30] sm:$0xff]  ;;  %1575 = vmatpush.msra.mxu0 %v1289_v58  ;;  %v4050_v58 = vld [vmem:[%s8933_s8 + $0x420] sm:$0xff] }
 0x3fa   :  { %1474 = vmatpush.msrb.mxu1 %v4001_v63  ;;  %1511 = vmatpush.msra.mxu3 %v4008_v1  ;;  %v1287_v63 = vld [vmem:[%s8933_s8 + $0x38] sm:$0xff] }
 0x3fb   :  { %1488 = vmatpush.msrb.mxu2 %v3982_v2  ;;  %v1323_v1 = vld [vmem:[%s8933_s8 + $0x158] sm:$0xff]  ;;  %v1284_v2 = vld [vmem:[%s8933_s8 + $0x20] sm:$0xff]  ;;  %1576 = vmatpush.msra.mxu0 %v1287_v63 }
 0x3fc   :  { %1475 = vmatpush.msrb.mxu1 %v3999_v6  ;;  %1512 = vmatpush.msra.mxu3 %v4006_v7  ;;  %v1285_v6 = vld [vmem:[%s8933_s8 + $0x28] sm:$0xff]  ;;  %v4046_v63 = vld [vmem:[%s8933_s8 + $0x400] sm:$0xff] }
 0x3fd   :  { %1489 = vmatpush.msrb.mxu2 %v3980_v8  ;;  %v1321_v7 = vld [vmem:[%s8933_s8 + $0x148] sm:$0xff]  ;;  %v1282_v8 = vld [vmem:[%s8933_s8 + $0x10] sm:$0xff]  ;;  %1577 = vmatpush.msra.mxu0 %v1285_v6  ;;  %v4042_v6 = vld [vmem:[%s8933_s8 + $0x3e0] sm:$0xff] }
 0x3fe   :  { %1476 = vmatpush.msrb.mxu1 %v3997_v11  ;;  %1513 = vmatpush.msra.mxu3 %v4004_v12  ;;  %v1283_v11 = vld [vmem:[%s8933_s8 + $0x18] sm:$0xff] }
 0x3ff   :  { %1490 = vmatpush.msrb.mxu2 %v3978_v13  ;;  %v1319_v12 = vld [vmem:[%s8933_s8 + $0x138] sm:$0xff]  ;;  %1578 = vmatpush.msra.mxu0 %v1283_v11  ;;  %v1280_v13 = vld [vmem:[%s8933_s8] sm:$0xff] }
 0x400   :  { %1524 = vmatpush.msra.mxu1 %v1310_v15  ;;  %1514 = vmatpush.msra.mxu3 %v4002_v16  ;;  %v1312_v15 = vld [vmem:[%s8933_s8 + $0x100] sm:$0xff]  ;;  %v1281_v16 = vld [vmem:[%s8933_s8 + $0x8] sm:$0xff] }
 0x401   :  { %1491 = vmatpush.msrb.mxu2 %v3976_v18  ;;  %1579 = vmatpush.msra.mxu0 %v1281_v16  ;;  %v1315_v18 = vld [vmem:[%s8933_s8 + $0x118] sm:$0xff]  ;;  %v4038_v11 = vld [vmem:[%s8933_s8 + $0x3c0] sm:$0xff] }
 0x402   :  { %1525 = vmatpush.msra.mxu1 %v1308_v19  ;;  %1515 = vmatpush.msra.mxu3 %v4000_v20  ;;  %v1313_v19 = vld [vmem:[%s8933_s8 + $0x108] sm:$0xff]  ;;  %v4034_v16 = vld [vmem:[%s8933_s8 + $0x3a0] sm:$0xff] }
 0x403   :  { %1492 = vmatpush.msrb.mxu2 %v3974_v21 }
 0x404   :  { %1526 = vmatpush.msra.mxu1 %v1306_v22  ;;  %1516 = vmatpush.msra.mxu3 %v3998_v4  ;;  %v4084_v4 = vld [vmem:[%s8933_s8 + $0x530] sm:$0xff] }
 0x405   :  { %1493 = vmatpush.msrb.mxu2 %v3972_v36  ;;  %v4082_v36 = vld [vmem:[%s8933_s8 + $0x520] sm:$0xff] }
 0x406   :  { %1527 = vmatpush.msra.mxu1 %v1304_v9  ;;  %1548 = vmatpush.msrb.mxu3 %v1334_v61  ;;  %v4083_v9 = vld [vmem:[%s8933_s8 + $0x528] sm:$0xff]  ;;  %v4080_v61 = vld [vmem:[%s8933_s8 + $0x510] sm:$0xff] }
 0x407   :  { %1494 = vmatpush.msrb.mxu2 %v3970_v25  ;;  %v4078_v25 = vld [vmem:[%s8933_s8 + $0x500] sm:$0xff] }
 0x408   :  { %1528 = vmatpush.msra.mxu1 %v1302_v26  ;;  %1549 = vmatpush.msrb.mxu3 %v1332_v27  ;;  %v4079_v26 = vld [vmem:[%s8933_s8 + $0x508] sm:$0xff] }
 0x409   :  { %1495 = vmatpush.msrb.mxu2 %v3968_v31  ;;  %v4025_v27 = vld [vmem:[%s8935_s7 + $0x8] sm:$0x7]  ;;  %v4077_v31 = vld [vmem:[%s8933_s8 + $0x4f8] sm:$0xff] }
 0x40a   :  { %1529 = vmatpush.msra.mxu1 %v1300_v32  ;;  %1550 = vmatpush.msrb.mxu3 %v1330_v33  ;;  %v4074_v32 = vld [vmem:[%s8933_s8 + $0x4e0] sm:$0xff]  ;;  %v4075_v33 = vld [vmem:[%s8933_s8 + $0x4e8] sm:$0xff] }
 0x40b   :  { %1496 = vmatpush.msrb.mxu2 %v3966_v35  ;;  %v4073_v35 = vld [vmem:[%s8933_s8 + $0x4d8] sm:$0xff] }
 0x40c   :  { %1530 = vmatpush.msra.mxu1 %v1298_v37  ;;  %1551 = vmatpush.msrb.mxu3 %v1328_v40  ;;  %v4070_v37 = vld [vmem:[%s8933_s8 + $0x4c0] sm:$0xff]  ;;  %v4068_v40 = vld [vmem:[%s8933_s8 + $0x4b0] sm:$0xff] }
 0x40d   :  { %1588 = vmatpush.msra.mxu2 %v1335_v39  ;;  %v4071_v39 = vld [vmem:[%s8933_s8 + $0x4c8] sm:$0xff] }
 0x40e   :  { %1531 = vmatpush.msra.mxu1 %v1296_v41  ;;  %1552 = vmatpush.msrb.mxu3 %v1326_v44  ;;  %v4069_v41 = vld [vmem:[%s8933_s8 + $0x4b8] sm:$0xff]  ;;  %v4064_v44 = vld [vmem:[%s8933_s8 + $0x490] sm:$0xff] }
 0x40f   :  { %1589 = vmatpush.msra.mxu2 %v1333_v43  ;;  %v4067_v43 = vld [vmem:[%s8933_s8 + $0x4a8] sm:$0xff] }
 0x410   :  { %1532 = vmatpush.msra.mxu1 %v1294_v45  ;;  %1553 = vmatpush.msrb.mxu3 %v1324_v48  ;;  %v4065_v45 = vld [vmem:[%s8933_s8 + $0x498] sm:$0xff]  ;;  %v4060_v48 = vld [vmem:[%s8933_s8 + $0x470] sm:$0xff] }
 0x411   :  { %1590 = vmatpush.msra.mxu2 %v1331_v47  ;;  %v4063_v47 = vld [vmem:[%s8933_s8 + $0x488] sm:$0xff] }
 0x412   :  { %1533 = vmatpush.msra.mxu1 %v1292_v49  ;;  %1554 = vmatpush.msrb.mxu3 %v1322_v51  ;;  %v4061_v49 = vld [vmem:[%s8933_s8 + $0x478] sm:$0xff] }
 0x413   :  { %1591 = vmatpush.msra.mxu2 %v1329_v50  ;;  %v4058_v50 = vld [vmem:[%s8933_s8 + $0x460] sm:$0xff]  ;;  %v4057_v51 = vld [vmem:[%s8933_s8 + $0x458] sm:$0xff] }
 0x414   :  { %1534 = vmatpush.msra.mxu1 %v1290_v53  ;;  %1555 = vmatpush.msrb.mxu3 %v1320_v57  ;;  %v4054_v53 = vld [vmem:[%s8933_s8 + $0x440] sm:$0xff]  ;;  %v4053_v57 = vld [vmem:[%s8933_s8 + $0x438] sm:$0xff] }
 0x415   :  { %1592 = vmatpush.msra.mxu2 %v1327_v54  ;;  %v4055_v54 = vld [vmem:[%s8933_s8 + $0x448] sm:$0xff] }
 0x416   :  { %1535 = vmatpush.msra.mxu1 %v1288_v55  ;;  %1556 = vmatpush.msrb.mxu3 %v1318_v62  ;;  %v4052_v55 = vld [vmem:[%s8933_s8 + $0x430] sm:$0xff]  ;;  %v4049_v62 = vld [vmem:[%s8933_s8 + $0x418] sm:$0xff] }
 0x417   :  { %1593 = vmatpush.msra.mxu2 %v1325_v59  ;;  %v4051_v59 = vld [vmem:[%s8933_s8 + $0x428] sm:$0xff] }
 0x418   :  { %1536 = vmatpush.msra.mxu1 %v1286_v60  ;;  %1557 = vmatpush.msrb.mxu3 %v1316_v3  ;;  %v4048_v60 = vld [vmem:[%s8933_s8 + $0x410] sm:$0xff]  ;;  %v4045_v3 = vld [vmem:[%s8933_s8 + $0x3f8] sm:$0xff] }
 0x419   :  { %1594 = vmatpush.msra.mxu2 %v1323_v1  ;;  %v4047_v1 = vld [vmem:[%s8933_s8 + $0x408] sm:$0xff] }
 0x41a   :  { %1537 = vmatpush.msra.mxu1 %v1284_v2  ;;  %1558 = vmatpush.msrb.mxu3 %v1314_v10  ;;  %v4044_v2 = vld [vmem:[%s8933_s8 + $0x3f0] sm:$0xff]  ;;  %v4041_v10 = vld [vmem:[%s8933_s8 + $0x3d8] sm:$0xff] }
 0x41b   :  { %1595 = vmatpush.msra.mxu2 %v1321_v7  ;;  %v4043_v7 = vld [vmem:[%s8933_s8 + $0x3e8] sm:$0xff] }
 0x41c   :  { %1538 = vmatpush.msra.mxu1 %v1282_v8  ;;  %1559 = vmatpush.msrb.mxu3 %v1312_v15  ;;  %v4040_v8 = vld [vmem:[%s8933_s8 + $0x3d0] sm:$0xff]  ;;  %v4037_v15 = vld [vmem:[%s8933_s8 + $0x3b8] sm:$0xff] }
 0x41d   :  { %1596 = vmatpush.msra.mxu2 %v1319_v12  ;;  %v4039_v12 = vld [vmem:[%s8933_s8 + $0x3c8] sm:$0xff] }
 0x41e   :  { %1539 = vmatpush.msra.mxu1 %v1280_v13  ;;  %v4036_v13 = vld [vmem:[%s8933_s8 + $0x3b0] sm:$0xff] }
 0x41f   :  { %1597 = vmatpush.msra.mxu2 %v1317_v17  ;;  %v4035_v17 = vld [vmem:[%s8933_s8 + $0x3a8] sm:$0xff] }
 0x421   :  { %1598 = vmatpush.msra.mxu2 %v1315_v18  ;;  %v4032_v18 = vld [vmem:[%s8933_s8 + $0x390] sm:$0xff] }
 0x423   :  { %1599 = vmatpush.msra.mxu2 %v1313_v19  ;;  %v4033_v19 = vld [vmem:[%s8933_s8 + $0x398] sm:$0xff] }
 0x462   :  { %v1277_v22 = vpop.f32.mrf.mxu1 }
 0x46e   :  { %v1257_v20 = vpop.f32.mrf.mxu3  ;;  %v1358_v56 = vpop.f32.mrf.mxu2 }
 0x46f   :  { %1457 = vmatmul.f32.vlgmr.msrb.gmra.mxu0 %v1358_v56  ;;  %1497 = vmatmul.f32.vlgmr.msrb.gmra.mxu2 %v1358_v56  ;;  %v4031_v56 = vld [vmem:[%s8933_s8 + $0x388] sm:$0xff] }
 0x470   :  { %1709 = vmatpush.msrb.mxu2 %v4060_v48  ;;  %1749 = vmatpush.msrb.mxu0 %v4061_v49  ;;  %v4104_v48 = vld [vmem:[%s8933_s8 + $0x598] sm:$0xff] }
 0x472   :  { %1710 = vmatpush.msrb.mxu2 %v4058_v50  ;;  %v4147_v50 = vld [vmem:[%s8933_s8 + $0x6f0] sm:$0xff] }
 0x476   :  { %v1378_v21 = vpop.f32.mrf.mxu3 }
 0x477   :  { %4021 = vmatmul.msk.f32.vlgmr.msrb.gmra.mxu1 %vm677_vm5, %v1378_v21  ;;  %4022 = vmatmul.msk.f32.vlgmr.msra.gmra.mxu3 %vm677_vm5, %v1378_v21  ;;  %v4123_v21 = vld [vmem:[%s8933_s8 + $0x630] sm:$0xff] }
 0x478   :  { %1580 = vmatmul.f32.vlgmr.msra.gmra.mxu0 %v1257_v20  ;;  %4026 = vmatpush.msk.msra.mxu3 %vm1233_vm6, %v6019_v29 }
 0x479   :  { %4028 = vmatpush.msk.msrb.mxu1 %vm1233_vm6, %v5996_v24  ;;  %4024 = vmatmul.msk.f32.vlgmr.msra.gmra.mxu2 %vm677_vm5, %v1277_v22 }
 0x47f   :  { %1540 = vmatmul.f32.vlgmr.msra.gmra.mxu1 %v1257_v20  ;;  %4023 = vmatmul.msk.f32.vlgmr.msrb.gmra.mxu3 %vm677_vm5, %v1277_v22  ;;  %v4030_v20 = vld [vmem:[%s8933_s8 + $0x380] sm:$0xff]  ;;  %v4124_v22 = vld [vmem:[%s8933_s8 + $0x638] sm:$0xff] }
 0x480   :  { %1733 = vmatpush.msrb.mxu3 %v4084_v4  ;;  %1773 = vmatpush.msra.mxu1 %v4085_v23  ;;  %v4121_v4 = vld [vmem:[%s8933_s8 + $0x620] sm:$0xff]  ;;  %v4122_v23 = vld [vmem:[%s8933_s8 + $0x628] sm:$0xff] }
 0x482   :  { %1734 = vmatpush.msrb.mxu3 %v4082_v36  ;;  %1774 = vmatpush.msra.mxu1 %v4083_v9  ;;  %v4119_v36 = vld [vmem:[%s8933_s8 + $0x610] sm:$0xff]  ;;  %v4120_v9 = vld [vmem:[%s8933_s8 + $0x618] sm:$0xff] }
 0x484   :  { %1735 = vmatpush.msrb.mxu3 %v4080_v61  ;;  %1775 = vmatpush.msra.mxu1 %v4081_v0  ;;  %v4117_v61 = vld [vmem:[%s8933_s8 + $0x600] sm:$0xff]  ;;  %v4118_v0 = vld [vmem:[%s8933_s8 + $0x608] sm:$0xff] }
 0x486   :  { %1736 = vmatpush.msrb.mxu3 %v4078_v25  ;;  %1776 = vmatpush.msra.mxu1 %v4079_v26  ;;  %v4115_v25 = vld [vmem:[%s8933_s8 + $0x5f0] sm:$0xff]  ;;  %v4116_v26 = vld [vmem:[%s8933_s8 + $0x5f8] sm:$0xff] }
 0x487   :  { %4027 = vmatmul.msk.f32.vlgmr.msra.gmra.mxu3 %vm1229_vm7, %v4025_v27  ;;  %4029 = vmatmul.msk.f32.vlgmr.msrb.gmra.mxu1 %vm1229_vm7, %v4025_v27 }
 0x488   :  { %1737 = vmatpush.msrb.mxu3 %v4076_v28  ;;  %1777 = vmatpush.msra.mxu1 %v4077_v31  ;;  %v4113_v28 = vld [vmem:[%s8933_s8 + $0x5e0] sm:$0xff]  ;;  %v4114_v31 = vld [vmem:[%s8933_s8 + $0x5e8] sm:$0xff] }
 0x48a   :  { %1738 = vmatpush.msrb.mxu3 %v4074_v32  ;;  %1778 = vmatpush.msra.mxu1 %v4075_v33  ;;  %v4111_v32 = vld [vmem:[%s8933_s8 + $0x5d0] sm:$0xff]  ;;  %v4112_v33 = vld [vmem:[%s8933_s8 + $0x5d8] sm:$0xff] }
 0x48c   :  { %1739 = vmatpush.msrb.mxu3 %v4072_v34  ;;  %1779 = vmatpush.msra.mxu1 %v4073_v35  ;;  %v4109_v34 = vld [vmem:[%s8933_s8 + $0x5c0] sm:$0xff]  ;;  %v4110_v35 = vld [vmem:[%s8933_s8 + $0x5c8] sm:$0xff] }
 0x48e   :  { %1740 = vmatpush.msrb.mxu3 %v4070_v37  ;;  %1780 = vmatpush.msra.mxu1 %v4071_v39 }
 0x490   :  { %1741 = vmatpush.msrb.mxu3 %v4068_v40  ;;  %1781 = vmatpush.msra.mxu1 %v4069_v41  ;;  %v4107_v41 = vld [vmem:[%s8933_s8 + $0x5b0] sm:$0xff] }
 0x492   :  { %1742 = vmatpush.msrb.mxu3 %v4066_v42  ;;  %1782 = vmatpush.msra.mxu1 %v4067_v43  ;;  %v4108_v42 = vld [vmem:[%s8933_s8 + $0x5b8] sm:$0xff] }
 0x494   :  { %1743 = vmatpush.msrb.mxu3 %v4064_v44  ;;  %1783 = vmatpush.msra.mxu1 %v4065_v45  ;;  %v4105_v45 = vld [vmem:[%s8933_s8 + $0x5a0] sm:$0xff] }
 0x496   :  { %1744 = vmatpush.msrb.mxu3 %v4062_v46  ;;  %1784 = vmatpush.msra.mxu1 %v4063_v47  ;;  %v4106_v46 = vld [vmem:[%s8933_s8 + $0x5a8] sm:$0xff]  ;;  %v4103_v47 = vld [vmem:[%s8933_s8 + $0x590] sm:$0xff] }
 0x498   :  { %4089 = vmatpush.msk.msra.mxu3 %vm1233_vm6, %v6019_v29  ;;  %4091 = vmatpush.msk.msrb.mxu1 %vm1233_vm6, %v5996_v24  ;;  %v4059_v29 = vld [vmem:[%s8933_s8 + $0x468] sm:$0xff]  ;;  %v4056_v24 = vld [vmem:[%s8933_s8 + $0x450] sm:$0xff] }
 0x499   :  { %1750 = vmatpush.msrb.mxu0 %v4059_v29  ;;  %1711 = vmatpush.msrb.mxu2 %v4056_v24  ;;  %v4148_v29 = vld [vmem:[%s8933_s8 + $0x6f8] sm:$0xff] }
 0x49b   :  { %1751 = vmatpush.msrb.mxu0 %v4057_v51  ;;  %1712 = vmatpush.msrb.mxu2 %v4054_v53  ;;  %v4145_v51 = vld [vmem:[%s8933_s8 + $0x6e0] sm:$0xff]  ;;  %v4146_v53 = vld [vmem:[%s8933_s8 + $0x6e8] sm:$0xff] }
 0x49d   :  { %1752 = vmatpush.msrb.mxu0 %v4055_v54  ;;  %1713 = vmatpush.msrb.mxu2 %v4052_v55  ;;  %v4143_v54 = vld [vmem:[%s8933_s8 + $0x6d0] sm:$0xff]  ;;  %v4144_v55 = vld [vmem:[%s8933_s8 + $0x6d8] sm:$0xff] }
 0x49f   :  { %1753 = vmatpush.msrb.mxu0 %v4053_v57  ;;  %1714 = vmatpush.msrb.mxu2 %v4050_v58  ;;  %v4141_v57 = vld [vmem:[%s8933_s8 + $0x6c0] sm:$0xff]  ;;  %v4142_v58 = vld [vmem:[%s8933_s8 + $0x6c8] sm:$0xff] }
 0x4a1   :  { %1754 = vmatpush.msrb.mxu0 %v4051_v59  ;;  %1715 = vmatpush.msrb.mxu2 %v4048_v60  ;;  %v4088_v60 = vld [vmem:[%s8935_s7 + $0xc] sm:$0x7] }
 0x4a3   :  { %1755 = vmatpush.msrb.mxu0 %v4049_v62  ;;  %1716 = vmatpush.msrb.mxu2 %v4046_v63  ;;  %v4139_v62 = vld [vmem:[%s8933_s8 + $0x6b0] sm:$0xff]  ;;  %v4140_v63 = vld [vmem:[%s8933_s8 + $0x6b8] sm:$0xff] }
 0x4a5   :  { %1756 = vmatpush.msrb.mxu0 %v4047_v1  ;;  %1717 = vmatpush.msrb.mxu2 %v4044_v2  ;;  %v4137_v1 = vld [vmem:[%s8933_s8 + $0x6a0] sm:$0xff]  ;;  %v4138_v2 = vld [vmem:[%s8933_s8 + $0x6a8] sm:$0xff] }
 0x4a7   :  { %1757 = vmatpush.msrb.mxu0 %v4045_v3  ;;  %1718 = vmatpush.msrb.mxu2 %v4042_v6  ;;  %v4135_v3 = vld [vmem:[%s8933_s8 + $0x690] sm:$0xff]  ;;  %v4136_v6 = vld [vmem:[%s8933_s8 + $0x698] sm:$0xff] }
 0x4a9   :  { %1758 = vmatpush.msrb.mxu0 %v4043_v7  ;;  %1719 = vmatpush.msrb.mxu2 %v4040_v8  ;;  %v4101_v7 = vld [vmem:[%s8933_s8 + $0x580] sm:$0xff] }
 0x4aa   :  { %v4133_v8 = vld [vmem:[%s8933_s8 + $0x680] sm:$0xff] }
 0x4ab   :  { %1759 = vmatpush.msrb.mxu0 %v4041_v10  ;;  %1720 = vmatpush.msrb.mxu2 %v4038_v11  ;;  %v4102_v10 = vld [vmem:[%s8933_s8 + $0x588] sm:$0xff] }
 0x4ac   :  { %v4134_v11 = vld [vmem:[%s8933_s8 + $0x688] sm:$0xff] }
 0x4ad   :  { %1760 = vmatpush.msrb.mxu0 %v4039_v12  ;;  %1721 = vmatpush.msrb.mxu2 %v4036_v13  ;;  %v4099_v12 = vld [vmem:[%s8933_s8 + $0x570] sm:$0xff] }
 0x4ae   :  { %v4131_v13 = vld [vmem:[%s8933_s8 + $0x670] sm:$0xff] }
 0x4af   :  { %1761 = vmatpush.msrb.mxu0 %v4037_v15  ;;  %1722 = vmatpush.msrb.mxu2 %v4034_v16  ;;  %v4100_v15 = vld [vmem:[%s8933_s8 + $0x578] sm:$0xff] }
 0x4b0   :  { %v4132_v16 = vld [vmem:[%s8933_s8 + $0x678] sm:$0xff] }
 0x4b1   :  { %1762 = vmatpush.msrb.mxu0 %v4035_v17  ;;  %1723 = vmatpush.msrb.mxu2 %v4032_v18  ;;  %v4097_v17 = vld [vmem:[%s8933_s8 + $0x560] sm:$0xff] }
 0x4b2   :  { %v4129_v18 = vld [vmem:[%s8933_s8 + $0x660] sm:$0xff] }
 0x4b3   :  { %1763 = vmatpush.msrb.mxu0 %v4033_v19  ;;  %1724 = vmatpush.msrb.mxu2 %v4030_v20  ;;  %v4098_v19 = vld [vmem:[%s8933_s8 + $0x568] sm:$0xff] }
 0x4b4   :  { %v4130_v20 = vld [vmem:[%s8933_s8 + $0x668] sm:$0xff] }
 0x4b5   :  { %1764 = vmatpush.msrb.mxu0 %v4031_v56  ;;  %1896 = vmatpush.msra.mxu2 %v4123_v21  ;;  %v4095_v56 = vld [vmem:[%s8933_s8 + $0x550] sm:$0xff] }
 0x4b6   :  { %v4127_v21 = vld [vmem:[%s8933_s8 + $0x650] sm:$0xff] }
 0x4b7   :  { %1936 = vmatpush.msra.mxu0 %v4124_v22  ;;  %1897 = vmatpush.msra.mxu2 %v4121_v4  ;;  %v4096_v22 = vld [vmem:[%s8933_s8 + $0x558] sm:$0xff] }
 0x4b8   :  { %v4128_v4 = vld [vmem:[%s8933_s8 + $0x658] sm:$0xff] }
 0x4b9   :  { %1937 = vmatpush.msra.mxu0 %v4122_v23  ;;  %1898 = vmatpush.msra.mxu2 %v4119_v36  ;;  %v4093_v23 = vld [vmem:[%s8933_s8 + $0x540] sm:$0xff] }
 0x4ba   :  { %v4125_v36 = vld [vmem:[%s8933_s8 + $0x640] sm:$0xff] }
 0x4bb   :  { %1938 = vmatpush.msra.mxu0 %v4120_v9  ;;  %1899 = vmatpush.msra.mxu2 %v4117_v61  ;;  %v4094_v9 = vld [vmem:[%s8933_s8 + $0x548] sm:$0xff] }
 0x4bc   :  { %v4126_v61 = vld [vmem:[%s8933_s8 + $0x648] sm:$0xff] }
 0x4bd   :  { %1939 = vmatpush.msra.mxu0 %v4118_v0  ;;  %1900 = vmatpush.msra.mxu2 %v4115_v25  ;;  %v2012_v0 = vld [vmem:[%s8936_s10 + $0xb8] sm:$0xff]  ;;  %v2011_v25 = vld [vmem:[%s8936_s10 + $0xb0] sm:$0xff] }
 0x4bf   :  { %1940 = vmatpush.msra.mxu0 %v4116_v26  ;;  %1901 = vmatpush.msra.mxu2 %v4113_v28  ;;  %v2004_v26 = vld [vmem:[%s8936_s10 + $0x78] sm:$0xff]  ;;  %v2003_v28 = vld [vmem:[%s8936_s10 + $0x70] sm:$0xff] }
 0x4c1   :  { %1941 = vmatpush.msra.mxu0 %v4114_v31  ;;  %1902 = vmatpush.msra.mxu2 %v4111_v32  ;;  %v4167_v31 = vld [vmem:[%s8936_s10 + $0x138] sm:$0xff]  ;;  %v2002_v32 = vld [vmem:[%s8936_s10 + $0x68] sm:$0xff] }
 0x4c3   :  { %1942 = vmatpush.msra.mxu0 %v4112_v33  ;;  %1903 = vmatpush.msra.mxu2 %v4109_v34  ;;  %v4166_v33 = vld [vmem:[%s8936_s10 + $0x130] sm:$0xff]  ;;  %v2009_v34 = vld [vmem:[%s8936_s10 + $0xa0] sm:$0xff] }
 0x4c5   :  { %1943 = vmatpush.msra.mxu0 %v4110_v35  ;;  %1904 = vmatpush.msra.mxu2 %v4107_v41  ;;  %v4175_v35 = vld [vmem:[%s8936_s10 + $0x178] sm:$0xff]  ;;  %v4174_v41 = vld [vmem:[%s8936_s10 + $0x170] sm:$0xff] }
 0x4c7   :  { %1944 = vmatpush.msra.mxu0 %v4108_v42  ;;  %1905 = vmatpush.msra.mxu2 %v4105_v45  ;;  %v2008_v42 = vld [vmem:[%s8936_s10 + $0x98] sm:$0xff] }
 0x4c8   :  { %v2000_v45 = vld [vmem:[%s8936_s10 + $0x58] sm:$0xff] }
 0x4c9   :  { %1945 = vmatpush.msra.mxu0 %v4106_v46  ;;  %1906 = vmatpush.msra.mxu2 %v4103_v47  ;;  %v4173_v46 = vld [vmem:[%s8936_s10 + $0x168] sm:$0xff]  ;;  %v2007_v47 = vld [vmem:[%s8936_s10 + $0x90] sm:$0xff] }
 0x4cb   :  { %1946 = vmatpush.msra.mxu0 %v4104_v48  ;;  %1907 = vmatpush.msra.mxu2 %v4101_v7  ;;  %v4163_v48 = vld [vmem:[%s8936_s10 + $0x118] sm:$0xff]  ;;  %v4190_v7 = vld [vmem:[%s8936_s10 + $0x1e8] sm:$0xff] }
 0x4cd   :  { %1947 = vmatpush.msra.mxu0 %v4102_v10  ;;  %1908 = vmatpush.msra.mxu2 %v4099_v12  ;;  %v4189_v12 = vld [vmem:[%s8936_s10 + $0x1e0] sm:$0xff] }
 0x4cf   :  { %1948 = vmatpush.msra.mxu0 %v4100_v15  ;;  %1909 = vmatpush.msra.mxu2 %v4097_v17  ;;  %v1996_v17 = vld [vmem:[%s8936_s10 + $0x38] sm:$0xff] }
 0x4d1   :  { %1949 = vmatpush.msra.mxu0 %v4098_v19  ;;  %1910 = vmatpush.msra.mxu2 %v4095_v56  ;;  %v4185_v19 = vld [vmem:[%s8936_s10 + $0x1c0] sm:$0xff]  ;;  %v1995_v56 = vld [vmem:[%s8936_s10 + $0x30] sm:$0xff] }
 0x4d3   :  { %1950 = vmatpush.msra.mxu0 %v4096_v22  ;;  %1911 = vmatpush.msra.mxu2 %v4093_v23  ;;  %v4184_v22 = vld [vmem:[%s8936_s10 + $0x1b8] sm:$0xff]  ;;  %v1994_v23 = vld [vmem:[%s8936_s10 + $0x28] sm:$0xff] }
 0x4d5   :  { %1951 = vmatpush.msra.mxu0 %v4094_v9  ;;  %v4183_v9 = vld [vmem:[%s8936_s10 + $0x1b0] sm:$0xff] }
 0x4ec   :  { %v1458_v37 = vpop.f32.mrf.mxu0 }
 0x4f4   :  { %v1478_v27 = vpop.f32.mrf.mxu1 }
 0x4f5   :  { %v1479_v40 = vadd.f32 %v1478_v27, %v1458_v37  ;;  %v2010_v27 = vld [vmem:[%s8936_s10 + $0xa8] sm:$0xff]  ;;  %v2001_v37 = vld [vmem:[%s8936_s10 + $0x60] sm:$0xff] }
 0x4fa   :  { %v6563_v39 = vpop.f32.mrf.mxu3 }
 0x4fc   :  { %v1541_v43 = vpop.f32.mrf.mxu1 }
 0x4fd   :  { %v6571_v44 = vadd.f32 %v1541_v43, %v1479_v40  ;;  %v4165_v40 = vld [vmem:[%s8936_s10 + $0x128] sm:$0xff]  ;;  %v4164_v43 = vld [vmem:[%s8936_s10 + $0x120] sm:$0xff] }
 0x502   :  { %v6585_v49 = vpop.f32.mrf.mxu3 }
 0x503   :  { %v1562_v10 = vadd.f32 %v6585_v49, %v6571_v44  ;;  %v4187_v44 = vld [vmem:[%s8936_s10 + $0x1d0] sm:$0xff]  ;;  %v4186_v49 = vld [vmem:[%s8936_s10 + $0x1c8] sm:$0xff] }
 0x504   :  { %v1646_v24 = vpop.f32.mrf.mxu1 }
 0x505   :  { %4086 = vmatmul.msk.f32.vlgmr.msrb.gmra.mxu3 %vm677_vm5, %v1646_v24  ;;  %4087 = vmatmul.msk.f32.vlgmr.msra.gmra.mxu1 %vm677_vm5, %v1646_v24  ;;  %v4172_v24 = vld [vmem:[%s8936_s10 + $0x160] sm:$0xff] }
 0x506   :  { %1920 = vmatpush.msrb.mxu3 %v4147_v50  ;;  %1960 = vmatpush.msra.mxu1 %v4148_v29  ;;  %v6753_v50 = vpop.f32.mrf.mxu2  ;;  %v1999_v29 = vld [vmem:[%s8936_s10 + $0x50] sm:$0xff] }
 0x508   :  { %1921 = vmatpush.msrb.mxu3 %v4145_v51  ;;  %1961 = vmatpush.msra.mxu1 %v4146_v53  ;;  %v2006_v51 = vld [vmem:[%s8936_s10 + $0x88] sm:$0xff]  ;;  %v4162_v53 = vld [vmem:[%s8936_s10 + $0x110] sm:$0xff] }
 0x50a   :  { %v1626_v59 = vpop.f32.mrf.mxu3  ;;  %1922 = vmatpush.msrb.mxu3 %v4143_v54  ;;  %1962 = vmatpush.msra.mxu1 %v4144_v55  ;;  %v1998_v54 = vld [vmem:[%s8936_s10 + $0x48] sm:$0xff]  ;;  %v4171_v55 = vld [vmem:[%s8936_s10 + $0x158] sm:$0xff] }
 0x50b   :  { %1725 = vmatmul.f32.vlgmr.msrb.gmra.mxu2 %v1626_v59  ;;  %1765 = vmatmul.f32.vlgmr.msrb.gmra.mxu0 %v1626_v59  ;;  %v1997_v59 = vld [vmem:[%s8936_s10 + $0x40] sm:$0xff] }
 0x50c   :  { %1923 = vmatpush.msrb.mxu3 %v4141_v57  ;;  %1963 = vmatpush.msra.mxu1 %v4142_v58  ;;  %v2005_v57 = vld [vmem:[%s8936_s10 + $0x80] sm:$0xff]  ;;  %v4161_v58 = vld [vmem:[%s8936_s10 + $0x108] sm:$0xff] }
 0x50d   :  { %4090 = vmatmul.msk.f32.vlgmr.msra.gmra.mxu3 %vm1229_vm7, %v4088_v60  ;;  %4092 = vmatmul.msk.f32.vlgmr.msrb.gmra.mxu1 %vm1229_vm7, %v4088_v60  ;;  %v4170_v60 = vld [vmem:[%s8936_s10 + $0x150] sm:$0xff] }
 0x50e   :  { %1924 = vmatpush.msrb.mxu3 %v4139_v62  ;;  %1964 = vmatpush.msra.mxu1 %v4140_v63  ;;  %v6787_v63 = vpop.f32.mrf.mxu2 }
 0x50f   :  { %2089 = vmatpush.msrb.mxu2 %v4167_v31  ;;  %2117 = vmatpush.msrb.mxu0 %v4175_v35  ;;  %v4156_v31 = vld [vmem:[%s8936_s10 + $0xe0] sm:$0xff]  ;;  %v4155_v35 = vld [vmem:[%s8936_s10 + $0xd8] sm:$0xff] }
 0x510   :  { %1925 = vmatpush.msrb.mxu3 %v4137_v1  ;;  %1965 = vmatpush.msra.mxu1 %v4138_v2  ;;  %v4192_v2 = vld [vmem:[%s8936_s10 + $0x1f8] sm:$0xff] }
 0x511   :  { %2090 = vmatpush.msrb.mxu2 %v4166_v33  ;;  %2118 = vmatpush.msrb.mxu0 %v4174_v41  ;;  %v4198_v33 = vld [vmem:[%s8936_s10 + $0x228] sm:$0xff] }
 0x512   :  { %1926 = vmatpush.msrb.mxu3 %v4135_v3  ;;  %1966 = vmatpush.msra.mxu1 %v4136_v6  ;;  %v4191_v6 = vld [vmem:[%s8936_s10 + $0x1f0] sm:$0xff]  ;;  %v1990_v41 = vld [vmem:[%s8936_s10 + $0x8] sm:$0xff] }
 0x513   :  { %2091 = vmatpush.msrb.mxu2 %v4165_v40  ;;  %2119 = vmatpush.msrb.mxu0 %v4173_v46  ;;  %v4197_v40 = vld [vmem:[%s8936_s10 + $0x220] sm:$0xff] }
 0x514   :  { %1927 = vmatpush.msrb.mxu3 %v4133_v8  ;;  %1967 = vmatpush.msra.mxu1 %v4134_v11  ;;  %v1989_v46 = vld [vmem:[%s8936_s10] sm:$0xff] }
 0x515   :  { %2092 = vmatpush.msrb.mxu2 %v4164_v43  ;;  %2120 = vmatpush.msrb.mxu0 %v4172_v24  ;;  %v4179_v43 = vld [vmem:[%s8936_s10 + $0x190] sm:$0xff]  ;;  %v4152_v24 = vld [vmem:[%s8936_s10 + $0xc0] sm:$0xff] }
 0x516   :  { %1928 = vmatpush.msrb.mxu3 %v4131_v13  ;;  %1968 = vmatpush.msra.mxu1 %v4132_v16  ;;  %v4188_v16 = vld [vmem:[%s8936_s10 + $0x1d8] sm:$0xff] }
 0x517   :  { %2093 = vmatpush.msrb.mxu2 %v4163_v48  ;;  %2121 = vmatpush.msrb.mxu0 %v4171_v55  ;;  %v4178_v48 = vld [vmem:[%s8936_s10 + $0x188] sm:$0xff]  ;;  %v6924_v55 = vld [vmem:[%s8927_s0 + $0x38] sm:$0xf] }
 0x518   :  { %1929 = vmatpush.msrb.mxu3 %v4129_v18  ;;  %1969 = vmatpush.msra.mxu1 %v4130_v20  ;;  %v4160_v18 = vld [vmem:[%s8936_s10 + $0x100] sm:$0xff]  ;;  %v4169_v20 = vld [vmem:[%s8936_s10 + $0x148] sm:$0xff] }
 0x519   :  { %2094 = vmatpush.msrb.mxu2 %v4162_v53  ;;  %2122 = vmatpush.msrb.mxu0 %v4170_v60  ;;  %v4177_v53 = vld [vmem:[%s8936_s10 + $0x180] sm:$0xff] }
 0x51a   :  { %1930 = vmatpush.msrb.mxu3 %v4127_v21  ;;  %1970 = vmatpush.msra.mxu1 %v4128_v4  ;;  %v4159_v21 = vld [vmem:[%s8936_s10 + $0xf8] sm:$0xff]  ;;  %v4168_v4 = vld [vmem:[%s8936_s10 + $0x140] sm:$0xff] }
 0x51b   :  { %2095 = vmatpush.msrb.mxu2 %v4161_v58  ;;  %2123 = vmatpush.msrb.mxu0 %v4169_v20  ;;  %v6934_v58 = vld [vmem:[%s8927_s0 + $0x30] sm:$0xff]  ;;  %v6947_v60 = vld [vmem:[%s8927_s0 + $0x20] sm:$0xff] }
 0x51c   :  { %1931 = vmatpush.msrb.mxu3 %v4125_v36  ;;  %1971 = vmatpush.msra.mxu1 %v4126_v61  ;;  %v4158_v36 = vld [vmem:[%s8936_s10 + $0xf0] sm:$0xff]  ;;  %v4200_v61 = vld [vmem:[%s8936_s10 + $0x238] sm:$0xff] }
 0x51d   :  { %2096 = vmatpush.msrb.mxu2 %v4160_v18  ;;  %2124 = vmatpush.msrb.mxu0 %v4168_v4  ;;  %v4295_v4 = vld [vmem:[%s8928_s2 + $0xc0] sm:$0xff] }
 0x51e   :  { %2045 = vmatpush.msrb.mxu1 %v2012_v0  ;;  %2017 = vmatpush.msra.mxu3 %v2004_v26  ;;  %v1993_v0 = vld [vmem:[%s8936_s10 + $0x20] sm:$0xff]  ;;  %v4182_v26 = vld [vmem:[%s8936_s10 + $0x1a8] sm:$0xff] }
 0x51f   :  { %2097 = vmatpush.msrb.mxu2 %v4159_v21  ;;  %v4293_v21 = vld [vmem:[%s8928_s2 + $0xd0] sm:$0xff] }
 0x520   :  { %2046 = vmatpush.msrb.mxu1 %v2011_v25  ;;  %2018 = vmatpush.msra.mxu3 %v2003_v28  ;;  %v4157_v25 = vld [vmem:[%s8936_s10 + $0xe8] sm:$0xff]  ;;  %v1992_v28 = vld [vmem:[%s8936_s10 + $0x18] sm:$0xff] }
 0x521   :  { %2098 = vmatpush.msrb.mxu2 %v4158_v36 }
 0x522   :  { %2047 = vmatpush.msrb.mxu1 %v2010_v27  ;;  %2019 = vmatpush.msra.mxu3 %v2002_v32  ;;  %v4199_v27 = vld [vmem:[%s8936_s10 + $0x230] sm:$0xff]  ;;  %v4181_v32 = vld [vmem:[%s8936_s10 + $0x1a0] sm:$0xff] }
 0x523   :  { %2099 = vmatpush.msrb.mxu2 %v4157_v25 }
 0x524   :  { %2048 = vmatpush.msrb.mxu1 %v2009_v34  ;;  %2020 = vmatpush.msra.mxu3 %v2001_v37  ;;  %v1991_v34 = vld [vmem:[%s8936_s10 + $0x10] sm:$0xff]  ;;  %v4180_v37 = vld [vmem:[%s8936_s10 + $0x198] sm:$0xff] }
 0x525   :  { %2100 = vmatpush.msrb.mxu2 %v4156_v31  ;;  %v4302_v31 = vld [vmem:[%s8928_s2 + $0x58] sm:$0xff] }
 0x526   :  { %2049 = vmatpush.msrb.mxu1 %v2008_v42  ;;  %2021 = vmatpush.msra.mxu3 %v2000_v45  ;;  %v4154_v42 = vld [vmem:[%s8936_s10 + $0xd0] sm:$0xff]  ;;  %v4196_v45 = vld [vmem:[%s8936_s10 + $0x218] sm:$0xff] }
 0x527   :  { %2101 = vmatpush.msrb.mxu2 %v4155_v35  ;;  %v4306_v35 = vld [vmem:[%s8928_s2 + $0x48] sm:$0xff] }
 0x528   :  { %2050 = vmatpush.msrb.mxu1 %v2007_v47  ;;  %2022 = vmatpush.msra.mxu3 %v1999_v29  ;;  %v4153_v47 = vld [vmem:[%s8936_s10 + $0xc8] sm:$0xff]  ;;  %v4195_v29 = vld [vmem:[%s8936_s10 + $0x210] sm:$0xff] }
 0x529   :  { %2102 = vmatpush.msrb.mxu2 %v4154_v42  ;;  %v4310_v42 = vld [vmem:[%s8928_s2 + $0x38] sm:$0xff] }
 0x52a   :  { %2051 = vmatpush.msrb.mxu1 %v2006_v51  ;;  %2023 = vmatpush.msra.mxu3 %v1998_v54  ;;  %v1581_v51 = vpop.f32.mrf.mxu0  ;;  %v4194_v54 = vld [vmem:[%s8936_s10 + $0x208] sm:$0xff] }
 0x52b   :  { %2103 = vmatpush.msrb.mxu2 %v4153_v47  ;;  %v4314_v47 = vld [vmem:[%s8928_s2 + $0x28] sm:$0xff] }
 0x52c   :  { %2052 = vmatpush.msrb.mxu1 %v2005_v57  ;;  %2024 = vmatpush.msra.mxu3 %v1997_v59  ;;  %v4193_v57 = vld [vmem:[%s8936_s10 + $0x200] sm:$0xff]  ;;  %v6939_v59 = vld [vmem:[%s8927_s0 + $0x28] sm:$0xff] }
 0x52d   :  { %2104 = vmatpush.msrb.mxu2 %v4152_v24  ;;  %v4317_v24 = vld [vmem:[%s8928_s2 + $0x18] sm:$0xff] }
 0x52e   :  { %2025 = vmatpush.msra.mxu3 %v1996_v17 }
 0x530   :  { %2026 = vmatpush.msra.mxu3 %v1995_v56 }
 0x532   :  { %2027 = vmatpush.msra.mxu3 %v1994_v23  ;;  %v4296_v23 = vld [vmem:[%s8928_s2 + $0x40] sm:$0xff] }
 0x534   :  { %2028 = vmatpush.msra.mxu3 %v1993_v0  ;;  %v4298_v0 = vld [vmem:[%s8928_s2 + $0xd8] sm:$0xff] }
 0x536   :  { %2029 = vmatpush.msra.mxu3 %v1992_v28  ;;  %v4301_v28 = vld [vmem:[%s8928_s2 + $0xc8] sm:$0xff] }
 0x538   :  { %2030 = vmatpush.msra.mxu3 %v1991_v34  ;;  %v4305_v34 = vld [vmem:[%s8928_s2 + $0x30] sm:$0xff] }
 0x53a   :  { %2031 = vmatpush.msra.mxu3 %v1990_v41  ;;  %v4309_v41 = vld [vmem:[%s8928_s2 + $0x20] sm:$0xff] }
 0x53c   :  { %2032 = vmatpush.msra.mxu3 %v1989_v46  ;;  %v4313_v46 = vld [vmem:[%s8928_s2 + $0xa8] sm:$0xff] }
 0x582   :  { %v6785_v62 = vpop.f32.mrf.mxu1 }
 0x588   :  { %v1746_v1 = vpop.f32.mrf.mxu3 }
 0x58a   :  { %v1833_v3 = vpop.f32.mrf.mxu1 }
 0x58b   :  { %4149 = vmatmul.msk.f32.vlgmr.msrb.gmra.mxu3 %vm677_vm5, %v1833_v3  ;;  %4150 = vmatmul.msk.f32.vlgmr.msra.gmra.mxu1 %vm677_vm5, %v1833_v3 }
 0x58c   :  { %2160 = vmatpush.msra.mxu1 %v4192_v2  ;;  %4206 = vmatpush.msk.msrb.mxu3 %vm54_vm0, %v6924_v55  ;;  %v1766_v2 = vpop.f32.mrf.mxu0 }
 0x58e   :  { %v1726_v8 = vpop.f32.mrf.mxu2  ;;  %2161 = vmatpush.msra.mxu1 %v4191_v6  ;;  %2222 = vmatpush.msrb.mxu3 %v6934_v58  ;;  %v1787_v6 = vadd.f32 %v6785_v62, %v1766_v2  ;;  %v4323_v2 = vld [vmem:[%s8928_s2 + $0x78] sm:$0xff] }
 0x58f   :  { %v1747_v11 = vadd.f32 %v1746_v1, %v1726_v8  ;;  %v1519_v1 = vadd.f32 %v6563_v39, %v6753_v50  ;;  %v6960_v8 = vld [vmem:[%s8937_s9] sm:$0x3] }
 0x590   :  { %v1813_v13 = vpop.f32.mrf.mxu3  ;;  %2162 = vmatpush.msra.mxu1 %v4190_v7  ;;  %2223 = vmatpush.msrb.mxu3 %v6939_v59  ;;  %v1980_v18 = vperm.slane %v6960_v8, 0 }
 0x591   :  { %v6805_v15 = vadd.f32 %v1747_v11, %v1562_v10  ;;  %1912 = vmatmul.f32.vlgmr.msra.gmra.mxu2 %v1813_v13  ;;  %1952 = vmatmul.f32.vlgmr.msra.gmra.mxu0 %v1813_v13  ;;  %v1582_v3 = vadd.f32 %v1581_v51, %v1519_v1  ;;  %v4318_v51 = vld [vmem:[%s8928_s2] sm:$0xff]  ;;  %v4322_v1 = vld [vmem:[%s8929_s1 + $0x8] sm:$0x3f] }
 0x592   :  { %2163 = vmatpush.msra.mxu1 %v4189_v12  ;;  %2188 = vmatpush.msra.mxu0 %v4200_v61  ;;  %v1981_v12 = vperm.slane %v6960_v8, 1  ;;  %v4297_v61 = vld [vmem:[%s8928_s2 + $0xb0] sm:$0xff]  ;;  %v4884_v8 = vld [vmem:[%s8938_s11] sm:$0x1] }
 0x593   :  { %4209 = vmatpush.msk.msra.mxu2 %vm54_vm0, %v6924_v55  ;;  %2224 = vmatpush.msrb.mxu3 %v6947_v60  ;;  %v1602_v10 = vadd.f32 %v6787_v63, %v1582_v3  ;;  %v4292_v63 = vld [vmem:[%s8928_s2 + $0x60] sm:$0xff]  ;;  %v4324_v3 = vld [vmem:[%s8929_s1 + $0x18] sm:$0x3f] }
 0x594   :  { %2164 = vmatpush.msra.mxu1 %v4188_v16  ;;  %2189 = vmatpush.msra.mxu0 %v4199_v27  ;;  %v4300_v27 = vld [vmem:[%s8928_s2 + $0xa0] sm:$0xff] }
 0x595   :  { %2245 = vmatpush.msra.mxu2 %v6934_v58  ;;  %v1790_v39 = vadd.f32 %v1787_v6, %v1602_v10  ;;  %v4325_v6 = vld [vmem:[%s8928_s2 + $0x140] sm:$0xff] }
 0x596   :  { %2165 = vmatpush.msra.mxu1 %v4187_v44  ;;  %2190 = vmatpush.msra.mxu0 %v4198_v33  ;;  %v4304_v33 = vld [vmem:[%s8928_s2 + $0xb8] sm:$0xff]  ;;  %v4328_v10 = vld [vmem:[%s8928_s2 + $0x120] sm:$0xff] }
 0x597   :  { %2246 = vmatpush.msra.mxu2 %v6939_v59 }
 0x598   :  { %2166 = vmatpush.msra.mxu1 %v4186_v49  ;;  %2191 = vmatpush.msra.mxu0 %v4197_v40  ;;  %v4308_v40 = vld [vmem:[%s8929_s1] sm:$0xff] }
 0x599   :  { %2247 = vmatpush.msra.mxu2 %v6947_v60 }
 0x59a   :  { %2167 = vmatpush.msra.mxu1 %v4185_v19  ;;  %2192 = vmatpush.msra.mxu0 %v4196_v45  ;;  %v4312_v45 = vld [vmem:[%s8929_s1 + $0x10] sm:$0xff] }
 0x59c   :  { %2168 = vmatpush.msra.mxu1 %v4184_v22  ;;  %2193 = vmatpush.msra.mxu0 %v4195_v29  ;;  %v4316_v29 = vld [vmem:[%s8928_s2 + $0x98] sm:$0xff] }
 0x59e   :  { %2169 = vmatpush.msra.mxu1 %v4183_v9  ;;  %2194 = vmatpush.msra.mxu0 %v4194_v54  ;;  %v4320_v54 = vld [vmem:[%s8928_s2 + $0x8] sm:$0xff] }
 0x5a0   :  { %2170 = vmatpush.msra.mxu1 %v4182_v26  ;;  %2195 = vmatpush.msra.mxu0 %v4193_v57  ;;  %v4299_v26 = vld [vmem:[%s8928_s2 + $0x68] sm:$0xff] }
 0x5a1   :  { %v4321_v57 = vld [vmem:[%s8928_s2 + $0x148] sm:$0xff] }
 0x5a2   :  { %2171 = vmatpush.msra.mxu1 %v4181_v32  ;;  %v4303_v32 = vld [vmem:[%s8928_s2 + $0x90] sm:$0xff] }
 0x5a4   :  { %2172 = vmatpush.msra.mxu1 %v4180_v37  ;;  %v4307_v37 = vld [vmem:[%s8928_s2 + $0x80] sm:$0xff] }
 0x5a6   :  { %2173 = vmatpush.msra.mxu1 %v4179_v43  ;;  %v4311_v43 = vld [vmem:[%s8928_s2 + $0x70] sm:$0xff] }
 0x5a8   :  { %2174 = vmatpush.msra.mxu1 %v4178_v48  ;;  %v4315_v48 = vld [vmem:[%s8928_s2 + $0x10] sm:$0xff] }
 0x5aa   :  { %2175 = vmatpush.msra.mxu1 %v4177_v53  ;;  %v4319_v53 = vld [vmem:[%s8928_s2 + $0x88] sm:$0xff] }
 0x608   :  { %v1973_v7 = vpop.f32.mrf.mxu1 }
 0x60e   :  { %v1953_v11 = vpop.f32.mrf.mxu0  ;;  %v1933_v16 = vpop.f32.mrf.mxu3 }
 0x60f   :  { %v1974_v50 = vadd.f32 %v1973_v7, %v1953_v11  ;;  %v4327_v7 = vld [vmem:[%s8928_s2 + $0x138] sm:$0xff]  ;;  %v4330_v11 = vld [vmem:[%s8928_s2 + $0x110] sm:$0xff] }
 0x611   :  { %v1977_v13 = vadd.f32 %v1974_v50, %v1790_v39  ;;  %v4332_v39 = vld [vmem:[%s8928_s2 + $0x100] sm:$0xff]  ;;  %v4333_v50 = vld [vmem:[%s8928_s2 + $0x108] sm:$0xff] }
 0x613   :  { %v1985_v44 = vadd.f32 %v1981_v12, %v1977_v13  ;;  %v4335_v13 = vld [vmem:[%s8928_s2 + $0xf8] sm:$0xff] }
 0x614   :  { %v1913_v49 = vpop.f32.mrf.mxu2 }
 0x615   :  { %v1987_v62 = vmax.f32 %v1985_v44, 0.0  ;;  %v1934_v17 = vadd.f32 %v1933_v16, %v1913_v49  ;;  %v4336_v16 = vld [vmem:[%s8928_s2 + $0xe0] sm:$0xff]  ;;  %v4337_v44 = vld [vmem:[%s8928_s2 + $0xe8] sm:$0xff] }
 0x617   :  { %v2085_v19 = vrot.slane %v1987_v62, 1  ;;  %v1976_v20 = vadd.f32 %v1934_v17, %v6805_v15  ;;  %4151 = vmatmul.msk.f32.vlgmr.msrb.gmra.mxu1 %vm2013_vm8, %v1987_v62  ;;  %v4294_v15 = vld [vmem:[%s8928_s2 + $0x50] sm:$0xff]  ;;  %v2156_v25 = vrot.slane %v1987_v62, 2  ;;  %v1988_v62 = vld [vmem:[%s8938_s11] sm:$0x1] }
 0x618   :  { %2322 = vmatpush.msrb.mxu1 %v4292_v63 }
 0x619   :  { %v1984_v56 = vadd.f32 %v1980_v18, %v1976_v20  ;;  %4176 = vmatmul.msk.f32.vlgmr.msrb.gmra.mxu0 %vm2013_vm8, %v2085_v19 }
 0x61a   :  { %2270 = vmatpush.msrb.mxu0 %v4293_v21  ;;  %2323 = vmatpush.msrb.mxu1 %v4294_v15 }
 0x61b   :  { %v1986_v22 = vmax.f32 %v1984_v56, 0.0 }
 0x61c   :  { %2271 = vmatpush.msrb.mxu0 %v4295_v4  ;;  %2324 = vmatpush.msrb.mxu1 %v4296_v23  ;;  %v4338_v23 = vld [vmem:[%s8928_s2 + $0x1b0] sm:$0xff] }
 0x61d   :  { %2033 = vmatmul.f32.vlgmr.msra.gmra.mxu3 %v1986_v22  ;;  %v2084_v36 = vrot.slane %v1986_v22, 1  ;;  %v2155_v9 = vrot.slane %v1986_v22, 2 }
 0x61e   :  { %2272 = vmatpush.msrb.mxu0 %v4297_v61  ;;  %2293 = vmatpush.msra.mxu3 %v4298_v0  ;;  %v4341_v61 = vld [vmem:[%s8928_s2 + $0x1a8] sm:$0xff] }
 0x61f   :  { %2105 = vmatmul.f32.vlgmr.msrb.gmra.mxu2 %v2084_v36  ;;  %2176 = vmatmul.f32.vlgmr.msra.gmra.mxu1 %v2155_v9  ;;  %v4339_v36 = vld [vmem:[%s8928_s2 + $0x1b8] sm:$0xff]  ;;  %v4340_v9 = vld [vmem:[%s8928_s2 + $0x1a0] sm:$0xff] }
 0x620   :  { %2345 = vmatpush.msrb.mxu2 %v4299_v26  ;;  %2273 = vmatpush.msrb.mxu0 %v4300_v27  ;;  %v4343_v26 = vld [vmem:[%s8928_s2 + $0x198] sm:$0xff] }
 0x621   :  { %4201 = vmatmul.msk.f32.vlgmr.msra.gmra.mxu0 %vm2013_vm8, %v2156_v25  ;;  %2294 = vmatpush.msra.mxu3 %v4301_v28  ;;  %v4342_v25 = vld [vmem:[%s8928_s2 + $0x190] sm:$0xff]  ;;  %v4344_v28 = vld [vmem:[%s8928_s2 + $0x180] sm:$0xff] }
 0x622   :  { %2346 = vmatpush.msrb.mxu2 %v4302_v31  ;;  %2274 = vmatpush.msrb.mxu0 %v4303_v32  ;;  %v4345_v31 = vld [vmem:[%s8928_s2 + $0x188] sm:$0xff]  ;;  %v4346_v32 = vld [vmem:[%s8928_s2 + $0x170] sm:$0xff] }
 0x623   :  { %2295 = vmatpush.msra.mxu3 %v4304_v33  ;;  %2325 = vmatpush.msrb.mxu1 %v4305_v34  ;;  %v4347_v33 = vld [vmem:[%s8928_s2 + $0x178] sm:$0xff]  ;;  %v4348_v34 = vld [vmem:[%s8928_s2 + $0x160] sm:$0xff] }
 0x624   :  { %2347 = vmatpush.msrb.mxu2 %v4306_v35  ;;  %2275 = vmatpush.msrb.mxu0 %v4307_v37  ;;  %v4349_v35 = vld [vmem:[%s8928_s2 + $0x168] sm:$0xff]  ;;  %v4350_v37 = vld [vmem:[%s8928_s2 + $0x150] sm:$0xff] }
 0x625   :  { %4207 = vmatmul.msk.f32.vlgmr.msrb.gmra.mxu3 %vm47_vm1, %v4308_v40  ;;  %2326 = vmatpush.msrb.mxu1 %v4309_v41  ;;  %v4351_v40 = vld [vmem:[%s8928_s2 + $0x158] sm:$0xff]  ;;  %v4352_v41 = vld [vmem:[%s8929_s1 + $0x30] sm:$0xff] }
 0x626   :  { %2348 = vmatpush.msrb.mxu2 %v4310_v42  ;;  %2276 = vmatpush.msrb.mxu0 %v4311_v43  ;;  %v4353_v42 = vld [vmem:[%s8929_s1 + $0x20] sm:$0xff]  ;;  %v4354_v43 = vld [vmem:[%s8929_s1 + $0x38] sm:$0x3f] }
 0x627   :  { %4210 = vmatmul.msk.f32.vlgmr.msra.gmra.mxu2 %vm47_vm1, %v4312_v45  ;;  %2296 = vmatpush.msra.mxu3 %v4313_v46  ;;  %v4355_v45 = vld [vmem:[%s8929_s1 + $0x28] sm:$0x3f] }
 0x628   :  { %2349 = vmatpush.msrb.mxu2 %v4314_v47  ;;  %2327 = vmatpush.msrb.mxu1 %v4315_v48 }
 0x629   :  { %2297 = vmatpush.msra.mxu3 %v4316_v29  ;;  %4220 = vmatpush.msk.msra.mxu0 %vm54_vm0, %v6924_v55 }
 0x62a   :  { %2350 = vmatpush.msrb.mxu2 %v4317_v24  ;;  %2328 = vmatpush.msrb.mxu1 %v4318_v51 }
 0x62b   :  { %2298 = vmatpush.msra.mxu3 %v4319_v53  ;;  %2372 = vmatpush.msra.mxu0 %v6934_v58  ;;  %v4356_v53 = vld [vmem:[%s8932_s5 + $0x2b0] sm:$0xff] }
 0x62c   :  { %2351 = vmatpush.msrb.mxu2 %v4320_v54  ;;  %2420 = vmatpush.msra.mxu1 %v4321_v57  ;;  %v4357_v57 = vld [vmem:[%s8932_s5 + $0x2a0] sm:$0xff] }
 0x62d   :  { %4208 = vmatmul.msk.f32.gmra.mxu3 %vm47_vm1, %v4322_v1  ;;  %2373 = vmatpush.msra.mxu0 %v6939_v59  ;;  %v4358_v1 = vld [vmem:[%s8932_s5 + $0x290] sm:$0xff] }
 0x62e   :  { %4227 = vmatpush.msk.msra.mxu2 %vm54_vm0, %v6924_v55  ;;  %2299 = vmatpush.msra.mxu3 %v4323_v2  ;;  %v4326_v55 = vld [vmem:[%s8928_s2 + $0x130] sm:$0xff] }
 0x62f   :  { %4211 = vmatmul.msk.f32.gmra.mxu2 %vm47_vm1, %v4324_v3  ;;  %2374 = vmatpush.msra.mxu0 %v6947_v60  ;;  %v4359_v3 = vld [vmem:[%s8932_s5 + $0x280] sm:$0xff] }
 0x630   :  { %2397 = vmatpush.msrb.mxu3 %v4325_v6  ;;  %2451 = vmatpush.msra.mxu2 %v6934_v58  ;;  %v4329_v58 = vld [vmem:[%s8928_s2 + $0x128] sm:$0xff]  ;;  %v4360_v6 = vld [vmem:[%s8932_s5 + $0x270] sm:$0xff] }
 0x631   :  { %2421 = vmatpush.msra.mxu1 %v4327_v7  ;;  %v4361_v7 = vld [vmem:[%s8932_s5 + $0x260] sm:$0xff] }
 0x632   :  { %2398 = vmatpush.msrb.mxu3 %v4326_v55  ;;  %2452 = vmatpush.msra.mxu2 %v6939_v59  ;;  %v4331_v59 = vld [vmem:[%s8928_s2 + $0x118] sm:$0xff] }
 0x633   :  { %2422 = vmatpush.msra.mxu1 %v4329_v58  ;;  %v4363_v58 = vld [vmem:[%s8932_s5 + $0x240] sm:$0xff] }
 0x634   :  { %2399 = vmatpush.msrb.mxu3 %v4328_v10  ;;  %2453 = vmatpush.msra.mxu2 %v6947_v60  ;;  %v4334_v60 = vld [vmem:[%s8928_s2 + $0xf0] sm:$0xff] }
 0x635   :  { %2423 = vmatpush.msra.mxu1 %v4331_v59  ;;  %v4362_v10 = vld [vmem:[%s8932_s5 + $0x250] sm:$0xff]  ;;  %v4365_v59 = vld [vmem:[%s8932_s5 + $0x220] sm:$0xff] }
 0x636   :  { %2400 = vmatpush.msrb.mxu3 %v4330_v11  ;;  %v4364_v11 = vld [vmem:[%s8932_s5 + $0x230] sm:$0xff] }
 0x637   :  { %2424 = vmatpush.msra.mxu1 %v4333_v50  ;;  %v4367_v50 = vld [vmem:[%s8932_s5 + $0x200] sm:$0xff] }
 0x638   :  { %2401 = vmatpush.msrb.mxu3 %v4332_v39  ;;  %v4366_v39 = vld [vmem:[%s8932_s5 + $0x210] sm:$0xff] }
 0x639   :  { %2425 = vmatpush.msra.mxu1 %v4335_v13  ;;  %v4369_v13 = vld [vmem:[%s8932_s5 + $0x1e0] sm:$0xff] }
 0x63a   :  { %2402 = vmatpush.msrb.mxu3 %v4334_v60  ;;  %v4368_v60 = vld [vmem:[%s8932_s5 + $0x1f0] sm:$0xff] }
 0x63b   :  { %2426 = vmatpush.msra.mxu1 %v4337_v44  ;;  %v4371_v44 = vld [vmem:[%s8932_s5 + $0x1c0] sm:$0xff] }
 0x63c   :  { %2403 = vmatpush.msrb.mxu3 %v4336_v16  ;;  %v4370_v16 = vld [vmem:[%s8932_s5 + $0x1d0] sm:$0xff] }
 0x694   :  { %v2054_v49 = vpop.f32.mrf.mxu1 }
 0x696   :  { %v2126_v20 = vpop.f32.mrf.mxu0 }
 0x69e   :  { %v7196_v46 = vpop.f32.mrf.mxu0 }
 0x6a0   :  { %v2034_v17 = vpop.f32.mrf.mxu3 }
 0x6a1   :  { %v2055_v19 = vadd.f32 %v2054_v49, %v2034_v17  ;;  %v4372_v49 = vld [vmem:[%s8932_s5 + $0x1b0] sm:$0xff] }
 0x6a2   :  { %v2106_v63 = vpop.f32.mrf.mxu2  ;;  %v4374_v17 = vld [vmem:[%s8932_s5 + $0x190] sm:$0xff] }
 0x6a3   :  { %v2057_v56 = vadd.f32 %v2055_v19, %v1988_v62  ;;  %v2127_v21 = vadd.f32 %v2126_v20, %v2106_v63  ;;  %v4373_v62 = vld [vmem:[%s8932_s5 + $0x1a0] sm:$0xff]  ;;  %v4376_v20 = vld [vmem:[%s8932_s5 + $0x170] sm:$0xff] }
 0x6a4   :  { %v4375_v19 = vld [vmem:[%s8932_s5 + $0x180] sm:$0xff] }
 0x6a5   :  { %v7128_v15 = vadd.f32 %v2127_v21, %v2057_v56  ;;  %v4377_v63 = vld [vmem:[%s8932_s5 + $0x160] sm:$0xff]  ;;  %v4378_v56 = vld [vmem:[%s8932_s5 + $0x150] sm:$0xff] }
 0x6a6   :  { %v4379_v21 = vld [vmem:[%s8932_s5 + $0x140] sm:$0xff] }
 0x6a8   :  { %v2226_v22 = vpop.f32.mrf.mxu3 }
 0x6a9   :  { %4218 = vmatmul.msk.f32.vlgmr.msrb.gmra.mxu2 %vm142_vm2, %v2226_v22  ;;  %4216 = vmatmul.msk.f32.vlgmr.msrb.gmra.mxu1 %vm142_vm2, %v2226_v22  ;;  %v4380_v22 = vld [vmem:[%s8932_s5 + $0x130] sm:$0xff] }
 0x6aa   :  { %v2249_v4 = vpop.f32.mrf.mxu2 }
 0x6ab   :  { %4212 = vmatmul.msk.f32.vlgmr.msrb.gmra.mxu0 %vm142_vm2, %v2249_v4  ;;  %4214 = vmatmul.msk.f32.vlgmr.msra.gmra.mxu3 %vm142_vm2, %v2249_v4  ;;  %v4381_v4 = vld [vmem:[%s8932_s5 + $0x120] sm:$0xff] }
 0x6ac   :  { %2476 = vmatpush.msrb.mxu0 %v4338_v23  ;;  %2499 = vmatpush.msra.mxu3 %v4339_v36  ;;  %v4382_v23 = vld [vmem:[%s8932_s5 + $0x110] sm:$0xff]  ;;  %v4383_v36 = vld [vmem:[%s8932_s5 + $0x100] sm:$0xff] }
 0x6ae   :  { %2477 = vmatpush.msrb.mxu0 %v4340_v9  ;;  %2500 = vmatpush.msra.mxu3 %v4341_v61  ;;  %v7298_v61 = vpop.f32.mrf.mxu1 }
 0x6b0   :  { %v2229_v0 = vpop.f32.mrf.mxu3  ;;  %2478 = vmatpush.msrb.mxu0 %v4342_v25  ;;  %2501 = vmatpush.msra.mxu3 %v4343_v26 }
 0x6b1   :  { %4219 = vmatmul.msk.f32.gmra.mxu2 %vm142_vm2, %v2229_v0  ;;  %4217 = vmatmul.msk.f32.gmra.mxu1 %vm142_vm2, %v2229_v0 }
 0x6b2   :  { %v2252_v27 = vpop.f32.mrf.mxu2  ;;  %2479 = vmatpush.msrb.mxu0 %v4344_v28  ;;  %2502 = vmatpush.msra.mxu3 %v4345_v31 }
 0x6b3   :  { %4213 = vmatmul.msk.f32.gmra.mxu0 %vm142_vm2, %v2252_v27  ;;  %4215 = vmatmul.msk.f32.gmra.mxu3 %vm142_vm2, %v2252_v27 }
 0x6b4   :  { %2480 = vmatpush.msrb.mxu0 %v4346_v32  ;;  %2503 = vmatpush.msra.mxu3 %v4347_v33 }
 0x6b6   :  { %2481 = vmatpush.msrb.mxu0 %v4348_v34  ;;  %2504 = vmatpush.msra.mxu3 %v4349_v35 }
 0x6b8   :  { %2482 = vmatpush.msrb.mxu0 %v4350_v37  ;;  %2505 = vmatpush.msra.mxu3 %v4351_v40 }
 0x6b9   :  { %4228 = vmatmul.msk.f32.vlgmr.msra.gmra.mxu2 %vm47_vm1, %v4352_v41 }
 0x6bb   :  { %4221 = vmatmul.msk.f32.vlgmr.msra.gmra.mxu0 %vm47_vm1, %v4353_v42 }
 0x6c1   :  { %4229 = vmatmul.msk.f32.gmra.mxu2 %vm47_vm1, %v4354_v43 }
 0x6c3   :  { %4222 = vmatmul.msk.f32.gmra.mxu0 %vm47_vm1, %v4355_v45 }
 0x726   :  { %v2330_v0 = vpop.f32.mrf.mxu1 }
 0x728   :  { %v7198_v47 = vpop.f32.mrf.mxu0 }
 0x729   :  { %v2331_v31 = vadd.f32 %v2330_v0, %v7198_v47  ;;  %v4408_v0 = vld [vmem:[%s8932_s5 + $0x320] sm:$0xff] }
 0x72c   :  { %v7200_v48 = vpop.f32.mrf.mxu2 }
 0x72e   :  { %v2301_v9 = vpop.f32.mrf.mxu3  ;;  %v2333_v28 = vpop.f32.mrf.mxu1 }
 0x72f   :  { %v2354_v47 = vadd.f32 %v7200_v48, %v2301_v9  ;;  %v4407_v9 = vld [vmem:[%s8932_s5 + $0x208] sm:$0xff] }
 0x730   :  { %v7202_v29 = vpop.f32.mrf.mxu0 }
 0x731   :  { %v2334_v33 = vadd.f32 %v2333_v28, %v7202_v29  ;;  %v4412_v28 = vld [vmem:[%s8932_s5 + $0x318] sm:$0xff] }
 0x734   :  { %v7204_v24 = vpop.f32.mrf.mxu2 }
 0x736   :  { %v2304_v25 = vpop.f32.mrf.mxu3 }
 0x738   :  { %v2376_v51 = vpop.f32.mrf.mxu0 }
 0x739   :  { %4223 = vmatmul.msk.f32.vlgmr.msrb.gmra.mxu3 %vm142_vm2, %v2376_v51  ;;  %4225 = vmatmul.msk.f32.vlgmr.msra.gmra.mxu1 %vm142_vm2, %v2376_v51 }
 0x73a   :  { %2614 = vmatpush.msrb.mxu3 %v4356_v53 }
 0x73c   :  { %v2455_v54 = vpop.f32.mrf.mxu2  ;;  %2615 = vmatpush.msrb.mxu3 %v4357_v57  ;;  %v4385_v57 = vld [vmem:[%s8931_s4] sm:$0x7f] }
 0x73d   :  { %4230 = vmatmul.msk.f32.vlgmr.msrb.gmra.mxu0 %vm142_vm2, %v2455_v54 }
 0x73e   :  { %2616 = vmatpush.msrb.mxu3 %v4358_v1  ;;  %v2357_v1 = vadd.f32 %v7204_v24, %v2304_v25  ;;  %v4409_v25 = vld [vmem:[%s8932_s5 + $0x328] sm:$0xff] }
 0x740   :  { %v2379_v2 = vpop.f32.mrf.mxu0  ;;  %2617 = vmatpush.msrb.mxu3 %v4359_v3 }
 0x741   :  { %4224 = vmatmul.msk.f32.gmra.mxu3 %vm142_vm2, %v2379_v2  ;;  %4226 = vmatmul.msk.f32.gmra.mxu1 %vm142_vm2, %v2379_v2  ;;  %v4386_v2 = vld [vmem:[%s8932_s5 + $0x2b8] sm:$0xff] }
 0x742   :  { %2618 = vmatpush.msrb.mxu3 %v4360_v6 }
 0x744   :  { %v2458_v55 = vpop.f32.mrf.mxu2  ;;  %2619 = vmatpush.msrb.mxu3 %v4361_v7 }
 0x745   :  { %4231 = vmatmul.msk.f32.gmra.mxu0 %vm142_vm2, %v2458_v55 }
 0x746   :  { %2620 = vmatpush.msrb.mxu3 %v4362_v10 }
 0x748   :  { %2621 = vmatpush.msrb.mxu3 %v4363_v58  ;;  %v4388_v58 = vld [vmem:[%s8932_s5 + $0x298] sm:$0xff] }
 0x749   :  { %4232 = vmatmul.msk.f32.vlgmr.msra.gmra.mxu3 %vm142_vm2, %v2455_v54 }
 0x74a   :  { %2622 = vmatpush.msrb.mxu3 %v4364_v11 }
 0x74c   :  { %2623 = vmatpush.msrb.mxu3 %v4365_v59  ;;  %v4389_v59 = vld [vmem:[%s8932_s5 + $0x288] sm:$0xff] }
 0x74e   :  { %2624 = vmatpush.msrb.mxu3 %v4366_v39 }
 0x750   :  { %2625 = vmatpush.msrb.mxu3 %v4367_v50  ;;  %v4390_v50 = vld [vmem:[%s8932_s5 + $0x278] sm:$0xff] }
 0x751   :  { %4233 = vmatmul.msk.f32.gmra.mxu3 %vm142_vm2, %v2458_v55  ;;  %v4387_v55 = vld [vmem:[%s8932_s5 + $0x2a8] sm:$0xff] }
 0x752   :  { %2626 = vmatpush.msrb.mxu3 %v4368_v60 }
 0x754   :  { %2627 = vmatpush.msrb.mxu3 %v4369_v13  ;;  %v4392_v13 = vld [vmem:[%s8932_s5 + $0x258] sm:$0xff] }
 0x756   :  { %2628 = vmatpush.msrb.mxu3 %v4370_v16  ;;  %v4393_v16 = vld [vmem:[%s8932_s5 + $0x370] sm:$0xff] }
 0x758   :  { %2629 = vmatpush.msrb.mxu3 %v4371_v44  ;;  %v4394_v44 = vld [vmem:[%s8932_s5 + $0x378] sm:$0xff] }
 0x75a   :  { %2721 = vmatpush.msra.mxu3 %v4372_v49  ;;  %v4395_v49 = vld [vmem:[%s8932_s5 + $0x248] sm:$0xff] }
 0x75c   :  { %2722 = vmatpush.msra.mxu3 %v4373_v62  ;;  %v4396_v62 = vld [vmem:[%s8932_s5 + $0x360] sm:$0xff] }
 0x75e   :  { %2723 = vmatpush.msra.mxu3 %v4374_v17  ;;  %v4397_v17 = vld [vmem:[%s8932_s5 + $0x368] sm:$0xff] }
 0x760   :  { %2724 = vmatpush.msra.mxu3 %v4375_v19  ;;  %v4398_v19 = vld [vmem:[%s8932_s5 + $0x238] sm:$0xff] }
 0x762   :  { %2725 = vmatpush.msra.mxu3 %v4376_v20  ;;  %v4399_v20 = vld [vmem:[%s8932_s5 + $0x350] sm:$0xff] }
 0x764   :  { %2726 = vmatpush.msra.mxu3 %v4377_v63  ;;  %v4400_v63 = vld [vmem:[%s8932_s5 + $0x358] sm:$0xff] }
 0x766   :  { %2727 = vmatpush.msra.mxu3 %v4378_v56  ;;  %v4401_v56 = vld [vmem:[%s8932_s5 + $0x228] sm:$0xff] }
 0x768   :  { %2728 = vmatpush.msra.mxu3 %v4379_v21  ;;  %v4402_v21 = vld [vmem:[%s8932_s5 + $0x340] sm:$0xff] }
 0x76a   :  { %2729 = vmatpush.msra.mxu3 %v4380_v22  ;;  %v4403_v22 = vld [vmem:[%s8932_s5 + $0x348] sm:$0xff] }
 0x76c   :  { %2730 = vmatpush.msra.mxu3 %v4381_v4  ;;  %v4404_v4 = vld [vmem:[%s8932_s5 + $0x218] sm:$0xff] }
 0x76e   :  { %2731 = vmatpush.msra.mxu3 %v4382_v23  ;;  %v4405_v23 = vld [vmem:[%s8932_s5 + $0x330] sm:$0xff] }
 0x770   :  { %2732 = vmatpush.msra.mxu3 %v4383_v36  ;;  %v4406_v36 = vld [vmem:[%s8932_s5 + $0x338] sm:$0xff] }
 0x7b6   :  { %v2428_v41 = vpop.f32.mrf.mxu1 }
 0x7b7   :  { %v2435_v48 = vadd.f32 %v2428_v41, %v2354_v47  ;;  %v4420_v41 = vld [vmem:[%s8932_s5 + $0x2e0] sm:$0xff]  ;;  %v4425_v47 = vld [vmem:[%s8932_s5 + $0x2d8] sm:$0xff] }
 0x7ba   :  { %v2484_v26 = vpop.f32.mrf.mxu0 }
 0x7bc   :  { %v2405_v27 = vpop.f32.mrf.mxu3 }
 0x7bd   :  { %v2434_v32 = vadd.f32 %v2405_v27, %v2331_v31  ;;  %v4411_v27 = vld [vmem:[%s8932_s5 + $0x310] sm:$0xff]  ;;  %v4413_v31 = vld [vmem:[%s8932_s5 + $0x1e8] sm:$0xff] }
 0x7be   :  { %v2431_v29 = vpop.f32.mrf.mxu1 }
 0x7bf   :  { %v2513_v37 = vadd.f32 %v2484_v26, %v2434_v32  ;;  %v2437_v3 = vadd.f32 %v2431_v29, %v2357_v1  ;;  %v4410_v26 = vld [vmem:[%s8932_s5 + $0x1f8] sm:$0xff]  ;;  %v4414_v32 = vld [vmem:[%s8932_s5 + $0x300] sm:$0xff]  ;;  %v4429_v1 = vld [vmem:[%s8932_s5 + $0x2c8] sm:$0xff] }
 0x7c0   :  { %v4426_v29 = vld [vmem:[%s8932_s5 + $0x2c0] sm:$0xff] }
 0x7c1   :  { %v2517_v43 = vadd.f32 %v2513_v37, %v5209_v30  ;;  %v4418_v37 = vld [vmem:[%s8932_s5 + $0x2f8] sm:$0xff] }
 0x7c2   :  { %v2487_v35 = vpop.f32.mrf.mxu0 }
 0x7c3   :  { %v7306_v54 = vmax.f32 %v2517_v43, 0.0  ;;  %v4422_v43 = vld [vmem:[%s8932_s5 + $0x2e8] sm:$0xff] }
 0x7c4   :  { %v2408_v34 = vpop.f32.mrf.mxu3 }
 0x7c5   :  { %v2436_v40 = vadd.f32 %v2408_v34, %v2334_v33  ;;  %v4415_v33 = vld [vmem:[%s8932_s5 + $0x308] sm:$0xff]  ;;  %v4416_v34 = vld [vmem:[%s8932_s5 + $0x1d8] sm:$0xff] }
 0x7c7   :  { %v2515_v42 = vadd.f32 %v2487_v35, %v2436_v40  ;;  %v4417_v35 = vld [vmem:[%s8932_s5 + $0x2f0] sm:$0xff]  ;;  %v4419_v40 = vld [vmem:[%s8932_s5 + $0x1c8] sm:$0xff] }
 0x7c9   :  { %v2519_v45 = vadd.f32 %v2515_v42, %v5209_v30  ;;  %v4384_v30 = vld [vmem:[%s8931_s4 + $0x8] sm:$0x7f]  ;;  %v4421_v42 = vld [vmem:[%s8932_s5 + $0x1b8] sm:$0xff] }
 0x7cb   :  { %v7304_v51 = vmax.f32 %v2519_v45, 0.0  ;;  %v4423_v45 = vld [vmem:[%s8932_s5 + $0x2d0] sm:$0xff] }
 0x7cc   :  { %v2507_v53 = vpop.f32.mrf.mxu3 }
 0x7cd   :  { %4234 = vmatpush.msk.msrb.mxu1 %vm472_vm3, %v7304_v51  ;;  %4238 = vmatpush.msk.msra.mxu0 %vm472_vm3, %v7304_v51  ;;  %v2514_v6 = vadd.f32 %v2507_v53, %v2435_v48  ;;  %v4424_v53 = vld [vmem:[%s8932_s5 + $0x1a8] sm:$0xff] }
 0x7ce   :  { %v4430_v48 = vld [vmem:[%s8932_s5 + $0x188] sm:$0xff] }
 0x7cf   :  { %2546 = vmatpush.msrb.mxu1 %v7306_v54  ;;  %2586 = vmatpush.msra.mxu0 %v7306_v54  ;;  %v2518_v24 = vadd.f32 %v2514_v6, %v5249_v52  ;;  %v4433_v6 = vld [vmem:[%s8932_s5 + $0x178] sm:$0xff] }
 0x7d0   :  { %4239 = vmatmul.msk.f32.vlgmr.msra.gmra.mxu0 %vm468_vm4, %v4384_v30  ;;  %4235 = vmatmul.msk.f32.vlgmr.msrb.gmra.mxu1 %vm468_vm4, %v4385_v57 }
 0x7d1   :  { %2654 = vmatpush.msrb.mxu0 %v4386_v2  ;;  %v7343_v60 = vmax.f32 %v2518_v24, 0.0  ;;  %v4431_v2 = vld [vmem:[%s8932_s5 + $0xe0] sm:$0xff]  ;;  %v4438_v24 = vld [vmem:[%s8932_s5 + $0xd8] sm:$0xff] }
 0x7d3   :  { %2655 = vmatpush.msrb.mxu0 %v4387_v55  ;;  %v4434_v55 = vld [vmem:[%s8932_s5 + $0xd0] sm:$0xff] }
 0x7d4   :  { %v2510_v7 = vpop.f32.mrf.mxu3 }
 0x7d5   :  { %v2516_v10 = vadd.f32 %v2510_v7, %v2437_v3  ;;  %2656 = vmatpush.msrb.mxu0 %v4388_v58  ;;  %v4432_v3 = vld [vmem:[%s8932_s5 + $0xf8] sm:$0xff]  ;;  %v4435_v7 = vld [vmem:[%s8932_s5 + $0xe8] sm:$0xff]  ;;  %v4437_v58 = vld [vmem:[%s8932_s5 + $0xc0] sm:$0xff] }
 0x7d7   :  { %v2520_v11 = vadd.f32 %v2516_v10, %v5249_v52  ;;  %2657 = vmatpush.msrb.mxu0 %v4389_v59  ;;  %v4391_v52 = vld [vmem:[%s8932_s5 + $0x268] sm:$0xff]  ;;  %v4440_v59 = vld [vmem:[%s8932_s5 + $0xb0] sm:$0xff] }
 0x7d8   :  { %v4436_v10 = vld [vmem:[%s8932_s5 + $0x168] sm:$0xff] }
 0x7d9   :  { %v7338_v39 = vmax.f32 %v2520_v11, 0.0  ;;  %2658 = vmatpush.msrb.mxu0 %v4390_v50  ;;  %v4439_v11 = vld [vmem:[%s8932_s5 + $0x158] sm:$0xff]  ;;  %v4441_v50 = vld [vmem:[%s8932_s5 + $0xc8] sm:$0xff] }
 0x7db   :  { %4236 = vmatpush.msk.msrb.mxu2 %vm472_vm3, %v7338_v39  ;;  %4240 = vmatpush.msk.msra.mxu1 %vm472_vm3, %v7338_v39 }
 0x7dc   :  { %2659 = vmatpush.msrb.mxu0 %v4391_v52  ;;  %v4442_v52 = vld [vmem:[%s8932_s5 + $0x148] sm:$0xff] }
 0x7dd   :  { %2566 = vmatpush.msrb.mxu2 %v7343_v60  ;;  %2606 = vmatpush.msra.mxu1 %v7343_v60 }
 0x7de   :  { %4237 = vmatmul.msk.f32.vlgmr.msrb.gmra.mxu2 %vm468_vm4, %v4385_v57  ;;  %4241 = vmatmul.msk.f32.vlgmr.msra.gmra.mxu1 %vm468_vm4, %v4384_v30  ;;  %v4427_v30 = vld [vmem:[%s8932_s5 + $0x198] sm:$0xff]  ;;  %v4428_v57 = vld [vmem:[%s8932_s5 + $0xf0] sm:$0xff] }
 0x7df   :  { %2660 = vmatpush.msrb.mxu0 %v4392_v13  ;;  %2638 = vmatpush.msra.mxu2 %v4393_v16  ;;  %v4443_v13 = vld [vmem:[%s8932_s5 + $0xa0] sm:$0xff]  ;;  %v4444_v16 = vld [vmem:[%s8932_s5 + $0xb8] sm:$0xff] }
 0x7e0   :  { %2678 = vmatpush.msrb.mxu1 %v4394_v44  ;;  %v4445_v44 = vld [vmem:[%s8932_s5 + $0x138] sm:$0xff] }
 0x7e1   :  { %2661 = vmatpush.msrb.mxu0 %v4395_v49  ;;  %2639 = vmatpush.msra.mxu2 %v4396_v62  ;;  %v4446_v49 = vld [vmem:[%s8932_s5 + $0x90] sm:$0xff]  ;;  %v4447_v62 = vld [vmem:[%s8932_s5 + $0xa8] sm:$0xff] }
 0x7e2   :  { %2679 = vmatpush.msrb.mxu1 %v4397_v17  ;;  %v4448_v17 = vld [vmem:[%s8932_s5 + $0x128] sm:$0xff] }
 0x7e3   :  { %2662 = vmatpush.msrb.mxu0 %v4398_v19  ;;  %2640 = vmatpush.msra.mxu2 %v4399_v20  ;;  %v4449_v19 = vld [vmem:[%s8932_s5 + $0x80] sm:$0xff]  ;;  %v4450_v20 = vld [vmem:[%s8932_s5 + $0x98] sm:$0xff] }
 0x7e4   :  { %2680 = vmatpush.msrb.mxu1 %v4400_v63  ;;  %v4451_v63 = vld [vmem:[%s8932_s5 + $0x118] sm:$0xff] }
 0x7e5   :  { %2663 = vmatpush.msrb.mxu0 %v4401_v56  ;;  %2641 = vmatpush.msra.mxu2 %v4402_v21  ;;  %v4452_v56 = vld [vmem:[%s8932_s5 + $0x70] sm:$0xff]  ;;  %v4453_v21 = vld [vmem:[%s8932_s5 + $0x88] sm:$0xff] }
 0x7e6   :  { %2681 = vmatpush.msrb.mxu1 %v4403_v22  ;;  %v4454_v22 = vld [vmem:[%s8932_s5 + $0x108] sm:$0xff] }
 0x7e7   :  { %2664 = vmatpush.msrb.mxu0 %v4404_v4  ;;  %2642 = vmatpush.msra.mxu2 %v4405_v23  ;;  %v4455_v4 = vld [vmem:[%s8932_s5 + $0x60] sm:$0xff]  ;;  %v4456_v23 = vld [vmem:[%s8932_s5 + $0x78] sm:$0xff] }
 0x7e8   :  { %2682 = vmatpush.msrb.mxu1 %v4406_v36  ;;  %v4457_v36 = vld [vmem:[%s8932_s5 + $0x50] sm:$0xff] }
 0x7e9   :  { %2665 = vmatpush.msrb.mxu0 %v4407_v9  ;;  %2643 = vmatpush.msra.mxu2 %v4408_v0  ;;  %v4458_v9 = vld [vmem:[%s8932_s5 + $0x68] sm:$0xff]  ;;  %v4459_v0 = vld [vmem:[%s8932_s5 + $0x40] sm:$0xff] }
 0x7ea   :  { %2683 = vmatpush.msrb.mxu1 %v4409_v25  ;;  %v4460_v25 = vld [vmem:[%s8932_s5 + $0x58] sm:$0xff] }
 0x7eb   :  { %2666 = vmatpush.msrb.mxu0 %v4410_v26  ;;  %2644 = vmatpush.msra.mxu2 %v4411_v27  ;;  %v4461_v26 = vld [vmem:[%s8932_s5 + $0x30] sm:$0xff]  ;;  %v4462_v27 = vld [vmem:[%s8932_s5 + $0x48] sm:$0xff] }
 0x7ec   :  { %2684 = vmatpush.msrb.mxu1 %v4412_v28  ;;  %v4463_v28 = vld [vmem:[%s8932_s5 + $0x20] sm:$0xff] }
 0x7ed   :  { %2667 = vmatpush.msrb.mxu0 %v4413_v31  ;;  %2645 = vmatpush.msra.mxu2 %v4414_v32  ;;  %v4464_v31 = vld [vmem:[%s8932_s5 + $0x38] sm:$0xff]  ;;  %v4465_v32 = vld [vmem:[%s8932_s5 + $0x10] sm:$0xff] }
 0x7ee   :  { %2685 = vmatpush.msrb.mxu1 %v4415_v33  ;;  %v4466_v33 = vld [vmem:[%s8932_s5 + $0x28] sm:$0xff] }
 0x7ef   :  { %2668 = vmatpush.msrb.mxu0 %v4416_v34  ;;  %2646 = vmatpush.msra.mxu2 %v4417_v35  ;;  %v4467_v34 = vld [vmem:[%s8932_s5] sm:$0xff]  ;;  %v4468_v35 = vld [vmem:[%s8932_s5 + $0x18] sm:$0xff] }
 0x7f0   :  { %2686 = vmatpush.msrb.mxu1 %v4418_v37  ;;  %v4469_v37 = vld [vmem:[%s8932_s5 + $0x8] sm:$0xff] }
 0x7f1   :  { %2669 = vmatpush.msrb.mxu0 %v4419_v40  ;;  %2647 = vmatpush.msra.mxu2 %v4420_v41  ;;  %v4470_v41 = vld [vmem:[%s8932_s5 + $0x530] sm:$0xff] }
 0x7f2   :  { %2687 = vmatpush.msrb.mxu1 %v4422_v43 }
 0x7f3   :  { %2761 = vmatpush.msra.mxu0 %v4421_v42  ;;  %2648 = vmatpush.msra.mxu2 %v4423_v45  ;;  %v4471_v42 = vld [vmem:[%s8932_s5 + $0x520] sm:$0xff]  ;;  %v4472_v45 = vld [vmem:[%s8932_s5 + $0x510] sm:$0xff] }
 0x7f4   :  { %2688 = vmatpush.msrb.mxu1 %v4425_v47  ;;  %v4474_v47 = vld [vmem:[%s8932_s5 + $0x4f0] sm:$0xff] }
 0x7f5   :  { %2762 = vmatpush.msra.mxu0 %v4424_v53  ;;  %2649 = vmatpush.msra.mxu2 %v4426_v29  ;;  %v4473_v53 = vld [vmem:[%s8932_s5 + $0x500] sm:$0xff] }
 0x7f6   :  { %2689 = vmatpush.msrb.mxu1 %v4429_v1  ;;  %v4475_v29 = vld [vmem:[%s8932_s5 + $0x4e0] sm:$0xff] }
 0x7f7   :  { %2763 = vmatpush.msra.mxu0 %v4427_v30  ;;  %2697 = vmatpush.msrb.mxu2 %v4428_v57  ;;  %v4476_v30 = vld [vmem:[%s8932_s5 + $0x4d0] sm:$0xff]  ;;  %v4477_v1 = vld [vmem:[%s8932_s5 + $0x4c0] sm:$0xff] }
 0x7f8   :  { %2737 = vmatpush.msra.mxu1 %v4432_v3  ;;  %v4480_v3 = vld [vmem:[%s8932_s5 + $0x468] sm:$0xff] }
 0x7f9   :  { %2764 = vmatpush.msra.mxu0 %v4430_v48  ;;  %2698 = vmatpush.msrb.mxu2 %v4431_v2  ;;  %v4478_v48 = vld [vmem:[%s8932_s5 + $0x478] sm:$0xff]  ;;  %v4479_v2 = vld [vmem:[%s8932_s5 + $0x4b0] sm:$0xff] }
 0x7fa   :  { %2738 = vmatpush.msra.mxu1 %v4435_v7  ;;  %v4482_v7 = vld [vmem:[%s8932_s5 + $0x490] sm:$0xff] }
 0x7fb   :  { %2765 = vmatpush.msra.mxu0 %v4433_v6  ;;  %2699 = vmatpush.msrb.mxu2 %v4434_v55  ;;  %v4481_v6 = vld [vmem:[%s8932_s5 + $0x4a0] sm:$0xff] }
 0x7fc   :  { %2739 = vmatpush.msra.mxu1 %v4438_v24  ;;  %v4485_v24 = vld [vmem:[%s8932_s5 + $0x538] sm:$0xff] }
 0x7fd   :  { %2766 = vmatpush.msra.mxu0 %v4436_v10  ;;  %2700 = vmatpush.msrb.mxu2 %v4437_v58  ;;  %v4483_v10 = vld [vmem:[%s8932_s5 + $0x470] sm:$0xff]  ;;  %v4484_v58 = vld [vmem:[%s8932_s5 + $0x480] sm:$0xff] }
 0x7fe   :  { %2740 = vmatpush.msra.mxu1 %v4441_v50  ;;  %v4488_v50 = vld [vmem:[%s8932_s5 + $0x458] sm:$0xff] }
 0x7ff   :  { %2767 = vmatpush.msra.mxu0 %v4439_v11  ;;  %2701 = vmatpush.msrb.mxu2 %v4440_v59  ;;  %v4486_v11 = vld [vmem:[%s8932_s5 + $0x460] sm:$0xff]  ;;  %v4487_v59 = vld [vmem:[%s8932_s5 + $0x528] sm:$0xff] }
 0x800   :  { %2741 = vmatpush.msra.mxu1 %v4444_v16  ;;  %v4492_v16 = vld [vmem:[%s8931_s4 + $0x10] sm:$0x7f] }
 0x801   :  { %2768 = vmatpush.msra.mxu0 %v4442_v52  ;;  %2702 = vmatpush.msrb.mxu2 %v4443_v13  ;;  %v4490_v52 = vld [vmem:[%s8932_s5 + $0x518] sm:$0xff]  ;;  %v4491_v13 = vld [vmem:[%s8932_s5 + $0x448] sm:$0xff] }
 0x802   :  { %2742 = vmatpush.msra.mxu1 %v4447_v62  ;;  %v4496_v62 = vld [vmem:[%s8932_s5 + $0x4f8] sm:$0xff] }
 0x803   :  { %2769 = vmatpush.msra.mxu0 %v4445_v44  ;;  %2703 = vmatpush.msrb.mxu2 %v4446_v49  ;;  %v4494_v44 = vld [vmem:[%s8932_s5 + $0x440] sm:$0xff]  ;;  %v4495_v49 = vld [vmem:[%s8932_s5 + $0x438] sm:$0xff] }
 0x804   :  { %2743 = vmatpush.msra.mxu1 %v4450_v20  ;;  %v4499_v20 = vld [vmem:[%s8932_s5 + $0x4e8] sm:$0xff] }
 0x805   :  { %2770 = vmatpush.msra.mxu0 %v4448_v17  ;;  %2704 = vmatpush.msrb.mxu2 %v4449_v19  ;;  %v4497_v17 = vld [vmem:[%s8932_s5 + $0x430] sm:$0xff]  ;;  %v4498_v19 = vld [vmem:[%s8932_s5 + $0x428] sm:$0xff] }
 0x806   :  { %2744 = vmatpush.msra.mxu1 %v4453_v21  ;;  %v4502_v21 = vld [vmem:[%s8932_s5 + $0x4d8] sm:$0xff] }
 0x807   :  { %2771 = vmatpush.msra.mxu0 %v4451_v63  ;;  %2705 = vmatpush.msrb.mxu2 %v4452_v56  ;;  %v4500_v63 = vld [vmem:[%s8932_s5 + $0x420] sm:$0xff]  ;;  %v4501_v56 = vld [vmem:[%s8932_s5 + $0x418] sm:$0xff] }
 0x808   :  { %2745 = vmatpush.msra.mxu1 %v4456_v23  ;;  %v4505_v23 = vld [vmem:[%s8932_s5 + $0x4c8] sm:$0xff] }
 0x809   :  { %2772 = vmatpush.msra.mxu0 %v4454_v22  ;;  %2706 = vmatpush.msrb.mxu2 %v4455_v4  ;;  %v4503_v22 = vld [vmem:[%s8932_s5 + $0x410] sm:$0xff]  ;;  %v4504_v4 = vld [vmem:[%s8932_s5 + $0x408] sm:$0xff] }
 0x80a   :  { %2746 = vmatpush.msra.mxu1 %v4458_v9  ;;  %v4507_v9 = vld [vmem:[%s8932_s5 + $0x3f8] sm:$0xff] }
 0x80b   :  { %2707 = vmatpush.msrb.mxu2 %v4457_v36  ;;  %v4506_v36 = vld [vmem:[%s8932_s5 + $0x400] sm:$0xff] }
 0x80c   :  { %2747 = vmatpush.msra.mxu1 %v4460_v25  ;;  %v4509_v25 = vld [vmem:[%s8932_s5 + $0x3f0] sm:$0xff] }
 0x80d   :  { %2708 = vmatpush.msrb.mxu2 %v4459_v0  ;;  %v4508_v0 = vld [vmem:[%s8932_s5 + $0x4b8] sm:$0xff] }
 0x80e   :  { %2748 = vmatpush.msra.mxu1 %v4462_v27  ;;  %v4511_v27 = vld [vmem:[%s8932_s5 + $0x4a8] sm:$0xff] }
 0x80f   :  { %2709 = vmatpush.msrb.mxu2 %v4461_v26  ;;  %v4510_v26 = vld [vmem:[%s8932_s5 + $0x3e8] sm:$0xff] }
 0x810   :  { %2749 = vmatpush.msra.mxu1 %v4464_v31  ;;  %v4513_v31 = vld [vmem:[%s8932_s5 + $0x3d8] sm:$0xff] }
 0x811   :  { %2710 = vmatpush.msrb.mxu2 %v4463_v28  ;;  %v4512_v28 = vld [vmem:[%s8932_s5 + $0x3e0] sm:$0xff] }
 0x812   :  { %2750 = vmatpush.msra.mxu1 %v4466_v33  ;;  %v4515_v33 = vld [vmem:[%s8932_s5 + $0x3d0] sm:$0xff] }
 0x813   :  { %2711 = vmatpush.msrb.mxu2 %v4465_v32  ;;  %v4514_v32 = vld [vmem:[%s8932_s5 + $0x498] sm:$0xff] }
 0x814   :  { %2751 = vmatpush.msra.mxu1 %v4468_v35  ;;  %v4517_v35 = vld [vmem:[%s8932_s5 + $0x488] sm:$0xff] }
 0x815   :  { %2712 = vmatpush.msrb.mxu2 %v4467_v34  ;;  %v4516_v34 = vld [vmem:[%s8932_s5 + $0x3c8] sm:$0xff] }
 0x816   :  { %2752 = vmatpush.msra.mxu1 %v4469_v37  ;;  %v4518_v37 = vld [vmem:[%s8932_s5 + $0x3c0] sm:$0xff] }
 0x84d   :  { %v2588_v40 = vpop.f32.mrf.mxu0  ;;  %v2548_v43 = vpop.f32.mrf.mxu1 }
 0x84e   :  { %2630 = vmatmul.f32.vlgmr.msrb.gmra.mxu3 %v2588_v40  ;;  %2670 = vmatmul.f32.vlgmr.msrb.gmra.mxu0 %v2588_v40  ;;  %v4519_v40 = vld [vmem:[%s8932_s5 + $0x3b8] sm:$0xff] }
 0x84f   :  { %4246 = vmatpush.msk.msrb.mxu3 %vm472_vm3, %v7304_v51  ;;  %2844 = vmatpush.msrb.mxu0 %v4470_v41  ;;  %v4520_v41 = vld [vmem:[%s8932_s5 + $0x3b0] sm:$0xff] }
 0x851   :  { %2792 = vmatpush.msrb.mxu3 %v7306_v54  ;;  %2845 = vmatpush.msrb.mxu0 %v4471_v42  ;;  %v4521_v42 = vld [vmem:[%s8932_s5 + $0x3a8] sm:$0xff] }
 0x853   :  { %2846 = vmatpush.msrb.mxu0 %v4472_v45  ;;  %v4524_v45 = vld [vmem:[%s8932_s5 + $0x390] sm:$0xff] }
 0x855   :  { %2847 = vmatpush.msrb.mxu0 %v4473_v53  ;;  %v4526_v53 = vld [vmem:[%s8932_s5 + $0x380] sm:$0xff] }
 0x857   :  { %2848 = vmatpush.msrb.mxu0 %v4474_v47  ;;  %v4527_v47 = vld [vmem:[%s8932_s5 + $0x638] sm:$0xff] }
 0x859   :  { %2849 = vmatpush.msrb.mxu0 %v4475_v29  ;;  %v4528_v29 = vld [vmem:[%s8932_s5 + $0x630] sm:$0xff] }
 0x85b   :  { %2850 = vmatpush.msrb.mxu0 %v4476_v30  ;;  %v2608_v57 = vpop.f32.mrf.mxu1  ;;  %v4529_v30 = vld [vmem:[%s8932_s5 + $0x628] sm:$0xff] }
 0x85c   :  { %4242 = vmatmul.msk.f32.vlgmr.msra.gmra.mxu2 %vm677_vm5, %v2608_v57  ;;  %4243 = vmatmul.msk.f32.vlgmr.msrb.gmra.mxu1 %vm677_vm5, %v2608_v57  ;;  %v4530_v57 = vld [vmem:[%s8932_s5 + $0x620] sm:$0xff] }
 0x85d   :  { %4248 = vmatpush.msk.msra.mxu2 %vm472_vm3, %v7338_v39  ;;  %2851 = vmatpush.msrb.mxu0 %v4477_v1  ;;  %v4531_v1 = vld [vmem:[%s8932_s5 + $0x618] sm:$0xff] }
 0x85e   :  { %2860 = vmatpush.msrb.mxu1 %v4478_v48  ;;  %v4532_v48 = vld [vmem:[%s8932_s5 + $0x610] sm:$0xff] }
 0x85f   :  { %2812 = vmatpush.msra.mxu2 %v7343_v60  ;;  %2852 = vmatpush.msrb.mxu0 %v4479_v2  ;;  %v4533_v2 = vld [vmem:[%s8932_s5 + $0x608] sm:$0xff] }
 0x860   :  { %2861 = vmatpush.msrb.mxu1 %v4480_v3  ;;  %v4534_v3 = vld [vmem:[%s8932_s5 + $0x600] sm:$0xff] }
 0x861   :  { %2853 = vmatpush.msrb.mxu0 %v4481_v6  ;;  %v2568_v55 = vpop.f32.mrf.mxu2  ;;  %v4535_v6 = vld [vmem:[%s8932_s5 + $0x5f8] sm:$0xff] }
 0x862   :  { %4244 = vmatmul.msk.f32.vlgmr.msra.gmra.mxu3 %vm677_vm5, %v2568_v55  ;;  %4245 = vmatmul.msk.f32.vlgmr.msra.gmra.mxu0 %vm677_vm5, %v2568_v55  ;;  %v4536_v55 = vld [vmem:[%s8932_s5 + $0x5f0] sm:$0xff] }
 0x863   :  { %2854 = vmatpush.msrb.mxu0 %v4482_v7  ;;  %2820 = vmatpush.msra.mxu3 %v4483_v10  ;;  %v4537_v7 = vld [vmem:[%s8932_s5 + $0x5e8] sm:$0xff]  ;;  %v4538_v10 = vld [vmem:[%s8932_s5 + $0x5e0] sm:$0xff] }
 0x864   :  { %2713 = vmatmul.f32.vlgmr.msrb.gmra.mxu2 %v2548_v43  ;;  %2753 = vmatmul.f32.vlgmr.msra.gmra.mxu1 %v2548_v43  ;;  %v4523_v43 = vld [vmem:[%s8932_s5 + $0x398] sm:$0xff] }
 0x865   :  { %2855 = vmatpush.msrb.mxu0 %v4484_v58  ;;  %2884 = vmatpush.msrb.mxu2 %v4485_v24  ;;  %v4539_v58 = vld [vmem:[%s8932_s5 + $0x5d8] sm:$0xff]  ;;  %v4540_v24 = vld [vmem:[%s8932_s5 + $0x5d0] sm:$0xff] }
 0x866   :  { %2821 = vmatpush.msra.mxu3 %v4486_v11  ;;  %2862 = vmatpush.msrb.mxu1 %v4488_v50  ;;  %v4541_v11 = vld [vmem:[%s8932_s5 + $0x5c8] sm:$0xff]  ;;  %v4543_v50 = vld [vmem:[%s8932_s5 + $0x5b8] sm:$0xff] }
 0x867   :  { %4252 = vmatpush.msk.msra.mxu0 %vm472_vm3, %v7304_v51  ;;  %2885 = vmatpush.msrb.mxu2 %v4487_v59  ;;  %v4489_v51 = vld [vmem:[%s8932_s5 + $0x450] sm:$0xff]  ;;  %v4542_v59 = vld [vmem:[%s8932_s5 + $0x5c0] sm:$0xff] }
 0x868   :  { %2822 = vmatpush.msra.mxu3 %v4489_v51  ;;  %2863 = vmatpush.msrb.mxu1 %v4491_v13  ;;  %v4544_v51 = vld [vmem:[%s8932_s5 + $0x5b0] sm:$0xff]  ;;  %v4546_v13 = vld [vmem:[%s8932_s5 + $0x5a0] sm:$0xff] }
 0x869   :  { %2917 = vmatpush.msra.mxu0 %v7306_v54  ;;  %2886 = vmatpush.msrb.mxu2 %v4490_v52  ;;  %v4493_v54 = vld [vmem:[%s8932_s5 + $0x508] sm:$0xff] }
 0x86a   :  { %4247 = vmatmul.msk.f32.vlgmr.msrb.gmra.mxu3 %vm468_vm4, %v4492_v16  ;;  %2864 = vmatpush.msrb.mxu1 %v4495_v49  ;;  %v4545_v52 = vld [vmem:[%s8932_s5 + $0x5a8] sm:$0xff]  ;;  %v4550_v49 = vld [vmem:[%s8932_s5 + $0x580] sm:$0xff] }
 0x86b   :  { %2887 = vmatpush.msrb.mxu2 %v4493_v54  ;;  %2823 = vmatpush.msra.mxu3 %v4494_v44  ;;  %v4548_v54 = vld [vmem:[%s8932_s5 + $0x590] sm:$0xff]  ;;  %v4549_v44 = vld [vmem:[%s8932_s5 + $0x588] sm:$0xff] }
 0x86c   :  { %4249 = vmatmul.msk.f32.vlgmr.msra.gmra.mxu2 %vm468_vm4, %v4492_v16  ;;  %2865 = vmatpush.msrb.mxu1 %v4498_v19  ;;  %v4547_v16 = vld [vmem:[%s8932_s5 + $0x598] sm:$0xff]  ;;  %v4553_v19 = vld [vmem:[%s8932_s5 + $0x568] sm:$0xff] }
 0x86d   :  { %2888 = vmatpush.msrb.mxu2 %v4496_v62  ;;  %2824 = vmatpush.msra.mxu3 %v4497_v17  ;;  %v4551_v62 = vld [vmem:[%s8932_s5 + $0x578] sm:$0xff]  ;;  %v4552_v17 = vld [vmem:[%s8932_s5 + $0x570] sm:$0xff] }
 0x86e   :  { %2866 = vmatpush.msrb.mxu1 %v4501_v56  ;;  %v4556_v56 = vld [vmem:[%s8932_s5 + $0x550] sm:$0xff] }
 0x86f   :  { %2889 = vmatpush.msrb.mxu2 %v4499_v20  ;;  %2825 = vmatpush.msra.mxu3 %v4500_v63  ;;  %v4554_v20 = vld [vmem:[%s8932_s5 + $0x560] sm:$0xff]  ;;  %v4555_v63 = vld [vmem:[%s8932_s5 + $0x558] sm:$0xff] }
 0x870   :  { %2867 = vmatpush.msrb.mxu1 %v4504_v4 }
 0x871   :  { %2890 = vmatpush.msrb.mxu2 %v4502_v21  ;;  %2826 = vmatpush.msra.mxu3 %v4503_v22  ;;  %v4557_v21 = vld [vmem:[%s8932_s5 + $0x548] sm:$0xff]  ;;  %v4558_v22 = vld [vmem:[%s8932_s5 + $0x540] sm:$0xff] }
 0x872   :  { %2868 = vmatpush.msrb.mxu1 %v4507_v9 }
 0x873   :  { %2891 = vmatpush.msrb.mxu2 %v4505_v23  ;;  %2827 = vmatpush.msra.mxu3 %v4506_v36 }
 0x874   :  { %2869 = vmatpush.msrb.mxu1 %v4510_v26 }
 0x875   :  { %2892 = vmatpush.msrb.mxu2 %v4508_v0  ;;  %2828 = vmatpush.msra.mxu3 %v4509_v25 }
 0x876   :  { %2870 = vmatpush.msrb.mxu1 %v4513_v31  ;;  %v4559_v31 = vld [vmem:[%s8933_s8 + $0x2b0] sm:$0xff] }
 0x877   :  { %2893 = vmatpush.msrb.mxu2 %v4511_v27  ;;  %2829 = vmatpush.msra.mxu3 %v4512_v28 }
 0x878   :  { %2871 = vmatpush.msrb.mxu1 %v4516_v34  ;;  %v4562_v34 = vld [vmem:[%s8933_s8 + $0x2a0] sm:$0xff] }
 0x879   :  { %2894 = vmatpush.msrb.mxu2 %v4514_v32  ;;  %2830 = vmatpush.msra.mxu3 %v4515_v33  ;;  %v4560_v32 = vld [vmem:[%s8932_s5 + $0x6f0] sm:$0xff]  ;;  %v4561_v33 = vld [vmem:[%s8932_s5 + $0x6f8] sm:$0xff] }
 0x87a   :  { %2872 = vmatpush.msrb.mxu1 %v4519_v40  ;;  %v4565_v40 = vld [vmem:[%s8933_s8 + $0x290] sm:$0xff] }
 0x87b   :  { %2895 = vmatpush.msrb.mxu2 %v4517_v35  ;;  %2831 = vmatpush.msra.mxu3 %v4518_v37  ;;  %v4563_v35 = vld [vmem:[%s8932_s5 + $0x6e0] sm:$0xff]  ;;  %v4564_v37 = vld [vmem:[%s8932_s5 + $0x6e8] sm:$0xff] }
 0x87c   :  { %2873 = vmatpush.msrb.mxu1 %v4521_v42  ;;  %v4567_v42 = vld [vmem:[%s8932_s5 + $0x6d8] sm:$0xff] }
 0x87d   :  { %4254 = vmatpush.msk.msra.mxu2 %vm472_vm3, %v7338_v39  ;;  %2832 = vmatpush.msra.mxu3 %v4520_v41  ;;  %v4522_v39 = vld [vmem:[%s8932_s5 + $0x3a0] sm:$0xff]  ;;  %v4566_v41 = vld [vmem:[%s8932_s5 + $0x6d0] sm:$0xff] }
 0x87e   :  { %2874 = vmatpush.msrb.mxu1 %v4523_v43  ;;  %v4569_v43 = vld [vmem:[%s8932_s5 + $0x6c0] sm:$0xff] }
 0x87f   :  { %2937 = vmatpush.msra.mxu2 %v7343_v60  ;;  %2833 = vmatpush.msra.mxu3 %v4522_v39  ;;  %v4525_v60 = vld [vmem:[%s8932_s5 + $0x388] sm:$0xff]  ;;  %v4568_v39 = vld [vmem:[%s8933_s8 + $0x280] sm:$0xff] }
 0x880   :  { %2875 = vmatpush.msrb.mxu1 %v4525_v60  ;;  %v4571_v60 = vld [vmem:[%s8931_s4 + $0x18] sm:$0x7f] }
 0x881   :  { %2834 = vmatpush.msra.mxu3 %v4524_v45  ;;  %v4570_v45 = vld [vmem:[%s8932_s5 + $0x6c8] sm:$0xff] }
 0x882   :  { %2985 = vmatpush.msra.mxu1 %v4527_v47  ;;  %v4573_v47 = vld [vmem:[%s8932_s5 + $0x6b8] sm:$0xff] }
 0x883   :  { %2835 = vmatpush.msra.mxu3 %v4526_v53  ;;  %v4572_v53 = vld [vmem:[%s8932_s5 + $0x6b0] sm:$0xff] }
 0x884   :  { %2986 = vmatpush.msra.mxu1 %v4529_v30  ;;  %v4575_v30 = vld [vmem:[%s8932_s5 + $0x6a0] sm:$0xff] }
 0x885   :  { %2945 = vmatpush.msrb.mxu3 %v4528_v29  ;;  %v4574_v29 = vld [vmem:[%s8933_s8 + $0x270] sm:$0xff] }
 0x886   :  { %2987 = vmatpush.msra.mxu1 %v4531_v1  ;;  %v4577_v1 = vld [vmem:[%s8933_s8 + $0x260] sm:$0xff] }
 0x887   :  { %2946 = vmatpush.msrb.mxu3 %v4530_v57  ;;  %v4576_v57 = vld [vmem:[%s8932_s5 + $0x6a8] sm:$0xff] }
 0x888   :  { %2988 = vmatpush.msra.mxu1 %v4533_v2  ;;  %v4579_v2 = vld [vmem:[%s8932_s5 + $0x698] sm:$0xff] }
 0x889   :  { %2947 = vmatpush.msrb.mxu3 %v4532_v48  ;;  %v4578_v48 = vld [vmem:[%s8932_s5 + $0x690] sm:$0xff] }
 0x88a   :  { %2989 = vmatpush.msra.mxu1 %v4535_v6  ;;  %v4581_v6 = vld [vmem:[%s8932_s5 + $0x680] sm:$0xff] }
 0x88b   :  { %2948 = vmatpush.msrb.mxu3 %v4534_v3  ;;  %v4580_v3 = vld [vmem:[%s8933_s8 + $0x250] sm:$0xff] }
 0x88c   :  { %2990 = vmatpush.msra.mxu1 %v4537_v7  ;;  %v4583_v7 = vld [vmem:[%s8933_s8 + $0x240] sm:$0xff] }
 0x88d   :  { %2949 = vmatpush.msrb.mxu3 %v4536_v55  ;;  %v4582_v55 = vld [vmem:[%s8932_s5 + $0x688] sm:$0xff] }
 0x88e   :  { %2991 = vmatpush.msra.mxu1 %v4539_v58  ;;  %v4585_v58 = vld [vmem:[%s8932_s5 + $0x678] sm:$0xff] }
 0x88f   :  { %2950 = vmatpush.msrb.mxu3 %v4538_v10  ;;  %v4584_v10 = vld [vmem:[%s8932_s5 + $0x670] sm:$0xff] }
 0x890   :  { %2992 = vmatpush.msra.mxu1 %v4541_v11  ;;  %v4587_v11 = vld [vmem:[%s8932_s5 + $0x660] sm:$0xff] }
 0x891   :  { %2951 = vmatpush.msrb.mxu3 %v4540_v24  ;;  %v4586_v24 = vld [vmem:[%s8933_s8 + $0x230] sm:$0xff] }
 0x892   :  { %2993 = vmatpush.msra.mxu1 %v4543_v50  ;;  %v4589_v50 = vld [vmem:[%s8933_s8 + $0x220] sm:$0xff] }
 0x893   :  { %2952 = vmatpush.msrb.mxu3 %v4542_v59  ;;  %v4588_v59 = vld [vmem:[%s8932_s5 + $0x668] sm:$0xff] }
 0x894   :  { %2994 = vmatpush.msra.mxu1 %v4545_v52  ;;  %v4591_v52 = vld [vmem:[%s8932_s5 + $0x658] sm:$0xff] }
 0x895   :  { %2953 = vmatpush.msrb.mxu3 %v4544_v51  ;;  %v4590_v51 = vld [vmem:[%s8932_s5 + $0x650] sm:$0xff] }
 0x896   :  { %2995 = vmatpush.msra.mxu1 %v4547_v16  ;;  %v4593_v16 = vld [vmem:[%s8932_s5 + $0x640] sm:$0xff] }
 0x897   :  { %2954 = vmatpush.msrb.mxu3 %v4546_v13  ;;  %v4592_v13 = vld [vmem:[%s8933_s8 + $0x210] sm:$0xff] }
 0x898   :  { %2996 = vmatpush.msra.mxu1 %v4549_v44  ;;  %v4595_v44 = vld [vmem:[%s8933_s8 + $0x200] sm:$0xff] }
 0x899   :  { %2955 = vmatpush.msrb.mxu3 %v4548_v54  ;;  %v4594_v54 = vld [vmem:[%s8932_s5 + $0x648] sm:$0xff] }
 0x89a   :  { %2997 = vmatpush.msra.mxu1 %v4551_v62  ;;  %v4597_v62 = vld [vmem:[%s8933_s8 + $0x1e0] sm:$0xff] }
 0x89b   :  { %2956 = vmatpush.msrb.mxu3 %v4550_v49  ;;  %v4596_v49 = vld [vmem:[%s8933_s8 + $0x1f0] sm:$0xff] }
 0x89c   :  { %2998 = vmatpush.msra.mxu1 %v4553_v19  ;;  %v4599_v19 = vld [vmem:[%s8933_s8 + $0x1c0] sm:$0xff] }
 0x89d   :  { %2957 = vmatpush.msrb.mxu3 %v4552_v17  ;;  %v4598_v17 = vld [vmem:[%s8933_s8 + $0x1d0] sm:$0xff] }
 0x89e   :  { %2999 = vmatpush.msra.mxu1 %v4555_v63 }
 0x89f   :  { %2958 = vmatpush.msrb.mxu3 %v4554_v20 }
 0x8a0   :  { %3000 = vmatpush.msra.mxu1 %v4557_v21 }
 0x8a1   :  { %2959 = vmatpush.msrb.mxu3 %v4556_v56 }
 0x8a3   :  { %2960 = vmatpush.msrb.mxu3 %v4558_v22 }
 0x8cb   :  { %v2671_v20 = vpop.f32.mrf.mxu0 }
 0x8d1   :  { %v2631_v4 = vpop.f32.mrf.mxu3 }
 0x8d9   :  { %v2691_v63 = vpop.f32.mrf.mxu1 }
 0x8df   :  { %v2651_v23 = vpop.f32.mrf.mxu2  ;;  %v2774_v56 = vpop.f32.mrf.mxu0 }
 0x8e0   :  { %v2652_v36 = vadd.f32 %v2651_v23, %v2631_v4  ;;  %v2692_v4 = vadd.f32 %v2691_v63, %v2671_v20  ;;  %v4629_v20 = vld [vmem:[%s8933_s8 + $0x340] sm:$0xff]  ;;  %v4630_v63 = vld [vmem:[%s8933_s8 + $0x348] sm:$0xff] }
 0x8e1   :  { %v2754_v21 = vpop.f32.mrf.mxu1 }
 0x8e2   :  { %v2755_v23 = vadd.f32 %v2754_v21, %v2692_v4  ;;  %v4632_v21 = vld [vmem:[%s8933_s8 + $0x330] sm:$0xff]  ;;  %v4634_v4 = vld [vmem:[%s8933_s8 + $0x258] sm:$0xff] }
 0x8e5   :  { %v2734_v9 = vpop.f32.mrf.mxu3 }
 0x8e7   :  { %v2714_v0 = vpop.f32.mrf.mxu2 }
 0x8e8   :  { %v2715_v25 = vadd.f32 %v2714_v0, %v2652_v36 }
 0x8ea   :  { %v7875_v26 = vadd.f32 %v2734_v9, %v2715_v25 }
 0x8ed   :  { %v2794_v27 = vpop.f32.mrf.mxu3 }
 0x8ee   :  { %2836 = vmatmul.f32.vlgmr.msra.gmra.mxu3 %v2794_v27  ;;  %2876 = vmatmul.f32.vlgmr.msrb.gmra.mxu1 %v2794_v27  ;;  %v2775_v27 = vadd.f32 %v2774_v56, %v2755_v23  ;;  %v4631_v56 = vld [vmem:[%s8933_s8 + $0x268] sm:$0xff]  ;;  %v4635_v23 = vld [vmem:[%s8933_s8 + $0x320] sm:$0xff] }
 0x8ef   :  { %v2814_v28 = vpop.f32.mrf.mxu2  ;;  %3120 = vmatpush.msrb.mxu1 %v4559_v31 }
 0x8f0   :  { %4250 = vmatmul.msk.f32.vlgmr.msrb.gmra.mxu0 %vm677_vm5, %v2814_v28  ;;  %4251 = vmatmul.msk.f32.vlgmr.msrb.gmra.mxu2 %vm677_vm5, %v2814_v28 }
 0x8f1   :  { %2969 = vmatpush.msrb.mxu0 %v4560_v32  ;;  %3009 = vmatpush.msrb.mxu2 %v4561_v33 }
 0x8f2   :  { %3121 = vmatpush.msrb.mxu1 %v4562_v34  ;;  %v4600_v34 = vld [vmem:[%s8933_s8 + $0xf8] sm:$0xff] }
 0x8f3   :  { %2970 = vmatpush.msrb.mxu0 %v4563_v35  ;;  %3010 = vmatpush.msrb.mxu2 %v4564_v37  ;;  %v4601_v35 = vld [vmem:[%s8933_s8 + $0xe8] sm:$0xff] }
 0x8f4   :  { %3122 = vmatpush.msrb.mxu1 %v4565_v40  ;;  %v4603_v40 = vld [vmem:[%s8933_s8 + $0xc8] sm:$0xff] }
 0x8f5   :  { %2971 = vmatpush.msrb.mxu0 %v4566_v41  ;;  %3011 = vmatpush.msrb.mxu2 %v4567_v42  ;;  %v4604_v41 = vld [vmem:[%s8933_s8 + $0xb8] sm:$0xff]  ;;  %v4605_v42 = vld [vmem:[%s8933_s8 + $0xa8] sm:$0xff] }
 0x8f6   :  { %3123 = vmatpush.msrb.mxu1 %v4568_v39  ;;  %v4606_v39 = vld [vmem:[%s8933_s8 + $0x98] sm:$0xff] }
 0x8f7   :  { %2972 = vmatpush.msrb.mxu0 %v4569_v43  ;;  %3012 = vmatpush.msrb.mxu2 %v4570_v45  ;;  %v4607_v43 = vld [vmem:[%s8933_s8 + $0x88] sm:$0xff]  ;;  %v4608_v45 = vld [vmem:[%s8933_s8 + $0x78] sm:$0xff] }
 0x8f8   :  { %4253 = vmatmul.msk.f32.vlgmr.msra.gmra.mxu0 %vm468_vm4, %v4571_v60  ;;  %4255 = vmatmul.msk.f32.vlgmr.msra.gmra.mxu2 %vm468_vm4, %v4571_v60  ;;  %v4609_v60 = vld [vmem:[%s8933_s8 + $0x68] sm:$0xff] }
 0x8f9   :  { %2973 = vmatpush.msrb.mxu0 %v4572_v53  ;;  %3013 = vmatpush.msrb.mxu2 %v4573_v47  ;;  %v4610_v53 = vld [vmem:[%s8933_s8 + $0x58] sm:$0xff]  ;;  %v4611_v47 = vld [vmem:[%s8933_s8 + $0x48] sm:$0xff] }
 0x8fa   :  { %3124 = vmatpush.msrb.mxu1 %v4574_v29  ;;  %v4612_v29 = vld [vmem:[%s8933_s8 + $0x38] sm:$0xff] }
 0x8fb   :  { %2974 = vmatpush.msrb.mxu0 %v4575_v30  ;;  %3014 = vmatpush.msrb.mxu2 %v4576_v57  ;;  %v4613_v30 = vld [vmem:[%s8933_s8 + $0x28] sm:$0xff]  ;;  %v4614_v57 = vld [vmem:[%s8933_s8 + $0x18] sm:$0xff] }
 0x8fc   :  { %3125 = vmatpush.msrb.mxu1 %v4577_v1  ;;  %v4615_v1 = vld [vmem:[%s8933_s8 + $0x8] sm:$0xff] }
 0x8fd   :  { %2975 = vmatpush.msrb.mxu0 %v4578_v48  ;;  %3015 = vmatpush.msrb.mxu2 %v4579_v2 }
 0x8fe   :  { %3126 = vmatpush.msrb.mxu1 %v4580_v3 }
 0x8ff   :  { %2976 = vmatpush.msrb.mxu0 %v4581_v6  ;;  %3016 = vmatpush.msrb.mxu2 %v4582_v55 }
 0x900   :  { %3127 = vmatpush.msrb.mxu1 %v4583_v7 }
 0x901   :  { %2977 = vmatpush.msrb.mxu0 %v4584_v10  ;;  %3017 = vmatpush.msrb.mxu2 %v4585_v58 }
 0x902   :  { %3128 = vmatpush.msrb.mxu1 %v4586_v24 }
 0x903   :  { %2978 = vmatpush.msrb.mxu0 %v4587_v11  ;;  %3018 = vmatpush.msrb.mxu2 %v4588_v59  ;;  %v4616_v59 = vld [vmem:[%s8935_s7] sm:$0x7] }
 0x904   :  { %3129 = vmatpush.msrb.mxu1 %v4589_v50 }
 0x905   :  { %2979 = vmatpush.msrb.mxu0 %v4590_v51  ;;  %3019 = vmatpush.msrb.mxu2 %v4591_v52  ;;  %v4618_v51 = vld [vmem:[%s8933_s8 + $0x2b8] sm:$0xff] }
 0x906   :  { %3130 = vmatpush.msrb.mxu1 %v4592_v13  ;;  %v4619_v13 = vld [vmem:[%s8933_s8 + $0x2a8] sm:$0xff] }
 0x907   :  { %2980 = vmatpush.msrb.mxu0 %v4593_v16  ;;  %3020 = vmatpush.msrb.mxu2 %v4594_v54  ;;  %v4622_v16 = vld [vmem:[%s8933_s8 + $0x298] sm:$0xff]  ;;  %v4623_v54 = vld [vmem:[%s8933_s8 + $0x360] sm:$0xff] }
 0x908   :  { %3131 = vmatpush.msrb.mxu1 %v4595_v44  ;;  %v4624_v44 = vld [vmem:[%s8933_s8 + $0x368] sm:$0xff] }
 0x90a   :  { %3132 = vmatpush.msrb.mxu1 %v4596_v49  ;;  %v4625_v49 = vld [vmem:[%s8933_s8 + $0x288] sm:$0xff] }
 0x90c   :  { %3133 = vmatpush.msrb.mxu1 %v4597_v62  ;;  %v4626_v62 = vld [vmem:[%s8933_s8 + $0x350] sm:$0xff] }
 0x90e   :  { %3134 = vmatpush.msrb.mxu1 %v4598_v17  ;;  %v4627_v17 = vld [vmem:[%s8933_s8 + $0x358] sm:$0xff] }
 0x910   :  { %3135 = vmatpush.msrb.mxu1 %v4599_v19  ;;  %v4628_v19 = vld [vmem:[%s8933_s8 + $0x278] sm:$0xff] }
 0x96b   :  { %v2877_v9 = vpop.f32.mrf.mxu1 }
 0x96d   :  { %v2857_v22 = vpop.f32.mrf.mxu0 }
 0x971   :  { %v2837_v36 = vpop.f32.mrf.mxu3 }
 0x972   :  { %v2858_v0 = vadd.f32 %v2857_v22, %v2837_v36  ;;  %v4633_v22 = vld [vmem:[%s8933_s8 + $0x338] sm:$0xff]  ;;  %v4636_v36 = vld [vmem:[%s8933_s8 + $0x328] sm:$0xff] }
 0x973   :  { %v2897_v25 = vpop.f32.mrf.mxu2 }
 0x974   :  { %v2900_v28 = vadd.f32 %v2858_v0, %v7875_v26  ;;  %v2898_v31 = vadd.f32 %v2897_v25, %v2877_v9  ;;  %v4602_v26 = vld [vmem:[%s8933_s8 + $0xd8] sm:$0xff]  ;;  %v4637_v9 = vld [vmem:[%s8933_s8 + $0x248] sm:$0xff]  ;;  %v4638_v0 = vld [vmem:[%s8933_s8 + $0x310] sm:$0xff] }
 0x975   :  { %v2919_v32 = vpop.f32.mrf.mxu0  ;;  %v4639_v25 = vld [vmem:[%s8933_s8 + $0x318] sm:$0xff] }
 0x976   :  { %v2901_v33 = vadd.f32 %v2898_v31, %v2775_v27  ;;  %2961 = vmatmul.f32.vlgmr.msrb.gmra.mxu3 %v2919_v32  ;;  %3001 = vmatmul.f32.vlgmr.msra.gmra.mxu1 %v2919_v32  ;;  %v4640_v27 = vld [vmem:[%s8933_s8 + $0x238] sm:$0xff]  ;;  %v4642_v31 = vld [vmem:[%s8933_s8 + $0x308] sm:$0xff] }
 0x977   :  { %3243 = vmatpush.msra.mxu1 %v4600_v34  ;;  %v4643_v32 = vld [vmem:[%s8933_s8 + $0x228] sm:$0xff]  ;;  %v4645_v34 = vld [vmem:[%s8933_s8 + $0x2f8] sm:$0xff] }
 0x979   :  { %3244 = vmatpush.msra.mxu1 %v4601_v35  ;;  %v4646_v35 = vld [vmem:[%s8933_s8 + $0x218] sm:$0xff] }
 0x97b   :  { %v2939_v37 = vpop.f32.mrf.mxu2  ;;  %3245 = vmatpush.msra.mxu1 %v4602_v26  ;;  %v4648_v26 = vld [vmem:[%s8933_s8 + $0x2e8] sm:$0xff] }
 0x97c   :  { %4256 = vmatmul.msk.f32.vlgmr.msrb.gmra.mxu0 %vm677_vm5, %v2939_v37  ;;  %4257 = vmatmul.msk.f32.vlgmr.msrb.gmra.mxu2 %vm677_vm5, %v2939_v37  ;;  %v4647_v37 = vld [vmem:[%s8933_s8 + $0x2e0] sm:$0xff] }
 0x97d   :  { %3246 = vmatpush.msra.mxu1 %v4603_v40  ;;  %v4649_v40 = vld [vmem:[%s8933_s8 + $0x208] sm:$0xff] }
 0x97f   :  { %3247 = vmatpush.msra.mxu1 %v4604_v41  ;;  %v4650_v41 = vld [vmem:[%s8933_s8 + $0x2d0] sm:$0xff] }
 0x981   :  { %3248 = vmatpush.msra.mxu1 %v4605_v42  ;;  %v4651_v42 = vld [vmem:[%s8933_s8 + $0x2d8] sm:$0xff] }
 0x983   :  { %3249 = vmatpush.msra.mxu1 %v4606_v39  ;;  %v4652_v39 = vld [vmem:[%s8933_s8 + $0x1f8] sm:$0xff] }
 0x985   :  { %3250 = vmatpush.msra.mxu1 %v4607_v43  ;;  %v4653_v43 = vld [vmem:[%s8933_s8 + $0x2c0] sm:$0xff] }
 0x987   :  { %3251 = vmatpush.msra.mxu1 %v4608_v45  ;;  %v4654_v45 = vld [vmem:[%s8933_s8 + $0x2c8] sm:$0xff] }
 0x989   :  { %3252 = vmatpush.msra.mxu1 %v4609_v60  ;;  %v4655_v60 = vld [vmem:[%s8933_s8 + $0xf0] sm:$0xff] }
 0x98b   :  { %3253 = vmatpush.msra.mxu1 %v4610_v53  ;;  %v4656_v53 = vld [vmem:[%s8933_s8 + $0x1b0] sm:$0xff] }
 0x98d   :  { %3254 = vmatpush.msra.mxu1 %v4611_v47  ;;  %v4657_v47 = vld [vmem:[%s8933_s8 + $0x1e8] sm:$0xff] }
 0x98f   :  { %3255 = vmatpush.msra.mxu1 %v4612_v29  ;;  %v4658_v29 = vld [vmem:[%s8933_s8 + $0xe0] sm:$0xff] }
 0x991   :  { %3256 = vmatpush.msra.mxu1 %v4613_v30  ;;  %v4659_v30 = vld [vmem:[%s8933_s8 + $0x1a0] sm:$0xff] }
 0x993   :  { %3257 = vmatpush.msra.mxu1 %v4614_v57  ;;  %v4660_v57 = vld [vmem:[%s8933_s8 + $0x1d8] sm:$0xff] }
 0x995   :  { %3258 = vmatpush.msra.mxu1 %v4615_v1  ;;  %v4661_v1 = vld [vmem:[%s8933_s8 + $0xd0] sm:$0xff] }
 0x9f3   :  { %v3002_v7 = vpop.f32.mrf.mxu1 }
 0x9f9   :  { %v2962_v48 = vpop.f32.mrf.mxu3  ;;  %v2982_v2 = vpop.f32.mrf.mxu0 }
 0x9fa   :  { %v2983_v3 = vadd.f32 %v2982_v2, %v2962_v48  ;;  %v4662_v48 = vld [vmem:[%s8933_s8 + $0x190] sm:$0xff]  ;;  %v4663_v2 = vld [vmem:[%s8933_s8 + $0x1c8] sm:$0xff] }
 0x9fc   :  { %v3025_v6 = vadd.f32 %v2983_v3, %v2900_v28  ;;  %v4641_v28 = vld [vmem:[%s8933_s8 + $0x300] sm:$0xff] }
 0x9fd   :  { %v4664_v3 = vld [vmem:[%s8933_s8 + $0xc0] sm:$0xff] }
 0x9fe   :  { %v3027_v55 = vadd.f32 %v3025_v6, %v1220_v38  ;;  %v4617_v38 = vld [vmem:[%s8935_s7 + $0x4] sm:$0x7] }
 0x9ff   :  { %v3022_v10 = vpop.f32.mrf.mxu2  ;;  %v4665_v6 = vld [vmem:[%s8933_s8 + $0x180] sm:$0xff] }
 0xa00   :  { %v8057_v58 = vmax.f32 %v3027_v55, 0.0  ;;  %v3023_v24 = vadd.f32 %v3022_v10, %v3002_v7  ;;  %v4666_v55 = vld [vmem:[%s8933_s8 + $0x1b8] sm:$0xff]  ;;  %v4667_v7 = vld [vmem:[%s8933_s8 + $0xb0] sm:$0xff] }
 0xa01   :  { %v4668_v10 = vld [vmem:[%s8933_s8 + $0x170] sm:$0xff] }
 0xa02   :  { %v3026_v11 = vadd.f32 %v3023_v24, %v2901_v33  ;;  %4258 = vmatpush.msk.msra.mxu0 %vm1233_vm6, %v8057_v58  ;;  %4262 = vmatpush.msk.msra.mxu3 %vm1233_vm6, %v8057_v58  ;;  %v4644_v33 = vld [vmem:[%s8933_s8 + $0x2f0] sm:$0xff]  ;;  %v4669_v24 = vld [vmem:[%s8933_s8 + $0x1a8] sm:$0xff] }
 0xa03   :  { %4259 = vmatmul.msk.f32.vlgmr.msra.gmra.mxu0 %vm1229_vm7, %v4616_v59  ;;  %4263 = vmatmul.msk.f32.vlgmr.msra.gmra.mxu3 %vm1229_vm7, %v4617_v38 }
 0xa04   :  { %v3028_v50 = vadd.f32 %v3026_v11, %v1221_v14  ;;  %3160 = vmatpush.msrb.mxu3 %v4618_v51  ;;  %v4621_v14 = vld [vmem:[%s8933_s8 + $0x370] sm:$0xff]  ;;  %v4670_v11 = vld [vmem:[%s8933_s8 + $0xa0] sm:$0xff] }
 0xa05   :  { %v4674_v51 = vld [vmem:[%s8933_s8 + $0x150] sm:$0xff] }
 0xa06   :  { %v8076_v52 = vmax.f32 %v3028_v50, 0.0  ;;  %3161 = vmatpush.msrb.mxu3 %v4619_v13  ;;  %v4673_v50 = vld [vmem:[%s8933_s8 + $0x90] sm:$0xff]  ;;  %v4675_v13 = vld [vmem:[%s8933_s8 + $0x188] sm:$0xff] }
 0xa08   :  { %4260 = vmatpush.msk.msra.mxu2 %vm1233_vm6, %v8076_v52  ;;  %4264 = vmatpush.msk.msrb.mxu0 %vm1233_vm6, %v8076_v52 }
 0xa09   :  { %4261 = vmatmul.msk.f32.vlgmr.msra.gmra.mxu2 %vm1229_vm7, %v4616_v59  ;;  %3162 = vmatpush.msrb.mxu3 %v4622_v16  ;;  %v4671_v59 = vld [vmem:[%s8933_s8 + $0x160] sm:$0xff]  ;;  %v4678_v16 = vld [vmem:[%s8933_s8 + $0x178] sm:$0xff] }
 0xa0a   :  { %3184 = vmatpush.msra.mxu0 %v4620_v5  ;;  %3144 = vmatpush.msrb.mxu2 %v4621_v14  ;;  %v4676_v5 = vld [vmem:[%s8933_s8 + $0x80] sm:$0xff] }
 0xa0b   :  { %4265 = vmatmul.msk.f32.vlgmr.msrb.gmra.mxu0 %vm1229_vm7, %v4617_v38  ;;  %3163 = vmatpush.msrb.mxu3 %v4625_v49  ;;  %v4672_v38 = vld [vmem:[%s8933_s8 + $0x198] sm:$0xff]  ;;  %v4677_v14 = vld [vmem:[%s8933_s8 + $0x140] sm:$0xff]  ;;  %v4681_v49 = vld [vmem:[%s8933_s8 + $0x168] sm:$0xff] }
 0xa0c   :  { %3145 = vmatpush.msrb.mxu2 %v4623_v54  ;;  %3185 = vmatpush.msra.mxu0 %v4624_v44  ;;  %v4679_v54 = vld [vmem:[%s8933_s8 + $0x70] sm:$0xff] }
 0xa0d   :  { %3164 = vmatpush.msrb.mxu3 %v4628_v19  ;;  %v4680_v44 = vld [vmem:[%s8933_s8 + $0x130] sm:$0xff]  ;;  %v4684_v19 = vld [vmem:[%s8933_s8 + $0x158] sm:$0xff] }
 0xa0e   :  { %3146 = vmatpush.msrb.mxu2 %v4626_v62  ;;  %3186 = vmatpush.msra.mxu0 %v4627_v17  ;;  %v4682_v62 = vld [vmem:[%s8933_s8 + $0x60] sm:$0xff] }
 0xa0f   :  { %3165 = vmatpush.msrb.mxu3 %v4631_v56  ;;  %v4683_v17 = vld [vmem:[%s8933_s8 + $0x120] sm:$0xff]  ;;  %v4687_v56 = vld [vmem:[%s8933_s8 + $0x148] sm:$0xff] }
 0xa10   :  { %3147 = vmatpush.msrb.mxu2 %v4629_v20  ;;  %3187 = vmatpush.msra.mxu0 %v4630_v63  ;;  %v4685_v20 = vld [vmem:[%s8933_s8 + $0x50] sm:$0xff] }
 0xa11   :  { %3166 = vmatpush.msrb.mxu3 %v4634_v4  ;;  %v4686_v63 = vld [vmem:[%s8933_s8 + $0x110] sm:$0xff]  ;;  %v4690_v4 = vld [vmem:[%s8933_s8 + $0x138] sm:$0xff] }
 0xa12   :  { %3148 = vmatpush.msrb.mxu2 %v4632_v21  ;;  %3188 = vmatpush.msra.mxu0 %v4633_v22  ;;  %v4688_v21 = vld [vmem:[%s8933_s8 + $0x40] sm:$0xff] }
 0xa13   :  { %3167 = vmatpush.msrb.mxu3 %v4637_v9  ;;  %v4689_v22 = vld [vmem:[%s8933_s8 + $0x100] sm:$0xff] }
 0xa14   :  { %3149 = vmatpush.msrb.mxu2 %v4635_v23  ;;  %3189 = vmatpush.msra.mxu0 %v4636_v36  ;;  %v4691_v23 = vld [vmem:[%s8933_s8 + $0x30] sm:$0xff]  ;;  %v4692_v36 = vld [vmem:[%s8933_s8 + $0x128] sm:$0xff]  ;;  %v4693_v9 = vld [vmem:[%s8933_s8 + $0x20] sm:$0xff] }
 0xa15   :  { %3168 = vmatpush.msrb.mxu3 %v4640_v27  ;;  %v4696_v27 = vld [vmem:[%s8933_s8 + $0x108] sm:$0xff] }
 0xa16   :  { %3150 = vmatpush.msrb.mxu2 %v4638_v0  ;;  %3190 = vmatpush.msra.mxu0 %v4639_v25  ;;  %v4694_v0 = vld [vmem:[%s8933_s8 + $0x118] sm:$0xff]  ;;  %v4695_v25 = vld [vmem:[%s8933_s8 + $0x10] sm:$0xff] }
 0xa17   :  { %3169 = vmatpush.msrb.mxu3 %v4643_v32 }
 0xa18   :  { %3151 = vmatpush.msrb.mxu2 %v4641_v28  ;;  %3191 = vmatpush.msra.mxu0 %v4642_v31  ;;  %v4697_v28 = vld [vmem:[%s8933_s8] sm:$0xff] }
 0xa19   :  { %3170 = vmatpush.msrb.mxu3 %v4646_v35  ;;  %v4699_v35 = vld [vmem:[%s8933_s8 + $0x478] sm:$0xff] }
 0xa1a   :  { %3152 = vmatpush.msrb.mxu2 %v4644_v33  ;;  %3192 = vmatpush.msra.mxu0 %v4645_v34  ;;  %v4698_v34 = vld [vmem:[%s8933_s8 + $0x470] sm:$0xff] }
 0xa1b   :  { %3171 = vmatpush.msrb.mxu3 %v4649_v40 }
 0xa1c   :  { %3153 = vmatpush.msrb.mxu2 %v4647_v37  ;;  %3193 = vmatpush.msra.mxu0 %v4648_v26  ;;  %v4700_v37 = vld [vmem:[%s8933_s8 + $0x460] sm:$0xff]  ;;  %v4701_v26 = vld [vmem:[%s8933_s8 + $0x468] sm:$0xff] }
 0xa1d   :  { %3172 = vmatpush.msrb.mxu3 %v4652_v39  ;;  %v4704_v39 = vld [vmem:[%s8933_s8 + $0x440] sm:$0xff] }
 0xa1e   :  { %3154 = vmatpush.msrb.mxu2 %v4650_v41  ;;  %3194 = vmatpush.msra.mxu0 %v4651_v42  ;;  %v4702_v41 = vld [vmem:[%s8933_s8 + $0x450] sm:$0xff]  ;;  %v4703_v42 = vld [vmem:[%s8933_s8 + $0x458] sm:$0xff] }
 0xa1f   :  { %3173 = vmatpush.msrb.mxu3 %v4657_v47  ;;  %v4709_v47 = vld [vmem:[%s8933_s8 + $0x438] sm:$0xff] }
 0xa20   :  { %3155 = vmatpush.msrb.mxu2 %v4653_v43  ;;  %3195 = vmatpush.msra.mxu0 %v4654_v45  ;;  %v4705_v43 = vld [vmem:[%s8933_s8 + $0x448] sm:$0xff]  ;;  %v4706_v45 = vld [vmem:[%s8933_s8 + $0x530] sm:$0xff] }
 0xa21   :  { %3174 = vmatpush.msrb.mxu3 %v4660_v57  ;;  %v4712_v57 = vld [vmem:[%s8933_s8 + $0x420] sm:$0xff] }
 0xa22   :  { %3203 = vmatpush.msra.mxu2 %v4655_v60  ;;  %3227 = vmatpush.msrb.mxu0 %v4656_v53  ;;  %v4707_v60 = vld [vmem:[%s8933_s8 + $0x538] sm:$0xff]  ;;  %v4708_v53 = vld [vmem:[%s8933_s8 + $0x430] sm:$0xff] }
 0xa23   :  { %3175 = vmatpush.msrb.mxu3 %v4663_v2  ;;  %v4715_v2 = vld [vmem:[%s8933_s8 + $0x518] sm:$0xff] }
 0xa24   :  { %3204 = vmatpush.msra.mxu2 %v4658_v29  ;;  %3228 = vmatpush.msrb.mxu0 %v4659_v30  ;;  %v4710_v29 = vld [vmem:[%s8933_s8 + $0x520] sm:$0xff]  ;;  %v4711_v30 = vld [vmem:[%s8933_s8 + $0x528] sm:$0xff] }
 0xa25   :  { %3267 = vmatpush.msra.mxu3 %v4666_v55  ;;  %v4718_v55 = vld [vmem:[%s8933_s8 + $0x500] sm:$0xff] }
 0xa26   :  { %3205 = vmatpush.msra.mxu2 %v4661_v1  ;;  %3229 = vmatpush.msrb.mxu0 %v4662_v48  ;;  %v4713_v1 = vld [vmem:[%s8933_s8 + $0x428] sm:$0xff]  ;;  %v4714_v48 = vld [vmem:[%s8933_s8 + $0x510] sm:$0xff] }
 0xa27   :  { %3268 = vmatpush.msra.mxu3 %v4669_v24  ;;  %v4721_v24 = vld [vmem:[%s8933_s8 + $0x4f0] sm:$0xff] }
 0xa28   :  { %3206 = vmatpush.msra.mxu2 %v4664_v3  ;;  %3230 = vmatpush.msrb.mxu0 %v4665_v6  ;;  %v4716_v3 = vld [vmem:[%s8933_s8 + $0x410] sm:$0xff]  ;;  %v4717_v6 = vld [vmem:[%s8933_s8 + $0x418] sm:$0xff] }
 0xa29   :  { %3269 = vmatpush.msra.mxu3 %v4672_v38  ;;  %v4724_v38 = vld [vmem:[%s8933_s8 + $0x408] sm:$0xff] }
 0xa2a   :  { %3207 = vmatpush.msra.mxu2 %v4667_v7  ;;  %3231 = vmatpush.msrb.mxu0 %v4668_v10  ;;  %v4719_v7 = vld [vmem:[%s8933_s8 + $0x508] sm:$0xff] }
 0xa2b   :  { %3270 = vmatpush.msra.mxu3 %v4675_v13  ;;  %v4720_v10 = vld [vmem:[%s8935_s7 + $0x8] sm:$0x7]  ;;  %v4727_v13 = vld [vmem:[%s8933_s8 + $0x3f0] sm:$0xff] }
 0xa2c   :  { %3208 = vmatpush.msra.mxu2 %v4670_v11  ;;  %3232 = vmatpush.msrb.mxu0 %v4671_v59  ;;  %v4722_v11 = vld [vmem:[%s8933_s8 + $0x4f8] sm:$0xff]  ;;  %v4723_v59 = vld [vmem:[%s8933_s8 + $0x400] sm:$0xff] }
 0xa2d   :  { %3271 = vmatpush.msra.mxu3 %v4678_v16  ;;  %v4730_v16 = vld [vmem:[%s8933_s8 + $0x4d8] sm:$0xff] }
 0xa2e   :  { %3209 = vmatpush.msra.mxu2 %v4673_v50  ;;  %3233 = vmatpush.msrb.mxu0 %v4674_v51  ;;  %v4725_v50 = vld [vmem:[%s8933_s8 + $0x4e0] sm:$0xff]  ;;  %v4726_v51 = vld [vmem:[%s8933_s8 + $0x4e8] sm:$0xff] }
 0xa2f   :  { %3272 = vmatpush.msra.mxu3 %v4681_v49  ;;  %v4733_v49 = vld [vmem:[%s8933_s8 + $0x4c0] sm:$0xff] }
 0xa30   :  { %3210 = vmatpush.msra.mxu2 %v4676_v5  ;;  %3234 = vmatpush.msrb.mxu0 %v4677_v14  ;;  %v4728_v5 = vld [vmem:[%s8933_s8 + $0x3f8] sm:$0xff]  ;;  %v4729_v14 = vld [vmem:[%s8933_s8 + $0x4d0] sm:$0xff] }
 0xa31   :  { %3273 = vmatpush.msra.mxu3 %v4684_v19  ;;  %v4736_v19 = vld [vmem:[%s8933_s8 + $0x3d8] sm:$0xff] }
 0xa32   :  { %3211 = vmatpush.msra.mxu2 %v4679_v54  ;;  %3235 = vmatpush.msrb.mxu0 %v4680_v44  ;;  %v4731_v54 = vld [vmem:[%s8933_s8 + $0x3e0] sm:$0xff]  ;;  %v4732_v44 = vld [vmem:[%s8933_s8 + $0x3e8] sm:$0xff] }
 0xa33   :  { %3274 = vmatpush.msra.mxu3 %v4687_v56  ;;  %v4739_v56 = vld [vmem:[%s8933_s8 + $0x3c0] sm:$0xff] }
 0xa34   :  { %3212 = vmatpush.msra.mxu2 %v4682_v62  ;;  %3236 = vmatpush.msrb.mxu0 %v4683_v17  ;;  %v4734_v62 = vld [vmem:[%s8933_s8 + $0x4c8] sm:$0xff]  ;;  %v4735_v17 = vld [vmem:[%s8933_s8 + $0x3d0] sm:$0xff] }
 0xa35   :  { %3275 = vmatpush.msra.mxu3 %v4690_v4  ;;  %v4742_v4 = vld [vmem:[%s8933_s8 + $0x4a8] sm:$0xff] }
 0xa36   :  { %3213 = vmatpush.msra.mxu2 %v4685_v20  ;;  %3237 = vmatpush.msrb.mxu0 %v4686_v63  ;;  %v4737_v20 = vld [vmem:[%s8933_s8 + $0x4b0] sm:$0xff]  ;;  %v4738_v63 = vld [vmem:[%s8933_s8 + $0x4b8] sm:$0xff] }
 0xa37   :  { %3276 = vmatpush.msra.mxu3 %v4692_v36  ;;  %v4744_v36 = vld [vmem:[%s8933_s8 + $0x3b8] sm:$0xff] }
 0xa38   :  { %3214 = vmatpush.msra.mxu2 %v4688_v21  ;;  %3238 = vmatpush.msrb.mxu0 %v4689_v22  ;;  %v4740_v21 = vld [vmem:[%s8933_s8 + $0x3c8] sm:$0xff]  ;;  %v4741_v22 = vld [vmem:[%s8933_s8 + $0x4a0] sm:$0xff] }
 0xa39   :  { %3277 = vmatpush.msra.mxu3 %v4694_v0  ;;  %v4746_v0 = vld [vmem:[%s8933_s8 + $0x498] sm:$0xff] }
 0xa3a   :  { %3215 = vmatpush.msra.mxu2 %v4691_v23  ;;  %v4743_v23 = vld [vmem:[%s8933_s8 + $0x3b0] sm:$0xff] }
 0xa3b   :  { %3278 = vmatpush.msra.mxu3 %v4696_v27  ;;  %v4748_v27 = vld [vmem:[%s8933_s8 + $0x3a8] sm:$0xff] }
 0xa3c   :  { %3216 = vmatpush.msra.mxu2 %v4693_v9  ;;  %v4745_v9 = vld [vmem:[%s8933_s8 + $0x490] sm:$0xff] }
 0xa3e   :  { %3217 = vmatpush.msra.mxu2 %v4695_v25  ;;  %v4747_v25 = vld [vmem:[%s8933_s8 + $0x3a0] sm:$0xff] }
 0xa40   :  { %3218 = vmatpush.msra.mxu2 %v4697_v28  ;;  %v4749_v28 = vld [vmem:[%s8933_s8 + $0x480] sm:$0xff] }
 0xa80   :  { %v3054_v31 = vpop.f32.mrf.mxu0 }
 0xa86   :  { %v3094_v32 = vpop.f32.mrf.mxu3 }
 0xa87   :  { %3136 = vmatmul.f32.vlgmr.msrb.gmra.mxu1 %v3094_v32  ;;  %3176 = vmatmul.f32.vlgmr.msrb.gmra.mxu3 %v3094_v32  ;;  %v4751_v32 = vld [vmem:[%s8933_s8 + $0x390] sm:$0xff] }
 0xa88   :  { %v3114_v33 = vpop.f32.mrf.mxu0  ;;  %3326 = vmatpush.msrb.mxu3 %v4698_v34  ;;  %3366 = vmatpush.msrb.mxu1 %v4699_v35  ;;  %v4753_v34 = vld [vmem:[%s8933_s8 + $0x380] sm:$0xff]  ;;  %v4756_v35 = vld [vmem:[%s8933_s8 + $0x638] sm:$0xff] }
 0xa89   :  { %4266 = vmatmul.msk.f32.vlgmr.msrb.gmra.mxu2 %vm677_vm5, %v3114_v33  ;;  %4267 = vmatmul.msk.f32.vlgmr.msra.gmra.mxu0 %vm677_vm5, %v3114_v33  ;;  %v4752_v33 = vld [vmem:[%s8933_s8 + $0x398] sm:$0xff] }
 0xa8a   :  { %4270 = vmatpush.msk.msra.mxu0 %vm1233_vm6, %v8057_v58  ;;  %4272 = vmatpush.msk.msrb.mxu2 %vm1233_vm6, %v8076_v52 }
 0xa8b   :  { %3327 = vmatpush.msrb.mxu3 %v4700_v37  ;;  %3367 = vmatpush.msrb.mxu1 %v4701_v26  ;;  %v4757_v37 = vld [vmem:[%s8933_s8 + $0x620] sm:$0xff]  ;;  %v4758_v26 = vld [vmem:[%s8933_s8 + $0x628] sm:$0xff] }
 0xa8c   :  { %v3074_v40 = vpop.f32.mrf.mxu2 }
 0xa8d   :  { %3328 = vmatpush.msrb.mxu3 %v4702_v41  ;;  %3368 = vmatpush.msrb.mxu1 %v4703_v42  ;;  %v4760_v41 = vld [vmem:[%s8933_s8 + $0x618] sm:$0xff]  ;;  %v4761_v42 = vld [vmem:[%s8933_s8 + $0x600] sm:$0xff] }
 0xa8f   :  { %3259 = vmatmul.f32.vlgmr.msra.gmra.mxu1 %v3054_v31  ;;  %4269 = vmatmul.msk.f32.vlgmr.msra.gmra.mxu3 %vm677_vm5, %v3074_v40 }
 0xa90   :  { %3329 = vmatpush.msrb.mxu3 %v4704_v39  ;;  %3369 = vmatpush.msrb.mxu1 %v4705_v43  ;;  %v4762_v39 = vld [vmem:[%s8933_s8 + $0x608] sm:$0xff]  ;;  %v4763_v43 = vld [vmem:[%s8933_s8 + $0x5f0] sm:$0xff] }
 0xa91   :  { %3219 = vmatmul.f32.vlgmr.msra.gmra.mxu2 %v3054_v31  ;;  %4268 = vmatmul.msk.f32.vlgmr.msrb.gmra.mxu0 %vm677_vm5, %v3074_v40  ;;  %v4750_v31 = vld [vmem:[%s8933_s8 + $0x488] sm:$0xff]  ;;  %v4759_v40 = vld [vmem:[%s8933_s8 + $0x610] sm:$0xff] }
 0xa92   :  { %3350 = vmatpush.msrb.mxu0 %v4706_v45  ;;  %3390 = vmatpush.msra.mxu2 %v4707_v60  ;;  %v4764_v45 = vld [vmem:[%s8933_s8 + $0x5f8] sm:$0xff]  ;;  %v4765_v60 = vld [vmem:[%s8933_s8 + $0x5e0] sm:$0xff] }
 0xa93   :  { %3330 = vmatpush.msrb.mxu3 %v4708_v53  ;;  %3370 = vmatpush.msrb.mxu1 %v4709_v47  ;;  %v4766_v53 = vld [vmem:[%s8933_s8 + $0x5e8] sm:$0xff]  ;;  %v4767_v47 = vld [vmem:[%s8933_s8 + $0x5d0] sm:$0xff] }
 0xa94   :  { %3351 = vmatpush.msrb.mxu0 %v4710_v29  ;;  %3391 = vmatpush.msra.mxu2 %v4711_v30  ;;  %v4768_v29 = vld [vmem:[%s8933_s8 + $0x5d8] sm:$0xff]  ;;  %v4769_v30 = vld [vmem:[%s8933_s8 + $0x5c0] sm:$0xff] }
 0xa95   :  { %3331 = vmatpush.msrb.mxu3 %v4712_v57  ;;  %3371 = vmatpush.msrb.mxu1 %v4713_v1  ;;  %v4770_v57 = vld [vmem:[%s8933_s8 + $0x5c8] sm:$0xff]  ;;  %v4771_v1 = vld [vmem:[%s8933_s8 + $0x5b0] sm:$0xff] }
 0xa96   :  { %3352 = vmatpush.msrb.mxu0 %v4714_v48  ;;  %3392 = vmatpush.msra.mxu2 %v4715_v2  ;;  %v4772_v48 = vld [vmem:[%s8933_s8 + $0x5b8] sm:$0xff]  ;;  %v4773_v2 = vld [vmem:[%s8933_s8 + $0x5a0] sm:$0xff] }
 0xa97   :  { %3332 = vmatpush.msrb.mxu3 %v4716_v3  ;;  %3372 = vmatpush.msrb.mxu1 %v4717_v6  ;;  %v4774_v3 = vld [vmem:[%s8933_s8 + $0x5a8] sm:$0xff]  ;;  %v4775_v6 = vld [vmem:[%s8933_s8 + $0x590] sm:$0xff] }
 0xa98   :  { %3353 = vmatpush.msrb.mxu0 %v4718_v55  ;;  %3393 = vmatpush.msra.mxu2 %v4719_v7  ;;  %v4776_v55 = vld [vmem:[%s8933_s8 + $0x598] sm:$0xff]  ;;  %v4777_v7 = vld [vmem:[%s8933_s8 + $0x580] sm:$0xff] }
 0xa99   :  { %4271 = vmatmul.msk.f32.vlgmr.msra.gmra.mxu0 %vm1229_vm7, %v4720_v10  ;;  %4273 = vmatmul.msk.f32.vlgmr.msrb.gmra.mxu2 %vm1229_vm7, %v4720_v10  ;;  %v4778_v10 = vld [vmem:[%s8933_s8 + $0x588] sm:$0xff] }
 0xa9a   :  { %3354 = vmatpush.msrb.mxu0 %v4721_v24  ;;  %3394 = vmatpush.msra.mxu2 %v4722_v11  ;;  %v4779_v24 = vld [vmem:[%s8933_s8 + $0x570] sm:$0xff]  ;;  %v4780_v11 = vld [vmem:[%s8933_s8 + $0x578] sm:$0xff] }
 0xa9b   :  { %3333 = vmatpush.msrb.mxu3 %v4723_v59  ;;  %3373 = vmatpush.msrb.mxu1 %v4724_v38  ;;  %v4781_v59 = vld [vmem:[%s8933_s8 + $0x560] sm:$0xff]  ;;  %v4782_v38 = vld [vmem:[%s8933_s8 + $0x568] sm:$0xff] }
 0xa9c   :  { %3355 = vmatpush.msrb.mxu0 %v4725_v50  ;;  %3395 = vmatpush.msra.mxu2 %v4726_v51  ;;  %v4783_v50 = vld [vmem:[%s8933_s8 + $0x550] sm:$0xff]  ;;  %v4784_v51 = vld [vmem:[%s8933_s8 + $0x558] sm:$0xff] }
 0xa9d   :  { %3334 = vmatpush.msrb.mxu3 %v4727_v13  ;;  %3374 = vmatpush.msrb.mxu1 %v4728_v5  ;;  %v4785_v13 = vld [vmem:[%s8933_s8 + $0x540] sm:$0xff]  ;;  %v4786_v5 = vld [vmem:[%s8933_s8 + $0x548] sm:$0xff] }
 0xa9e   :  { %3356 = vmatpush.msrb.mxu0 %v4729_v14  ;;  %3396 = vmatpush.msra.mxu2 %v4730_v16 }
 0xa9f   :  { %3335 = vmatpush.msrb.mxu3 %v4731_v54  ;;  %3375 = vmatpush.msrb.mxu1 %v4732_v44 }
 0xaa0   :  { %3357 = vmatpush.msrb.mxu0 %v4733_v49  ;;  %3397 = vmatpush.msra.mxu2 %v4734_v62 }
 0xaa1   :  { %3336 = vmatpush.msrb.mxu3 %v4735_v17  ;;  %3376 = vmatpush.msrb.mxu1 %v4736_v19 }
 0xaa2   :  { %3358 = vmatpush.msrb.mxu0 %v4737_v20  ;;  %3398 = vmatpush.msra.mxu2 %v4738_v63  ;;  %v4787_v63 = vld [vmem:[%s8936_s10 + $0x138] sm:$0xff] }
 0xaa3   :  { %3337 = vmatpush.msrb.mxu3 %v4739_v56  ;;  %3377 = vmatpush.msrb.mxu1 %v4740_v21  ;;  %v4788_v56 = vld [vmem:[%s8936_s10 + $0x178] sm:$0xff]  ;;  %v4789_v21 = vld [vmem:[%s8936_s10 + $0x130] sm:$0xff] }
 0xaa4   :  { %3359 = vmatpush.msrb.mxu0 %v4741_v22  ;;  %3399 = vmatpush.msra.mxu2 %v4742_v4  ;;  %v4790_v22 = vld [vmem:[%s8936_s10 + $0x170] sm:$0xff] }
 0xaa5   :  { %3338 = vmatpush.msrb.mxu3 %v4743_v23  ;;  %3378 = vmatpush.msrb.mxu1 %v4744_v36  ;;  %v4791_v23 = vld [vmem:[%s8936_s10 + $0x128] sm:$0xff] }
 0xaa6   :  { %3360 = vmatpush.msrb.mxu0 %v4745_v9  ;;  %3400 = vmatpush.msra.mxu2 %v4746_v0  ;;  %v4792_v36 = vld [vmem:[%s8936_s10 + $0x168] sm:$0xff]  ;;  %v4793_v9 = vld [vmem:[%s8933_s8 + $0x6f0] sm:$0xff]  ;;  %v4794_v0 = vld [vmem:[%s8933_s8 + $0x6f8] sm:$0xff] }
 0xaa7   :  { %3339 = vmatpush.msrb.mxu3 %v4747_v25  ;;  %3379 = vmatpush.msrb.mxu1 %v4748_v27  ;;  %v4795_v25 = vld [vmem:[%s8936_s10 + $0x120] sm:$0xff] }
 0xaa8   :  { %3361 = vmatpush.msrb.mxu0 %v4749_v28  ;;  %3401 = vmatpush.msra.mxu2 %v4750_v31  ;;  %v4796_v27 = vld [vmem:[%s8936_s10 + $0x160] sm:$0xff]  ;;  %v4798_v31 = vld [vmem:[%s8933_s8 + $0x6e8] sm:$0xff] }
 0xaa9   :  { %3340 = vmatpush.msrb.mxu3 %v4751_v32  ;;  %3380 = vmatpush.msrb.mxu1 %v4752_v33  ;;  %v4797_v28 = vld [vmem:[%s8933_s8 + $0x6e0] sm:$0xff]  ;;  %v4799_v32 = vld [vmem:[%s8936_s10 + $0x118] sm:$0xff] }
 0xaaa   :  { %4276 = vmatpush.msk.msra.mxu0 %vm1233_vm6, %v8057_v58  ;;  %4278 = vmatpush.msk.msrb.mxu2 %vm1233_vm6, %v8076_v52  ;;  %v4754_v58 = vld [vmem:[%s8933_s8 + $0x388] sm:$0xff]  ;;  %v4755_v52 = vld [vmem:[%s8933_s8 + $0x630] sm:$0xff]  ;;  %v4800_v33 = vld [vmem:[%s8936_s10 + $0x158] sm:$0xff] }
 0xaab   :  { %3341 = vmatpush.msrb.mxu3 %v4753_v34  ;;  %3381 = vmatpush.msrb.mxu1 %v4754_v58  ;;  %v4801_v34 = vld [vmem:[%s8933_s8 + $0x6d0] sm:$0xff]  ;;  %v4802_v58 = vld [vmem:[%s8933_s8 + $0x6d8] sm:$0xff] }
 0xaad   :  { %3451 = vmatpush.msra.mxu3 %v4755_v52  ;;  %3491 = vmatpush.msra.mxu1 %v4756_v35  ;;  %v4803_v52 = vld [vmem:[%s8936_s10 + $0x110] sm:$0xff] }
 0xaae   :  { %v4804_v35 = vld [vmem:[%s8936_s10 + $0x150] sm:$0xff] }
 0xaaf   :  { %3452 = vmatpush.msra.mxu3 %v4757_v37  ;;  %3492 = vmatpush.msra.mxu1 %v4758_v26  ;;  %v4805_v37 = vld [vmem:[%s8933_s8 + $0x6c0] sm:$0xff]  ;;  %v4806_v26 = vld [vmem:[%s8933_s8 + $0x6c8] sm:$0xff] }
 0xab1   :  { %3453 = vmatpush.msra.mxu3 %v4759_v40  ;;  %3493 = vmatpush.msra.mxu1 %v4760_v41  ;;  %v4807_v40 = vld [vmem:[%s8935_s7 + $0xc] sm:$0x7]  ;;  %v4808_v41 = vld [vmem:[%s8933_s8 + $0x6b0] sm:$0xff] }
 0xab3   :  { %3454 = vmatpush.msra.mxu3 %v4761_v42  ;;  %3494 = vmatpush.msra.mxu1 %v4762_v39  ;;  %v4809_v42 = vld [vmem:[%s8933_s8 + $0x6b8] sm:$0xff]  ;;  %v4810_v39 = vld [vmem:[%s8936_s10 + $0x108] sm:$0xff] }
 0xab5   :  { %3455 = vmatpush.msra.mxu3 %v4763_v43  ;;  %3495 = vmatpush.msra.mxu1 %v4764_v45  ;;  %v4811_v43 = vld [vmem:[%s8936_s10 + $0x148] sm:$0xff]  ;;  %v4812_v45 = vld [vmem:[%s8933_s8 + $0x6a0] sm:$0xff] }
 0xab7   :  { %3456 = vmatpush.msra.mxu3 %v4765_v60  ;;  %3496 = vmatpush.msra.mxu1 %v4766_v53  ;;  %v4813_v60 = vld [vmem:[%s8933_s8 + $0x6a8] sm:$0xff]  ;;  %v4814_v53 = vld [vmem:[%s8936_s10 + $0x100] sm:$0xff] }
 0xab9   :  { %3457 = vmatpush.msra.mxu3 %v4767_v47  ;;  %3497 = vmatpush.msra.mxu1 %v4768_v29  ;;  %v4815_v47 = vld [vmem:[%s8936_s10 + $0x140] sm:$0xff]  ;;  %v4816_v29 = vld [vmem:[%s8933_s8 + $0x690] sm:$0xff] }
 0xabb   :  { %3458 = vmatpush.msra.mxu3 %v4769_v30  ;;  %3498 = vmatpush.msra.mxu1 %v4770_v57  ;;  %v4817_v30 = vld [vmem:[%s8933_s8 + $0x698] sm:$0xff] }
 0xabc   :  { %v4818_v57 = vld [vmem:[%s8936_s10 + $0xf8] sm:$0xff] }
 0xabd   :  { %3459 = vmatpush.msra.mxu3 %v4771_v1  ;;  %3499 = vmatpush.msra.mxu1 %v4772_v48  ;;  %v4819_v1 = vld [vmem:[%s8933_s8 + $0x680] sm:$0xff]  ;;  %v4820_v48 = vld [vmem:[%s8933_s8 + $0x688] sm:$0xff] }
 0xabf   :  { %3460 = vmatpush.msra.mxu3 %v4773_v2  ;;  %3500 = vmatpush.msra.mxu1 %v4774_v3  ;;  %v4821_v2 = vld [vmem:[%s8936_s10 + $0xf0] sm:$0xff] }
 0xac0   :  { %v4822_v3 = vld [vmem:[%s8933_s8 + $0x670] sm:$0xff] }
 0xac1   :  { %3461 = vmatpush.msra.mxu3 %v4775_v6  ;;  %3501 = vmatpush.msra.mxu1 %v4776_v55  ;;  %v4823_v6 = vld [vmem:[%s8933_s8 + $0x678] sm:$0xff]  ;;  %v4824_v55 = vld [vmem:[%s8936_s10 + $0xe8] sm:$0xff] }
 0xac3   :  { %3462 = vmatpush.msra.mxu3 %v4777_v7  ;;  %3502 = vmatpush.msra.mxu1 %v4778_v10  ;;  %v4825_v7 = vld [vmem:[%s8933_s8 + $0x660] sm:$0xff]  ;;  %v4826_v10 = vld [vmem:[%s8933_s8 + $0x668] sm:$0xff] }
 0xac5   :  { %3463 = vmatpush.msra.mxu3 %v4779_v24  ;;  %3503 = vmatpush.msra.mxu1 %v4780_v11  ;;  %v4827_v24 = vld [vmem:[%s8936_s10 + $0xe0] sm:$0xff]  ;;  %v4828_v11 = vld [vmem:[%s8933_s8 + $0x650] sm:$0xff] }
 0xac7   :  { %3464 = vmatpush.msra.mxu3 %v4781_v59  ;;  %3504 = vmatpush.msra.mxu1 %v4782_v38  ;;  %v4829_v59 = vld [vmem:[%s8933_s8 + $0x658] sm:$0xff] }
 0xac8   :  { %v4830_v38 = vld [vmem:[%s8936_s10 + $0xd8] sm:$0xff] }
 0xac9   :  { %3465 = vmatpush.msra.mxu3 %v4783_v50  ;;  %3505 = vmatpush.msra.mxu1 %v4784_v51  ;;  %v4831_v50 = vld [vmem:[%s8933_s8 + $0x640] sm:$0xff]  ;;  %v4832_v51 = vld [vmem:[%s8933_s8 + $0x648] sm:$0xff] }
 0xacb   :  { %3466 = vmatpush.msra.mxu3 %v4785_v13  ;;  %3506 = vmatpush.msra.mxu1 %v4786_v5  ;;  %v4833_v13 = vld [vmem:[%s8936_s10 + $0xb8] sm:$0xff] }
 0xacc   :  { %v4834_v5 = vld [vmem:[%s8936_s10 + $0x78] sm:$0xff] }
 0xb04   :  { %v3137_v44 = vpop.f32.mrf.mxu1 }
 0xb06   :  { %v8602_v14 = vpop.f32.mrf.mxu0 }
 0xb0c   :  { %v3157_v16 = vpop.f32.mrf.mxu2 }
 0xb0d   :  { %v3158_v49 = vadd.f32 %v3157_v16, %v3137_v44  ;;  %v4835_v16 = vld [vmem:[%s8936_s10 + $0xd0] sm:$0xff] }
 0xb0e   :  { %v3240_v54 = vpop.f32.mrf.mxu0  ;;  %v4837_v44 = vld [vmem:[%s8936_s10 + $0x70] sm:$0xff] }
 0xb14   :  { %v3220_v62 = vpop.f32.mrf.mxu2 }
 0xb15   :  { %v3221_v17 = vadd.f32 %v3220_v62, %v3158_v49  ;;  %v4838_v49 = vld [vmem:[%s8936_s10 + $0xc8] sm:$0xff] }
 0xb16   :  { %v3300_v19 = vpop.f32.mrf.mxu0  ;;  %v4839_v62 = vld [vmem:[%s8936_s10 + $0xa8] sm:$0xff] }
 0xb17   :  { %v8604_v20 = vadd.f32 %v3240_v54, %v3221_v17  ;;  %3342 = vmatmul.f32.vlgmr.msrb.gmra.mxu3 %v3300_v19  ;;  %3382 = vmatmul.f32.vlgmr.msrb.gmra.mxu1 %v3300_v19  ;;  %v4836_v54 = vld [vmem:[%s8936_s10 + $0xb0] sm:$0xff]  ;;  %v4840_v17 = vld [vmem:[%s8936_s10 + $0x68] sm:$0xff]  ;;  %v4841_v19 = vld [vmem:[%s8936_s10 + $0xc0] sm:$0xff] }
 0xb18   :  { %3587 = vmatpush.msrb.mxu3 %v4787_v63  ;;  %3615 = vmatpush.msrb.mxu1 %v4788_v56  ;;  %v4842_v63 = vld [vmem:[%s8936_s10 + $0xa0] sm:$0xff] }
 0xb19   :  { %v4843_v56 = vld [vmem:[%s8936_s10 + $0x60] sm:$0xff] }
 0xb1a   :  { %3588 = vmatpush.msrb.mxu3 %v4789_v21  ;;  %3616 = vmatpush.msrb.mxu1 %v4790_v22  ;;  %v4844_v21 = vld [vmem:[%s8936_s10 + $0x98] sm:$0xff] }
 0xb1b   :  { %v4845_v22 = vld [vmem:[%s8936_s10 + $0x58] sm:$0xff] }
 0xb1c   :  { %v3320_v4 = vpop.f32.mrf.mxu2  ;;  %3589 = vmatpush.msrb.mxu3 %v4791_v23  ;;  %3617 = vmatpush.msrb.mxu1 %v4792_v36  ;;  %v4847_v23 = vld [vmem:[%s8936_s10 + $0x50] sm:$0xff]  ;;  %v4848_v36 = vld [vmem:[%s8936_s10 + $0x88] sm:$0xff] }
 0xb1d   :  { %4274 = vmatmul.msk.f32.vlgmr.msrb.gmra.mxu0 %vm677_vm5, %v3320_v4  ;;  %4275 = vmatmul.msk.f32.vlgmr.msra.gmra.mxu2 %vm677_vm5, %v3320_v4  ;;  %v4846_v4 = vld [vmem:[%s8936_s10 + $0x90] sm:$0xff] }
 0xb1e   :  { %3475 = vmatpush.msrb.mxu0 %v4793_v9  ;;  %3515 = vmatpush.msra.mxu2 %v4794_v0  ;;  %v4849_v9 = vld [vmem:[%s8936_s10 + $0x48] sm:$0xff]  ;;  %v4850_v0 = vld [vmem:[%s8936_s10 + $0x80] sm:$0xff] }
 0xb1f   :  { %3590 = vmatpush.msrb.mxu3 %v4795_v25  ;;  %3618 = vmatpush.msrb.mxu1 %v4796_v27  ;;  %v4851_v25 = vld [vmem:[%s8936_s10 + $0x40] sm:$0xff]  ;;  %v4852_v27 = vld [vmem:[%s8936_s10 + $0x38] sm:$0xff] }
 0xb20   :  { %3476 = vmatpush.msrb.mxu0 %v4797_v28  ;;  %3516 = vmatpush.msra.mxu2 %v4798_v31  ;;  %v4853_v28 = vld [vmem:[%s8936_s10 + $0x30] sm:$0xff]  ;;  %v4854_v31 = vld [vmem:[%s8936_s10 + $0x28] sm:$0xff] }
 0xb21   :  { %3591 = vmatpush.msrb.mxu3 %v4799_v32  ;;  %3619 = vmatpush.msrb.mxu1 %v4800_v33  ;;  %v4855_v32 = vld [vmem:[%s8936_s10 + $0x20] sm:$0xff]  ;;  %v4856_v33 = vld [vmem:[%s8936_s10 + $0x18] sm:$0xff] }
 0xb22   :  { %3477 = vmatpush.msrb.mxu0 %v4801_v34  ;;  %3517 = vmatpush.msra.mxu2 %v4802_v58  ;;  %v4857_v34 = vld [vmem:[%s8936_s10 + $0x10] sm:$0xff]  ;;  %v4858_v58 = vld [vmem:[%s8936_s10 + $0x8] sm:$0xff] }
 0xb23   :  { %3592 = vmatpush.msrb.mxu3 %v4803_v52  ;;  %3620 = vmatpush.msrb.mxu1 %v4804_v35  ;;  %v4859_v52 = vld [vmem:[%s8936_s10] sm:$0xff]  ;;  %v3177_v35 = vpop.f32.mrf.mxu3 }
 0xb24   :  { %3478 = vmatpush.msrb.mxu0 %v4805_v37  ;;  %3518 = vmatpush.msra.mxu2 %v4806_v26  ;;  %v3260_v26 = vpop.f32.mrf.mxu1 }
 0xb25   :  { %4277 = vmatmul.msk.f32.vlgmr.msra.gmra.mxu0 %vm1229_vm7, %v4807_v40  ;;  %4279 = vmatmul.msk.f32.vlgmr.msrb.gmra.mxu2 %vm1229_vm7, %v4807_v40 }
 0xb26   :  { %3479 = vmatpush.msrb.mxu0 %v4808_v41  ;;  %3519 = vmatpush.msra.mxu2 %v4809_v42  ;;  %v3198_v42 = vadd.f32 %v8602_v14, %v3177_v35  ;;  %v4861_v14 = vld [vmem:[%s8936_s10 + $0x230] sm:$0xff] }
 0xb27   :  { %3593 = vmatpush.msrb.mxu3 %v4810_v39  ;;  %3621 = vmatpush.msrb.mxu1 %v4811_v43 }
 0xb28   :  { %3480 = vmatpush.msrb.mxu0 %v4812_v45  ;;  %3520 = vmatpush.msra.mxu2 %v4813_v60  ;;  %v3261_v60 = vadd.f32 %v3260_v26, %v3198_v42 }
 0xb29   :  { %3594 = vmatpush.msrb.mxu3 %v4814_v53  ;;  %3622 = vmatpush.msrb.mxu1 %v4815_v47 }
 0xb2a   :  { %3481 = vmatpush.msrb.mxu0 %v4816_v29  ;;  %3521 = vmatpush.msra.mxu2 %v4817_v30 }
 0xb2b   :  { %3595 = vmatpush.msrb.mxu3 %v4818_v57  ;;  %v3280_v37 = vpop.f32.mrf.mxu3 }
 0xb2c   :  { %3482 = vmatpush.msrb.mxu0 %v4819_v1  ;;  %3522 = vmatpush.msra.mxu2 %v4820_v48  ;;  %v3281_v47 = vadd.f32 %v3280_v37, %v3261_v60  ;;  %v4860_v1 = vld [vmem:[%s8936_s10 + $0x238] sm:$0xff]  ;;  %v4862_v48 = vld [vmem:[%s8936_s10 + $0x228] sm:$0xff] }
 0xb2d   :  { %3596 = vmatpush.msrb.mxu3 %v4821_v2  ;;  %v4863_v2 = vld [vmem:[%s8936_s10 + $0x1f8] sm:$0xff] }
 0xb2e   :  { %3483 = vmatpush.msrb.mxu0 %v4822_v3  ;;  %3523 = vmatpush.msra.mxu2 %v4823_v6  ;;  %v4864_v3 = vld [vmem:[%s8936_s10 + $0x220] sm:$0xff]  ;;  %v4865_v6 = vld [vmem:[%s8936_s10 + $0x1f0] sm:$0xff] }
 0xb2f   :  { %3597 = vmatpush.msrb.mxu3 %v4824_v55  ;;  %v4866_v55 = vld [vmem:[%s8936_s10 + $0x218] sm:$0xff] }
 0xb30   :  { %3484 = vmatpush.msrb.mxu0 %v4825_v7  ;;  %3524 = vmatpush.msra.mxu2 %v4826_v10  ;;  %v4867_v7 = vld [vmem:[%s8936_s10 + $0x1e8] sm:$0xff]  ;;  %v4868_v10 = vld [vmem:[%s8936_s10 + $0x210] sm:$0xff] }
 0xb31   :  { %3598 = vmatpush.msrb.mxu3 %v4827_v24  ;;  %v4869_v24 = vld [vmem:[%s8936_s10 + $0x1e0] sm:$0xff] }
 0xb32   :  { %3485 = vmatpush.msrb.mxu0 %v4828_v11  ;;  %3525 = vmatpush.msra.mxu2 %v4829_v59  ;;  %v4870_v11 = vld [vmem:[%s8936_s10 + $0x208] sm:$0xff]  ;;  %v4871_v59 = vld [vmem:[%s8936_s10 + $0x1d8] sm:$0xff] }
 0xb33   :  { %3599 = vmatpush.msrb.mxu3 %v4830_v38  ;;  %v4872_v38 = vld [vmem:[%s8936_s10 + $0x200] sm:$0xff] }
 0xb34   :  { %3486 = vmatpush.msrb.mxu0 %v4831_v50  ;;  %3526 = vmatpush.msra.mxu2 %v4832_v51  ;;  %v4873_v50 = vld [vmem:[%s8936_s10 + $0x1d0] sm:$0xff]  ;;  %v4874_v51 = vld [vmem:[%s8936_s10 + $0x1c8] sm:$0xff] }
 0xb35   :  { %3600 = vmatpush.msrb.mxu3 %v4835_v16  ;;  %v4877_v16 = vld [vmem:[%s8936_s10 + $0x1b0] sm:$0xff] }
 0xb36   :  { %3568 = vmatpush.msrb.mxu2 %v4833_v13  ;;  %3540 = vmatpush.msra.mxu0 %v4834_v5  ;;  %v4875_v13 = vld [vmem:[%s8936_s10 + $0x1c0] sm:$0xff]  ;;  %v4876_v5 = vld [vmem:[%s8936_s10 + $0x1b8] sm:$0xff] }
 0xb37   :  { %3601 = vmatpush.msrb.mxu3 %v4838_v49  ;;  %v4880_v49 = vld [vmem:[%s8936_s10 + $0x198] sm:$0xff] }
 0xb38   :  { %3569 = vmatpush.msrb.mxu2 %v4836_v54  ;;  %3541 = vmatpush.msra.mxu0 %v4837_v44  ;;  %v4878_v54 = vld [vmem:[%s8936_s10 + $0x1a8] sm:$0xff]  ;;  %v4879_v44 = vld [vmem:[%s8936_s10 + $0x1a0] sm:$0xff] }
 0xb39   :  { %3602 = vmatpush.msrb.mxu3 %v4841_v19  ;;  %v4883_v19 = vld [vmem:[%s8936_s10 + $0x180] sm:$0xff] }
 0xb3a   :  { %3570 = vmatpush.msrb.mxu2 %v4839_v62  ;;  %3542 = vmatpush.msra.mxu0 %v4840_v17  ;;  %v4881_v62 = vld [vmem:[%s8936_s10 + $0x190] sm:$0xff]  ;;  %v4882_v17 = vld [vmem:[%s8936_s10 + $0x188] sm:$0xff] }
 0xb3c   :  { %3571 = vmatpush.msrb.mxu2 %v4842_v63  ;;  %3543 = vmatpush.msra.mxu0 %v4843_v56 }
 0xb3e   :  { %3572 = vmatpush.msrb.mxu2 %v4844_v21  ;;  %3544 = vmatpush.msra.mxu0 %v4845_v22 }
 0xb40   :  { %3573 = vmatpush.msrb.mxu2 %v4846_v4  ;;  %3545 = vmatpush.msra.mxu0 %v4847_v23 }
 0xb42   :  { %3574 = vmatpush.msrb.mxu2 %v4848_v36  ;;  %3546 = vmatpush.msra.mxu0 %v4849_v9 }
 0xb44   :  { %3575 = vmatpush.msrb.mxu2 %v4850_v0  ;;  %3547 = vmatpush.msra.mxu0 %v4851_v25 }
 0xb46   :  { %3548 = vmatpush.msra.mxu0 %v4852_v27 }
 0xb48   :  { %3549 = vmatpush.msra.mxu0 %v4853_v28 }
 0xb4a   :  { %3550 = vmatpush.msra.mxu0 %v4854_v31 }
 0xb4c   :  { %3551 = vmatpush.msra.mxu0 %v4855_v32 }
 0xb4e   :  { %3552 = vmatpush.msra.mxu0 %v4856_v33 }
 0xb50   :  { %3553 = vmatpush.msra.mxu0 %v4857_v34 }
 0xb52   :  { %3554 = vmatpush.msra.mxu0 %v4858_v58 }
 0xb54   :  { %3555 = vmatpush.msra.mxu0 %v4859_v52 }
 0xb94   :  { %v3383_v45 = vpop.f32.mrf.mxu1 }
 0xb9a   :  { %v3343_v40 = vpop.f32.mrf.mxu3  ;;  %v3363_v41 = vpop.f32.mrf.mxu0 }
 0xb9b   :  { %v3364_v39 = vadd.f32 %v3363_v41, %v3343_v40 }
 0xb9d   :  { %v8831_v43 = vadd.f32 %v3364_v39, %v8604_v20 }
 0xba0   :  { %v3403_v53 = vpop.f32.mrf.mxu2 }
 0xba1   :  { %v3404_v29 = vadd.f32 %v3403_v53, %v3383_v45 }
 0xba2   :  { %v3425_v30 = vpop.f32.mrf.mxu0 }
 0xba3   :  { %v8833_v57 = vadd.f32 %v3404_v29, %v3281_v47  ;;  %3467 = vmatmul.f32.vlgmr.msra.gmra.mxu3 %v3425_v30  ;;  %3507 = vmatmul.f32.vlgmr.msra.gmra.mxu1 %v3425_v30 }
 0xba4   :  { %3661 = vmatpush.msra.mxu1 %v4860_v1 }
 0xba6   :  { %3662 = vmatpush.msra.mxu1 %v4861_v14 }
 0xba8   :  { %v3445_v20 = vpop.f32.mrf.mxu2  ;;  %3663 = vmatpush.msra.mxu1 %v4862_v48 }
 0xba9   :  { %4280 = vmatmul.msk.f32.vlgmr.msrb.gmra.mxu0 %vm677_vm5, %v3445_v20  ;;  %4281 = vmatmul.msk.f32.vlgmr.msra.gmra.mxu2 %vm677_vm5, %v3445_v20 }
 0xbaa   :  { %3633 = vmatpush.msra.mxu2 %v4863_v2  ;;  %3664 = vmatpush.msra.mxu1 %v4864_v3 }
 0xbac   :  { %3634 = vmatpush.msra.mxu2 %v4865_v6  ;;  %3665 = vmatpush.msra.mxu1 %v4866_v55 }
 0xbae   :  { %3635 = vmatpush.msra.mxu2 %v4867_v7  ;;  %3666 = vmatpush.msra.mxu1 %v4868_v10 }
 0xbb0   :  { %3636 = vmatpush.msra.mxu2 %v4869_v24  ;;  %3667 = vmatpush.msra.mxu1 %v4870_v11 }
 0xbb2   :  { %3637 = vmatpush.msra.mxu2 %v4871_v59  ;;  %3668 = vmatpush.msra.mxu1 %v4872_v38 }
 0xbb4   :  { %3638 = vmatpush.msra.mxu2 %v4873_v50 }
 0xbb6   :  { %3639 = vmatpush.msra.mxu2 %v4874_v51 }
 0xbb8   :  { %3640 = vmatpush.msra.mxu2 %v4875_v13 }
 0xbba   :  { %3641 = vmatpush.msra.mxu2 %v4876_v5 }
 0xbbc   :  { %3642 = vmatpush.msra.mxu2 %v4877_v16 }
 0xbbe   :  { %3643 = vmatpush.msra.mxu2 %v4878_v54 }
 0xbc0   :  { %3644 = vmatpush.msra.mxu2 %v4879_v44 }
 0xbc2   :  { %3645 = vmatpush.msra.mxu2 %v4880_v49 }
 0xbc4   :  { %3646 = vmatpush.msra.mxu2 %v4881_v62 }
 0xbc6   :  { %3647 = vmatpush.msra.mxu2 %v4882_v17 }
 0xbc8   :  { %3648 = vmatpush.msra.mxu2 %v4883_v19 }
 0xc20   :  { %v3508_v23 = vpop.f32.mrf.mxu1 }
 0xc26   :  { %v3468_v63 = vpop.f32.mrf.mxu3  ;;  %v3488_v56 = vpop.f32.mrf.mxu0 }
 0xc27   :  { %v3489_v21 = vadd.f32 %v3488_v56, %v3468_v63 }
 0xc29   :  { %v3531_v22 = vadd.f32 %v3489_v21, %v8831_v43  ;;  %v2198_v43 = vadd.f32 %v7196_v46, %v7298_v61 }
 0xc2b   :  { %v3533_v4 = vadd.f32 %v3531_v22, %v1980_v18  ;;  %v2200_v60 = vadd.f32 %v2198_v43, %v7128_v15 }
 0xc2c   :  { %v3528_v36 = vpop.f32.mrf.mxu2 }
 0xc2d   :  { %v3535_v9 = vmax.f32 %v3533_v4, 0.0  ;;  %v3529_v0 = vadd.f32 %v3528_v36, %v3508_v23 }
 0xc2f   :  { %v3582_v25 = vrot.slane %v3535_v9, 1  ;;  %v3532_v27 = vadd.f32 %v3529_v0, %v8833_v57  ;;  %3556 = vmatmul.f32.vlgmr.msra.gmra.mxu0 %v3535_v9  ;;  %v3628_v33 = vrot.slane %v3535_v9, 2 }
 0xc31   :  { %v3534_v28 = vadd.f32 %v3532_v27, %v1981_v12  ;;  %3603 = vmatmul.f32.vlgmr.msrb.gmra.mxu3 %v3582_v25 }
 0xc33   :  { %v3536_v31 = vmax.f32 %v3534_v28, 0.0 }
 0xc35   :  { %v3583_v32 = vrot.slane %v3536_v31, 1  ;;  %4282 = vmatmul.msk.f32.vlgmr.msrb.gmra.mxu2 %vm2013_vm8, %v3536_v31  ;;  %v3629_v18 = vrot.slane %v3536_v31, 2 }
 0xc37   :  { %4283 = vmatmul.msk.f32.vlgmr.msrb.gmra.mxu1 %vm2013_vm8, %v3583_v32 }
 0xc3d   :  { %3649 = vmatmul.f32.vlgmr.msra.gmra.mxu2 %v3628_v33 }
 0xc3f   :  { %4284 = vmatmul.msk.f32.vlgmr.msra.gmra.mxu1 %vm2013_vm8, %v3629_v18 }
 0xcac   :  { %v3557_v58 = vpop.f32.mrf.mxu0 }
 0xcb4   :  { %v3624_v34 = vpop.f32.mrf.mxu1  ;;  %v3604_v37 = vpop.f32.mrf.mxu3 }
 0xcb5   :  { %v3625_v26 = vadd.f32 %v3624_v34, %v3604_v37 }
 0xcb8   :  { %v3577_v52 = vpop.f32.mrf.mxu2 }
 0xcb9   :  { %v3578_v35 = vadd.f32 %v3577_v52, %v3557_v58 }
 0xcbb   :  { %v3580_v12 = vadd.f32 %v4884_v8, %v3578_v35 }
 0xcbc   :  { %v3670_v40 = vpop.f32.mrf.mxu1 }
 0xcbd   :  { %v3627_v42 = vadd.f32 %v3625_v26, %v3580_v12 }
 0xcc0   :  { %v3650_v41 = vpop.f32.mrf.mxu2 }
 0xcc1   :  { %v3671_v39 = vadd.f32 %v3670_v40, %v3650_v41 }
 0xcc3   :  { %v3673_v45 = vadd.f32 %v3671_v39, %v3627_v42 }
 0xcc5   :  { %v3675_v53 = vperm.slane %v3673_v45, 0 }
 0xcc7   :  { %v3678_v47 = vsel %vm3677_vm9, %v2200_v60, %v3675_v53 }
 0xcc8   :  { %3680 = vst.msk [vmem:[%s8939_s12] sm:$0x3] %vm3679_vm10, %v3678_v47 }

</bundles_post_ra>
